<compile_context>
chip_gen: v6e
topology: v6e:2x2x1
jax: 0.10.0
libtpu: 0.0.40
codegen_flags: <defaults>
</compile_context>

<pallas_src>
import numpy as np

import jax
import jax.numpy as jnp
from jax.experimental import pallas as pl
from jax.experimental.pallas import tpu as pltpu


# ----------------------------------------------------------------------------
# Fixed network geometry (input 3x32x32 is forced by fc1 expecting 32*1*1 feats)
# ----------------------------------------------------------------------------
H0, W0, C0 = 32, 32, 3
K1, C1 = 3, 4
H1, W1 = H0 - K1 + 1, W0 - K1 + 1          # 30, 30
K2, C2 = 3, 6
H2, W2 = H1 - K2 + 1, W1 - K2 + 1          # 28, 28
H2P, W2P = H2 // 2, W2 // 2                # 14, 14
K3, C3 = 5, 16
H3, W3 = H2P - K3 + 1, W2P - K3 + 1        # 10, 10
H3P, W3P = H3 // 2, W3 // 2                # 5, 5
K4, C4 = 5, 32
H4, W4 = H3P - K4 + 1, W3P - K4 + 1        # 1, 1
FC1, FC2, FC3 = 120, 84, 10


# ----------------------------------------------------------------------------
# Fused Pallas kernel
# ----------------------------------------------------------------------------
def _conv_rows(read_rows, in_rows, t_ref, b_ref):
    """Valid conv in packed layout:  relu( sum_kh rows[kh:kh+OH,:] @ T[kh] + b )."""
    kh_total = t_ref.shape[0]
    oh = in_rows - kh_total + 1
    acc = None
    for kh in range(kh_total):
        part = jnp.dot(read_rows(kh, oh), t_ref[kh],
                       preferred_element_type=jnp.float32)
        acc = part if acc is None else acc + part
    return jnp.maximum(acc + b_ref[...], 0.0)


def _pool2x2(a, re_ref, ro_ref, se_ref, so_ref):
    """Exact 2x2 max-pool in packed layout via 0/1 selection matmuls + max."""
    m = jnp.maximum(
        jnp.dot(re_ref[...], a, preferred_element_type=jnp.float32),
        jnp.dot(ro_ref[...], a, preferred_element_type=jnp.float32))
    return jnp.maximum(
        jnp.dot(m, se_ref[...], preferred_element_type=jnp.float32),
        jnp.dot(m, so_ref[...], preferred_element_type=jnp.float32))


def _net_fused_kernel(x_ref, t1_ref, b1_ref, t2_ref, b2_ref,
                      r1e_ref, r1o_ref, s1e_ref, s1o_ref,
                      t3_ref, b3_ref,
                      r2e_ref, r2o_ref, s2e_ref, s2o_ref,
                      t4_ref, b4_ref,
                      wf1_ref, bf1_ref, wf2_ref, bf2_ref, wf3_ref, bf3_ref,
                      out_ref,
                      act1_ref, act2_ref, act3_ref, flat_ref):
    n_batch = flat_ref.shape[0]
    # Batch of 2 is unrolled in-kernel. For large batches, add a grid over the
    # batch axis marked "parallel" (sharded across v7x's two TensorCores) —
    # weights stay VMEM-resident since their block index never changes.
    for n in range(n_batch):
        # conv1 + relu -> (30, 30*4)
        a1 = _conv_rows(lambda kh, oh: x_ref[n, kh:kh + oh, :],
                        x_ref.shape[1], t1_ref, b1_ref)
        act1_ref[...] = a1
        # conv2 + relu -> (28, 28*6)
        a2 = _conv_rows(lambda kh, oh: act1_ref[kh:kh + oh, :],
                        act1_ref.shape[0], t2_ref, b2_ref)
        # pool 2x2 -> (14, 14*6)
        act2_ref[...] = _pool2x2(a2, r1e_ref, r1o_ref, s1e_ref, s1o_ref)
        # conv3 + relu -> (10, 10*16)
        a3 = _conv_rows(lambda kh, oh: act2_ref[kh:kh + oh, :],
                        act2_ref.shape[0], t3_ref, b3_ref)
        # pool 2x2 -> (5, 5*16)
        act3_ref[...] = _pool2x2(a3, r2e_ref, r2o_ref, s2e_ref, s2o_ref)
        # conv4 + relu -> (1, 32)  (1x1 spatial => already the flattened feature)
        a4 = _conv_rows(lambda kh, oh: act3_ref[kh:kh + oh, :],
                        act3_ref.shape[0], t4_ref, b4_ref)
        flat_ref[n:n + 1, :] = a4

    # Fused FC chain, batched over N, still VMEM-resident.
    h = flat_ref[...]                                                  # (N, 32)
    h = jnp.maximum(jnp.dot(h, wf1_ref[...],
                            preferred_element_type=jnp.float32) + bf1_ref[...], 0.0)
    h = jnp.maximum(jnp.dot(h, wf2_ref[...],
                            preferred_element_type=jnp.float32) + bf2_ref[...], 0.0)
    out_ref[...] = (jnp.dot(h, wf3_ref[...],
                            preferred_element_type=jnp.float32)
                    + bf3_ref[...]).astype(out_ref.dtype)


# ----------------------------------------------------------------------------
# One-time host-side weight packing (pre-transformed weights: no transposes,
# im2col or pooling glue left in the forward path)
# ----------------------------------------------------------------------------
def _np(a):
    return np.asarray(jax.device_get(a), np.float32)


def _toeplitz_conv(w_oikk, w_in):
    """PyTorch conv weight (OC, IC, KH, KW) -> (KH, W_in*IC, OW*OC) matrices
    for the packed row layout: T[kh][(ow+kw)*IC+ic, ow*OC+oc] = W[oc,ic,kh,kw]."""
    w = _np(w_oikk)
    oc, ic, kh_n, kw_n = w.shape
    ow = w_in - kw_n + 1
    t = np.zeros((kh_n, w_in * ic, ow * oc), np.float32)
    for kh in range(kh_n):
        for owi in range(ow):
            for kw in range(kw_n):
                wp = owi + kw
                t[kh, wp * ic:(wp + 1) * ic, owi * oc:(owi + 1) * oc] = w[:, :, kh, kw].T
    return t


def _bias_row(b, ow):
    return np.tile(_np(b), ow)[None, :]


def _pool_row_select(h_in):
    h_out = h_in // 2
    re = np.zeros((h_out, h_in), np.float32)
    ro = np.zeros((h_out, h_in), np.float32)
    for p in range(h_out):
        re[p, 2 * p] = 1.0
        ro[p, 2 * p + 1] = 1.0
    return re, ro


def _pool_col_select(w_in, c):
    w_out = w_in // 2
    se = np.zeros((w_in * c, w_out * c), np.float32)
    so = np.zeros((w_in * c, w_out * c), np.float32)
    for ow in range(w_out):
        for ch in range(c):
            se[(2 * ow) * c + ch, ow * c + ch] = 1.0
            so[(2 * ow + 1) * c + ch, ow * c + ch] = 1.0
    return se, so


def prepare_params(params):
    r1e, r1o = _pool_row_select(H2)
    s1e, s1o = _pool_col_select(W2, C2)
    r2e, r2o = _pool_row_select(H3)
    s2e, s2o = _pool_col_select(W3, C3)
    packed = {
        "t1": _toeplitz_conv(params["conv1_w"], W0), "b1": _bias_row(params["conv1_b"], W1),
        "t2": _toeplitz_conv(params["conv2_w"], W1), "b2": _bias_row(params["conv2_b"], W2),
        "r1e": r1e, "r1o": r1o, "s1e": s1e, "s1o": s1o,
        "t3": _toeplitz_conv(params["conv3_w"], W2P), "b3": _bias_row(params["conv3_b"], W3),
        "r2e": r2e, "r2o": r2o, "s2e": s2e, "s2o": s2o,
        "t4": _toeplitz_conv(params["conv4_w"], W3P), "b4": _bias_row(params["conv4_b"], W4),
        "wf1": _np(params["fc1_w"]).T, "bf1": _np(params["fc1_b"])[None, :],
        "wf2": _np(params["fc2_w"]).T, "bf2": _np(params["fc2_b"])[None, :],
        "wf3": _np(params["fc3_w"]).T, "bf3": _np(params["fc3_b"])[None, :],
    }
    return {k: jnp.asarray(v) for k, v in packed.items()}


# ----------------------------------------------------------------------------
# Forward pass: one fused pallas_call
# ----------------------------------------------------------------------------
@jax.jit
def net_forward(packed, x_nchw):
    n, c, h, w = x_nchw.shape
    assert (c, h, w) == (C0, H0, W0), \
        "Net requires 3x32x32 input (fc1 expects 32*1*1 features after conv4)"
    # NCHW -> packed rows  X[n, h, w*C + c]   (only XLA op left outside the kernel)
    xp = jnp.transpose(x_nchw, (0, 2, 3, 1)).reshape(n, H0, W0 * C0).astype(jnp.float32)

    operands = (xp,
                packed["t1"], packed["b1"], packed["t2"], packed["b2"],
                packed["r1e"], packed["r1o"], packed["s1e"], packed["s1o"],
                packed["t3"], packed["b3"],
                packed["r2e"], packed["r2o"], packed["s2e"], packed["s2o"],
                packed["t4"], packed["b4"],
                packed["wf1"], packed["bf1"], packed["wf2"], packed["bf2"],
                packed["wf3"], packed["bf3"])
    vmem_spec = pl.BlockSpec(memory_space=pltpu.MemorySpace.VMEM)
    return pl.pallas_call(
        _net_fused_kernel,
        out_shape=jax.ShapeDtypeStruct((n, FC3), jnp.float32),
        in_specs=[vmem_spec] * len(operands),
        out_specs=vmem_spec,
        scratch_shapes=[
            pltpu.VMEM((H1, W1 * C1), jnp.float32),    # conv1 out  (30, 120)
            pltpu.VMEM((H2P, W2P * C2), jnp.float32),  # pool1 out  (14, 84)
            pltpu.VMEM((H3P, W3P * C3), jnp.float32),  # pool2 out  (5, 80)
            pltpu.VMEM((n, C4), jnp.float32),          # flattened conv4 out (N, 32)
        ],
    )(*operands)


# ----------------------------------------------------------------------------
# Parameter init (deterministic, synthetic) — PyTorch layouts preserved
# ----------------------------------------------------------------------------
def init_params(key):
    def conv_w(k, oc, ic, kk):
        scale = 1.0 / jnp.sqrt(ic * kk * kk)
        return jax.random.uniform(k, (oc, ic, kk, kk), jnp.float32, -scale, scale)

    def lin_w(k, out, inp):
        scale = 1.0 / jnp.sqrt(inp)
        return jax.random.uniform(k, (out, inp), jnp.float32, -scale, scale)

    ks = jax.random.split(key, 14)
    return {
        "conv1_w": conv_w(ks[0], C1, C0, K1),
        "conv1_b": jax.random.uniform(ks[1], (C1,), jnp.float32, -0.1, 0.1),
        "conv2_w": conv_w(ks[2], C2, C1, K2),
        "conv2_b": jax.random.uniform(ks[3], (C2,), jnp.float32, -0.1, 0.1),
        "conv3_w": conv_w(ks[4], C3, C2, K3),
        "conv3_b": jax.random.uniform(ks[5], (C3,), jnp.float32, -0.1, 0.1),
        "conv4_w": conv_w(ks[6], C4, C3, K4),
        "conv4_b": jax.random.uniform(ks[7], (C4,), jnp.float32, -0.1, 0.1),
        "fc1_w": lin_w(ks[8], FC1, C4),
        "fc1_b": jax.random.uniform(ks[9], (FC1,), jnp.float32, -0.1, 0.1),
        "fc2_w": lin_w(ks[10], FC2, FC1),
        "fc2_b": jax.random.uniform(ks[11], (FC2,), jnp.float32, -0.1, 0.1),
        "fc3_w": lin_w(ks[12], FC3, FC2),
        "fc3_b": jax.random.uniform(ks[13], (FC3,), jnp.float32, -0.1, 0.1),
    }


# ----------------------------------------------------------------------------
# Pure-JAX reference of the same forward pass (correctness check only)
# ----------------------------------------------------------------------------
def ref_forward(params, x):
    def conv(x, w, b):
        y = jax.lax.conv_general_dilated(
            x, w, window_strides=(1, 1), padding="VALID",
            dimension_numbers=("NCHW", "OIHW", "NCHW"))
        return jax.nn.relu(y + b.reshape(1, -1, 1, 1))

    def pool(x):
        return jnp.maximum(
            jnp.maximum(x[:, :, 0::2, 0::2], x[:, :, 0::2, 1::2]),
            jnp.maximum(x[:, :, 1::2, 0::2], x[:, :, 1::2, 1::2]))

    x = conv(x, params["conv1_w"], params["conv1_b"])
    x = conv(x, params["conv2_w"], params["conv2_b"])
    x = pool(x)
    x = conv(x, params["conv3_w"], params["conv3_b"])
    x = pool(x)
    x = conv(x, params["conv4_w"], params["conv4_b"])
    x = x.reshape(-1, C4)
    x = jax.nn.relu(x @ params["fc1_w"].T + params["fc1_b"])
    x = jax.nn.relu(x @ params["fc2_w"].T + params["fc2_b"])
    return x @ params["fc3_w"].T + params["fc3_b"]


if __name__ == "__main__":
    key = jax.random.PRNGKey(0)
    k_param, k_x = jax.random.split(key)
    params = init_params(k_param)
    packed = prepare_params(params)
    # Input in PyTorch NCHW layout: batch=2, channels=3, 32x32 spatial
    # (spatial size forced by fc1 expecting 32*1*1 features after conv4).
    x = jax.random.normal(k_x, (2, 3, 32, 32), dtype=jnp.float32)

    out = jax.block_until_ready(net_forward(packed, x))
    assert out.shape == (2, FC3), out.shape

    # Verify the fused kernel against the plain-JAX reference.
    ref = jax.block_until_ready(jax.jit(ref_forward)(params, x))
    np.testing.assert_allclose(np.asarray(out), np.asarray(ref),
                               rtol=2e-4, atol=2e-4)
    print("KERNEL_OK")
</pallas_src>

<mosaic_0001>
module attributes {stable_mosaic.version = 11 : i64} {
  func.func @_net_fused_kernel(%arg0: memref<2x32x96xf32, #tpu.memory_space<vmem>>, %arg1: memref<3x96x120xf32, #tpu.memory_space<vmem>>, %arg2: memref<1x120xf32, #tpu.memory_space<vmem>>, %arg3: memref<3x120x168xf32, #tpu.memory_space<vmem>>, %arg4: memref<1x168xf32, #tpu.memory_space<vmem>>, %arg5: memref<14x28xf32, #tpu.memory_space<vmem>>, %arg6: memref<14x28xf32, #tpu.memory_space<vmem>>, %arg7: memref<168x84xf32, #tpu.memory_space<vmem>>, %arg8: memref<168x84xf32, #tpu.memory_space<vmem>>, %arg9: memref<5x84x160xf32, #tpu.memory_space<vmem>>, %arg10: memref<1x160xf32, #tpu.memory_space<vmem>>, %arg11: memref<5x10xf32, #tpu.memory_space<vmem>>, %arg12: memref<5x10xf32, #tpu.memory_space<vmem>>, %arg13: memref<160x80xf32, #tpu.memory_space<vmem>>, %arg14: memref<160x80xf32, #tpu.memory_space<vmem>>, %arg15: memref<5x80x32xf32, #tpu.memory_space<vmem>>, %arg16: memref<1x32xf32, #tpu.memory_space<vmem>>, %arg17: memref<32x120xf32, #tpu.memory_space<vmem>>, %arg18: memref<1x120xf32, #tpu.memory_space<vmem>>, %arg19: memref<120x84xf32, #tpu.memory_space<vmem>>, %arg20: memref<1x84xf32, #tpu.memory_space<vmem>>, %arg21: memref<84x10xf32, #tpu.memory_space<vmem>>, %arg22: memref<1x10xf32, #tpu.memory_space<vmem>>, %arg23: memref<2x10xf32, #tpu.memory_space<vmem>>, %arg24: memref<30x120xf32, #tpu.memory_space<vmem>>, %arg25: memref<14x84xf32, #tpu.memory_space<vmem>>, %arg26: memref<5x80xf32, #tpu.memory_space<vmem>>, %arg27: memref<2x32xf32, #tpu.memory_space<vmem>>) attributes {dimension_semantics = [], scalar_prefetch = 0 : i64, scratch_operands = 4 : i64, tpu.core_type = #tpu.core_type<tc>} {
    %c0 = arith.constant 0 : index
    %c0_0 = arith.constant 0 : index
    %c0_1 = arith.constant 0 : index
    %0 = vector.load %arg0[%c0, %c0_0, %c0_1] : memref<2x32x96xf32, #tpu.memory_space<vmem>>, vector<1x30x96xf32>
    %1 = vector.shape_cast %0 : vector<1x30x96xf32> to vector<30x96xf32>
    %c0_2 = arith.constant 0 : index
    %c0_3 = arith.constant 0 : index
    %c0_4 = arith.constant 0 : index
    %2 = vector.load %arg1[%c0_2, %c0_3, %c0_4] : memref<3x96x120xf32, #tpu.memory_space<vmem>>, vector<1x96x120xf32>
    %3 = vector.shape_cast %2 : vector<1x96x120xf32> to vector<96x120xf32>
    %cst = arith.constant dense<0.000000e+00> : vector<30x120xf32>
    %4 = tpu.matmul %1, %3, %cst {dimension_numbers = #tpu.dot_dimension_numbers<[1], [0], [0], [1], [0, 0, 1, 1], [], []>} : vector<30x96xf32>, vector<96x120xf32>, vector<30x120xf32> -> vector<30x120xf32>
    %c0_5 = arith.constant 0 : index
    %c1 = arith.constant 1 : index
    %c0_6 = arith.constant 0 : index
    %5 = vector.load %arg0[%c0_5, %c1, %c0_6] : memref<2x32x96xf32, #tpu.memory_space<vmem>>, vector<1x30x96xf32>
    %6 = vector.shape_cast %5 : vector<1x30x96xf32> to vector<30x96xf32>
    %c1_7 = arith.constant 1 : index
    %c0_8 = arith.constant 0 : index
    %c0_9 = arith.constant 0 : index
    %7 = vector.load %arg1[%c1_7, %c0_8, %c0_9] : memref<3x96x120xf32, #tpu.memory_space<vmem>>, vector<1x96x120xf32>
    %8 = vector.shape_cast %7 : vector<1x96x120xf32> to vector<96x120xf32>
    %cst_10 = arith.constant dense<0.000000e+00> : vector<30x120xf32>
    %9 = tpu.matmul %6, %8, %cst_10 {dimension_numbers = #tpu.dot_dimension_numbers<[1], [0], [0], [1], [0, 0, 1, 1], [], []>} : vector<30x96xf32>, vector<96x120xf32>, vector<30x120xf32> -> vector<30x120xf32>
    %10 = arith.addf %4, %9 : vector<30x120xf32>
    %c0_11 = arith.constant 0 : index
    %c2 = arith.constant 2 : index
    %c0_12 = arith.constant 0 : index
    %11 = vector.load %arg0[%c0_11, %c2, %c0_12] : memref<2x32x96xf32, #tpu.memory_space<vmem>>, vector<1x30x96xf32>
    %12 = vector.shape_cast %11 : vector<1x30x96xf32> to vector<30x96xf32>
    %c2_13 = arith.constant 2 : index
    %c0_14 = arith.constant 0 : index
    %c0_15 = arith.constant 0 : index
    %13 = vector.load %arg1[%c2_13, %c0_14, %c0_15] : memref<3x96x120xf32, #tpu.memory_space<vmem>>, vector<1x96x120xf32>
    %14 = vector.shape_cast %13 : vector<1x96x120xf32> to vector<96x120xf32>
    %cst_16 = arith.constant dense<0.000000e+00> : vector<30x120xf32>
    %15 = tpu.matmul %12, %14, %cst_16 {dimension_numbers = #tpu.dot_dimension_numbers<[1], [0], [0], [1], [0, 0, 1, 1], [], []>} : vector<30x96xf32>, vector<96x120xf32>, vector<30x120xf32> -> vector<30x120xf32>
    %16 = arith.addf %10, %15 : vector<30x120xf32>
    %c0_17 = arith.constant 0 : index
    %c0_18 = arith.constant 0 : index
    %17 = vector.load %arg2[%c0_17, %c0_18] : memref<1x120xf32, #tpu.memory_space<vmem>>, vector<1x120xf32>
    %18 = vector.broadcast %17 : vector<1x120xf32> to vector<30x120xf32>
    %19 = arith.addf %16, %18 : vector<30x120xf32>
    %cst_19 = arith.constant 0.000000e+00 : f32
    %20 = vector.broadcast %cst_19 : f32 to vector<30x120xf32>
    %21 = arith.maximumf %19, %20 : vector<30x120xf32>
    %c0_20 = arith.constant 0 : index
    %c0_21 = arith.constant 0 : index
    %22 = vector.load %arg24[%c0_20, %c0_21] : memref<30x120xf32, #tpu.memory_space<vmem>>, vector<30x120xf32>
    tpu.vector_store %arg24[%c0_20, %c0_21], %21 {strides = array<i32>} : memref<30x120xf32, #tpu.memory_space<vmem>>, vector<30x120xf32>,
    %c0_22 = arith.constant 0 : index
    %c0_23 = arith.constant 0 : index
    %23 = vector.load %arg24[%c0_22, %c0_23] : memref<30x120xf32, #tpu.memory_space<vmem>>, vector<28x120xf32>
    %c0_24 = arith.constant 0 : index
    %c0_25 = arith.constant 0 : index
    %c0_26 = arith.constant 0 : index
    %24 = vector.load %arg3[%c0_24, %c0_25, %c0_26] : memref<3x120x168xf32, #tpu.memory_space<vmem>>, vector<1x120x168xf32>
    %25 = vector.shape_cast %24 : vector<1x120x168xf32> to vector<120x168xf32>
    %cst_27 = arith.constant dense<0.000000e+00> : vector<28x168xf32>
    %26 = tpu.matmul %23, %25, %cst_27 {dimension_numbers = #tpu.dot_dimension_numbers<[1], [0], [0], [1], [0, 0, 1, 1], [], []>} : vector<28x120xf32>, vector<120x168xf32>, vector<28x168xf32> -> vector<28x168xf32>
    %c1_28 = arith.constant 1 : index
    %c0_29 = arith.constant 0 : index
    %27 = vector.load %arg24[%c1_28, %c0_29] : memref<30x120xf32, #tpu.memory_space<vmem>>, vector<28x120xf32>
    %c1_30 = arith.constant 1 : index
    %c0_31 = arith.constant 0 : index
    %c0_32 = arith.constant 0 : index
    %28 = vector.load %arg3[%c1_30, %c0_31, %c0_32] : memref<3x120x168xf32, #tpu.memory_space<vmem>>, vector<1x120x168xf32>
    %29 = vector.shape_cast %28 : vector<1x120x168xf32> to vector<120x168xf32>
    %cst_33 = arith.constant dense<0.000000e+00> : vector<28x168xf32>
    %30 = tpu.matmul %27, %29, %cst_33 {dimension_numbers = #tpu.dot_dimension_numbers<[1], [0], [0], [1], [0, 0, 1, 1], [], []>} : vector<28x120xf32>, vector<120x168xf32>, vector<28x168xf32> -> vector<28x168xf32>
    %31 = arith.addf %26, %30 : vector<28x168xf32>
    %c2_34 = arith.constant 2 : index
    %c0_35 = arith.constant 0 : index
    %32 = vector.load %arg24[%c2_34, %c0_35] : memref<30x120xf32, #tpu.memory_space<vmem>>, vector<28x120xf32>
    %c2_36 = arith.constant 2 : index
    %c0_37 = arith.constant 0 : index
    %c0_38 = arith.constant 0 : index
    %33 = vector.load %arg3[%c2_36, %c0_37, %c0_38] : memref<3x120x168xf32, #tpu.memory_space<vmem>>, vector<1x120x168xf32>
    %34 = vector.shape_cast %33 : vector<1x120x168xf32> to vector<120x168xf32>
    %cst_39 = arith.constant dense<0.000000e+00> : vector<28x168xf32>
    %35 = tpu.matmul %32, %34, %cst_39 {dimension_numbers = #tpu.dot_dimension_numbers<[1], [0], [0], [1], [0, 0, 1, 1], [], []>} : vector<28x120xf32>, vector<120x168xf32>, vector<28x168xf32> -> vector<28x168xf32>
    %36 = arith.addf %31, %35 : vector<28x168xf32>
    %c0_40 = arith.constant 0 : index
    %c0_41 = arith.constant 0 : index
    %37 = vector.load %arg4[%c0_40, %c0_41] : memref<1x168xf32, #tpu.memory_space<vmem>>, vector<1x168xf32>
    %38 = vector.broadcast %37 : vector<1x168xf32> to vector<28x168xf32>
    %39 = arith.addf %36, %38 : vector<28x168xf32>
    %cst_42 = arith.constant 0.000000e+00 : f32
    %40 = vector.broadcast %cst_42 : f32 to vector<28x168xf32>
    %41 = arith.maximumf %39, %40 : vector<28x168xf32>
    %c0_43 = arith.constant 0 : index
    %c0_44 = arith.constant 0 : index
    %42 = vector.load %arg5[%c0_43, %c0_44] : memref<14x28xf32, #tpu.memory_space<vmem>>, vector<14x28xf32>
    %cst_45 = arith.constant dense<0.000000e+00> : vector<14x168xf32>
    %43 = tpu.matmul %42, %41, %cst_45 {dimension_numbers = #tpu.dot_dimension_numbers<[1], [0], [0], [1], [0, 0, 1, 1], [], []>} : vector<14x28xf32>, vector<28x168xf32>, vector<14x168xf32> -> vector<14x168xf32>
    %c0_46 = arith.constant 0 : index
    %c0_47 = arith.constant 0 : index
    %44 = vector.load %arg6[%c0_46, %c0_47] : memref<14x28xf32, #tpu.memory_space<vmem>>, vector<14x28xf32>
    %cst_48 = arith.constant dense<0.000000e+00> : vector<14x168xf32>
    %45 = tpu.matmul %44, %41, %cst_48 {dimension_numbers = #tpu.dot_dimension_numbers<[1], [0], [0], [1], [0, 0, 1, 1], [], []>} : vector<14x28xf32>, vector<28x168xf32>, vector<14x168xf32> -> vector<14x168xf32>
    %46 = arith.maximumf %43, %45 : vector<14x168xf32>
    %c0_49 = arith.constant 0 : index
    %c0_50 = arith.constant 0 : index
    %47 = vector.load %arg7[%c0_49, %c0_50] : memref<168x84xf32, #tpu.memory_space<vmem>>, vector<168x84xf32>
    %cst_51 = arith.constant dense<0.000000e+00> : vector<14x84xf32>
    %48 = tpu.matmul %46, %47, %cst_51 {dimension_numbers = #tpu.dot_dimension_numbers<[1], [0], [0], [1], [0, 0, 1, 1], [], []>} : vector<14x168xf32>, vector<168x84xf32>, vector<14x84xf32> -> vector<14x84xf32>
    %c0_52 = arith.constant 0 : index
    %c0_53 = arith.constant 0 : index
    %49 = vector.load %arg8[%c0_52, %c0_53] : memref<168x84xf32, #tpu.memory_space<vmem>>, vector<168x84xf32>
    %cst_54 = arith.constant dense<0.000000e+00> : vector<14x84xf32>
    %50 = tpu.matmul %46, %49, %cst_54 {dimension_numbers = #tpu.dot_dimension_numbers<[1], [0], [0], [1], [0, 0, 1, 1], [], []>} : vector<14x168xf32>, vector<168x84xf32>, vector<14x84xf32> -> vector<14x84xf32>
    %51 = arith.maximumf %48, %50 : vector<14x84xf32>
    %c0_55 = arith.constant 0 : index
    %c0_56 = arith.constant 0 : index
    %52 = vector.load %arg25[%c0_55, %c0_56] : memref<14x84xf32, #tpu.memory_space<vmem>>, vector<14x84xf32>
    tpu.vector_store %arg25[%c0_55, %c0_56], %51 {strides = array<i32>} : memref<14x84xf32, #tpu.memory_space<vmem>>, vector<14x84xf32>,
    %c0_57 = arith.constant 0 : index
    %c0_58 = arith.constant 0 : index
    %53 = vector.load %arg25[%c0_57, %c0_58] : memref<14x84xf32, #tpu.memory_space<vmem>>, vector<10x84xf32>
    %c0_59 = arith.constant 0 : index
    %c0_60 = arith.constant 0 : index
    %c0_61 = arith.constant 0 : index
    %54 = vector.load %arg9[%c0_59, %c0_60, %c0_61] : memref<5x84x160xf32, #tpu.memory_space<vmem>>, vector<1x84x160xf32>
    %55 = vector.shape_cast %54 : vector<1x84x160xf32> to vector<84x160xf32>
    %cst_62 = arith.constant dense<0.000000e+00> : vector<10x160xf32>
    %56 = tpu.matmul %53, %55, %cst_62 {dimension_numbers = #tpu.dot_dimension_numbers<[1], [0], [0], [1], [0, 0, 1, 1], [], []>} : vector<10x84xf32>, vector<84x160xf32>, vector<10x160xf32> -> vector<10x160xf32>
    %c1_63 = arith.constant 1 : index
    %c0_64 = arith.constant 0 : index
    %57 = vector.load %arg25[%c1_63, %c0_64] : memref<14x84xf32, #tpu.memory_space<vmem>>, vector<10x84xf32>
    %c1_65 = arith.constant 1 : index
    %c0_66 = arith.constant 0 : index
    %c0_67 = arith.constant 0 : index
    %58 = vector.load %arg9[%c1_65, %c0_66, %c0_67] : memref<5x84x160xf32, #tpu.memory_space<vmem>>, vector<1x84x160xf32>
    %59 = vector.shape_cast %58 : vector<1x84x160xf32> to vector<84x160xf32>
    %cst_68 = arith.constant dense<0.000000e+00> : vector<10x160xf32>
    %60 = tpu.matmul %57, %59, %cst_68 {dimension_numbers = #tpu.dot_dimension_numbers<[1], [0], [0], [1], [0, 0, 1, 1], [], []>} : vector<10x84xf32>, vector<84x160xf32>, vector<10x160xf32> -> vector<10x160xf32>
    %61 = arith.addf %56, %60 : vector<10x160xf32>
    %c2_69 = arith.constant 2 : index
    %c0_70 = arith.constant 0 : index
    %62 = vector.load %arg25[%c2_69, %c0_70] : memref<14x84xf32, #tpu.memory_space<vmem>>, vector<10x84xf32>
    %c2_71 = arith.constant 2 : index
    %c0_72 = arith.constant 0 : index
    %c0_73 = arith.constant 0 : index
    %63 = vector.load %arg9[%c2_71, %c0_72, %c0_73] : memref<5x84x160xf32, #tpu.memory_space<vmem>>, vector<1x84x160xf32>
    %64 = vector.shape_cast %63 : vector<1x84x160xf32> to vector<84x160xf32>
    %cst_74 = arith.constant dense<0.000000e+00> : vector<10x160xf32>
    %65 = tpu.matmul %62, %64, %cst_74 {dimension_numbers = #tpu.dot_dimension_numbers<[1], [0], [0], [1], [0, 0, 1, 1], [], []>} : vector<10x84xf32>, vector<84x160xf32>, vector<10x160xf32> -> vector<10x160xf32>
    %66 = arith.addf %61, %65 : vector<10x160xf32>
    %c3 = arith.constant 3 : index
    %c0_75 = arith.constant 0 : index
    %67 = vector.load %arg25[%c3, %c0_75] : memref<14x84xf32, #tpu.memory_space<vmem>>, vector<10x84xf32>
    %c3_76 = arith.constant 3 : index
    %c0_77 = arith.constant 0 : index
    %c0_78 = arith.constant 0 : index
    %68 = vector.load %arg9[%c3_76, %c0_77, %c0_78] : memref<5x84x160xf32, #tpu.memory_space<vmem>>, vector<1x84x160xf32>
    %69 = vector.shape_cast %68 : vector<1x84x160xf32> to vector<84x160xf32>
    %cst_79 = arith.constant dense<0.000000e+00> : vector<10x160xf32>
    %70 = tpu.matmul %67, %69, %cst_79 {dimension_numbers = #tpu.dot_dimension_numbers<[1], [0], [0], [1], [0, 0, 1, 1], [], []>} : vector<10x84xf32>, vector<84x160xf32>, vector<10x160xf32> -> vector<10x160xf32>
    %71 = arith.addf %66, %70 : vector<10x160xf32>
    %c4 = arith.constant 4 : index
    %c0_80 = arith.constant 0 : index
    %72 = vector.load %arg25[%c4, %c0_80] : memref<14x84xf32, #tpu.memory_space<vmem>>, vector<10x84xf32>
    %c4_81 = arith.constant 4 : index
    %c0_82 = arith.constant 0 : index
    %c0_83 = arith.constant 0 : index
    %73 = vector.load %arg9[%c4_81, %c0_82, %c0_83] : memref<5x84x160xf32, #tpu.memory_space<vmem>>, vector<1x84x160xf32>
    %74 = vector.shape_cast %73 : vector<1x84x160xf32> to vector<84x160xf32>
    %cst_84 = arith.constant dense<0.000000e+00> : vector<10x160xf32>
    %75 = tpu.matmul %72, %74, %cst_84 {dimension_numbers = #tpu.dot_dimension_numbers<[1], [0], [0], [1], [0, 0, 1, 1], [], []>} : vector<10x84xf32>, vector<84x160xf32>, vector<10x160xf32> -> vector<10x160xf32>
    %76 = arith.addf %71, %75 : vector<10x160xf32>
    %c0_85 = arith.constant 0 : index
    %c0_86 = arith.constant 0 : index
    %77 = vector.load %arg10[%c0_85, %c0_86] : memref<1x160xf32, #tpu.memory_space<vmem>>, vector<1x160xf32>
    %78 = vector.broadcast %77 : vector<1x160xf32> to vector<10x160xf32>
    %79 = arith.addf %76, %78 : vector<10x160xf32>
    %cst_87 = arith.constant 0.000000e+00 : f32
    %80 = vector.broadcast %cst_87 : f32 to vector<10x160xf32>
    %81 = arith.maximumf %79, %80 : vector<10x160xf32>
    %c0_88 = arith.constant 0 : index
    %c0_89 = arith.constant 0 : index
    %82 = vector.load %arg11[%c0_88, %c0_89] : memref<5x10xf32, #tpu.memory_space<vmem>>, vector<5x10xf32>
    %cst_90 = arith.constant dense<0.000000e+00> : vector<5x160xf32>
    %83 = tpu.matmul %82, %81, %cst_90 {dimension_numbers = #tpu.dot_dimension_numbers<[1], [0], [0], [1], [0, 0, 1, 1], [], []>} : vector<5x10xf32>, vector<10x160xf32>, vector<5x160xf32> -> vector<5x160xf32>
    %c0_91 = arith.constant 0 : index
    %c0_92 = arith.constant 0 : index
    %84 = vector.load %arg12[%c0_91, %c0_92] : memref<5x10xf32, #tpu.memory_space<vmem>>, vector<5x10xf32>
    %cst_93 = arith.constant dense<0.000000e+00> : vector<5x160xf32>
    %85 = tpu.matmul %84, %81, %cst_93 {dimension_numbers = #tpu.dot_dimension_numbers<[1], [0], [0], [1], [0, 0, 1, 1], [], []>} : vector<5x10xf32>, vector<10x160xf32>, vector<5x160xf32> -> vector<5x160xf32>
    %86 = arith.maximumf %83, %85 : vector<5x160xf32>
    %c0_94 = arith.constant 0 : index
    %c0_95 = arith.constant 0 : index
    %87 = vector.load %arg13[%c0_94, %c0_95] : memref<160x80xf32, #tpu.memory_space<vmem>>, vector<160x80xf32>
    %cst_96 = arith.constant dense<0.000000e+00> : vector<5x80xf32>
    %88 = tpu.matmul %86, %87, %cst_96 {dimension_numbers = #tpu.dot_dimension_numbers<[1], [0], [0], [1], [0, 0, 1, 1], [], []>} : vector<5x160xf32>, vector<160x80xf32>, vector<5x80xf32> -> vector<5x80xf32>
    %c0_97 = arith.constant 0 : index
    %c0_98 = arith.constant 0 : index
    %89 = vector.load %arg14[%c0_97, %c0_98] : memref<160x80xf32, #tpu.memory_space<vmem>>, vector<160x80xf32>
    %cst_99 = arith.constant dense<0.000000e+00> : vector<5x80xf32>
    %90 = tpu.matmul %86, %89, %cst_99 {dimension_numbers = #tpu.dot_dimension_numbers<[1], [0], [0], [1], [0, 0, 1, 1], [], []>} : vector<5x160xf32>, vector<160x80xf32>, vector<5x80xf32> -> vector<5x80xf32>
    %91 = arith.maximumf %88, %90 : vector<5x80xf32>
    %c0_100 = arith.constant 0 : index
    %c0_101 = arith.constant 0 : index
    %92 = vector.load %arg26[%c0_100, %c0_101] : memref<5x80xf32, #tpu.memory_space<vmem>>, vector<5x80xf32>
    tpu.vector_store %arg26[%c0_100, %c0_101], %91 {strides = array<i32>} : memref<5x80xf32, #tpu.memory_space<vmem>>, vector<5x80xf32>,
    %c0_102 = arith.constant 0 : index
    %c0_103 = arith.constant 0 : index
    %93 = vector.load %arg26[%c0_102, %c0_103] : memref<5x80xf32, #tpu.memory_space<vmem>>, vector<1x80xf32>
    %c0_104 = arith.constant 0 : index
    %c0_105 = arith.constant 0 : index
    %c0_106 = arith.constant 0 : index
    %94 = vector.load %arg15[%c0_104, %c0_105, %c0_106] : memref<5x80x32xf32, #tpu.memory_space<vmem>>, vector<1x80x32xf32>
    %95 = vector.shape_cast %94 : vector<1x80x32xf32> to vector<80x32xf32>
    %cst_107 = arith.constant dense<0.000000e+00> : vector<1x32xf32>
    %96 = tpu.matmul %93, %95, %cst_107 {dimension_numbers = #tpu.dot_dimension_numbers<[1], [0], [0], [1], [0, 0, 1, 1], [], []>} : vector<1x80xf32>, vector<80x32xf32>, vector<1x32xf32> -> vector<1x32xf32>
    %c1_108 = arith.constant 1 : index
    %c0_109 = arith.constant 0 : index
    %97 = vector.load %arg26[%c1_108, %c0_109] : memref<5x80xf32, #tpu.memory_space<vmem>>, vector<1x80xf32>
    %c1_110 = arith.constant 1 : index
    %c0_111 = arith.constant 0 : index
    %c0_112 = arith.constant 0 : index
    %98 = vector.load %arg15[%c1_110, %c0_111, %c0_112] : memref<5x80x32xf32, #tpu.memory_space<vmem>>, vector<1x80x32xf32>
    %99 = vector.shape_cast %98 : vector<1x80x32xf32> to vector<80x32xf32>
    %cst_113 = arith.constant dense<0.000000e+00> : vector<1x32xf32>
    %100 = tpu.matmul %97, %99, %cst_113 {dimension_numbers = #tpu.dot_dimension_numbers<[1], [0], [0], [1], [0, 0, 1, 1], [], []>} : vector<1x80xf32>, vector<80x32xf32>, vector<1x32xf32> -> vector<1x32xf32>
    %101 = arith.addf %96, %100 : vector<1x32xf32>
    %c2_114 = arith.constant 2 : index
    %c0_115 = arith.constant 0 : index
    %102 = vector.load %arg26[%c2_114, %c0_115] : memref<5x80xf32, #tpu.memory_space<vmem>>, vector<1x80xf32>
    %c2_116 = arith.constant 2 : index
    %c0_117 = arith.constant 0 : index
    %c0_118 = arith.constant 0 : index
    %103 = vector.load %arg15[%c2_116, %c0_117, %c0_118] : memref<5x80x32xf32, #tpu.memory_space<vmem>>, vector<1x80x32xf32>
    %104 = vector.shape_cast %103 : vector<1x80x32xf32> to vector<80x32xf32>
    %cst_119 = arith.constant dense<0.000000e+00> : vector<1x32xf32>
    %105 = tpu.matmul %102, %104, %cst_119 {dimension_numbers = #tpu.dot_dimension_numbers<[1], [0], [0], [1], [0, 0, 1, 1], [], []>} : vector<1x80xf32>, vector<80x32xf32>, vector<1x32xf32> -> vector<1x32xf32>
    %106 = arith.addf %101, %105 : vector<1x32xf32>
    %c3_120 = arith.constant 3 : index
    %c0_121 = arith.constant 0 : index
    %107 = vector.load %arg26[%c3_120, %c0_121] : memref<5x80xf32, #tpu.memory_space<vmem>>, vector<1x80xf32>
    %c3_122 = arith.constant 3 : index
    %c0_123 = arith.constant 0 : index
    %c0_124 = arith.constant 0 : index
    %108 = vector.load %arg15[%c3_122, %c0_123, %c0_124] : memref<5x80x32xf32, #tpu.memory_space<vmem>>, vector<1x80x32xf32>
    %109 = vector.shape_cast %108 : vector<1x80x32xf32> to vector<80x32xf32>
    %cst_125 = arith.constant dense<0.000000e+00> : vector<1x32xf32>
    %110 = tpu.matmul %107, %109, %cst_125 {dimension_numbers = #tpu.dot_dimension_numbers<[1], [0], [0], [1], [0, 0, 1, 1], [], []>} : vector<1x80xf32>, vector<80x32xf32>, vector<1x32xf32> -> vector<1x32xf32>
    %111 = arith.addf %106, %110 : vector<1x32xf32>
    %c4_126 = arith.constant 4 : index
    %c0_127 = arith.constant 0 : index
    %112 = vector.load %arg26[%c4_126, %c0_127] : memref<5x80xf32, #tpu.memory_space<vmem>>, vector<1x80xf32>
    %c4_128 = arith.constant 4 : index
    %c0_129 = arith.constant 0 : index
    %c0_130 = arith.constant 0 : index
    %113 = vector.load %arg15[%c4_128, %c0_129, %c0_130] : memref<5x80x32xf32, #tpu.memory_space<vmem>>, vector<1x80x32xf32>
    %114 = vector.shape_cast %113 : vector<1x80x32xf32> to vector<80x32xf32>
    %cst_131 = arith.constant dense<0.000000e+00> : vector<1x32xf32>
    %115 = tpu.matmul %112, %114, %cst_131 {dimension_numbers = #tpu.dot_dimension_numbers<[1], [0], [0], [1], [0, 0, 1, 1], [], []>} : vector<1x80xf32>, vector<80x32xf32>, vector<1x32xf32> -> vector<1x32xf32>
    %116 = arith.addf %111, %115 : vector<1x32xf32>
    %c0_132 = arith.constant 0 : index
    %c0_133 = arith.constant 0 : index
    %117 = vector.load %arg16[%c0_132, %c0_133] : memref<1x32xf32, #tpu.memory_space<vmem>>, vector<1x32xf32>
    %118 = arith.addf %116, %117 : vector<1x32xf32>
    %cst_134 = arith.constant 0.000000e+00 : f32
    %119 = vector.broadcast %cst_134 : f32 to vector<1x32xf32>
    %120 = arith.maximumf %118, %119 : vector<1x32xf32>
    %c0_135 = arith.constant 0 : index
    %c0_136 = arith.constant 0 : index
    %121 = vector.load %arg27[%c0_135, %c0_136] : memref<2x32xf32, #tpu.memory_space<vmem>>, vector<1x32xf32>
    tpu.vector_store %arg27[%c0_135, %c0_136], %120 {strides = array<i32>} : memref<2x32xf32, #tpu.memory_space<vmem>>, vector<1x32xf32>,
    %c1_137 = arith.constant 1 : index
    %c0_138 = arith.constant 0 : index
    %c0_139 = arith.constant 0 : index
    %122 = vector.load %arg0[%c1_137, %c0_138, %c0_139] : memref<2x32x96xf32, #tpu.memory_space<vmem>>, vector<1x30x96xf32>
    %123 = vector.shape_cast %122 : vector<1x30x96xf32> to vector<30x96xf32>
    %c0_140 = arith.constant 0 : index
    %c0_141 = arith.constant 0 : index
    %c0_142 = arith.constant 0 : index
    %124 = vector.load %arg1[%c0_140, %c0_141, %c0_142] : memref<3x96x120xf32, #tpu.memory_space<vmem>>, vector<1x96x120xf32>
    %125 = vector.shape_cast %124 : vector<1x96x120xf32> to vector<96x120xf32>
    %cst_143 = arith.constant dense<0.000000e+00> : vector<30x120xf32>
    %126 = tpu.matmul %123, %125, %cst_143 {dimension_numbers = #tpu.dot_dimension_numbers<[1], [0], [0], [1], [0, 0, 1, 1], [], []>} : vector<30x96xf32>, vector<96x120xf32>, vector<30x120xf32> -> vector<30x120xf32>
    %c1_144 = arith.constant 1 : index
    %c1_145 = arith.constant 1 : index
    %c0_146 = arith.constant 0 : index
    %127 = vector.load %arg0[%c1_144, %c1_145, %c0_146] : memref<2x32x96xf32, #tpu.memory_space<vmem>>, vector<1x30x96xf32>
    %128 = vector.shape_cast %127 : vector<1x30x96xf32> to vector<30x96xf32>
    %c1_147 = arith.constant 1 : index
    %c0_148 = arith.constant 0 : index
    %c0_149 = arith.constant 0 : index
    %129 = vector.load %arg1[%c1_147, %c0_148, %c0_149] : memref<3x96x120xf32, #tpu.memory_space<vmem>>, vector<1x96x120xf32>
    %130 = vector.shape_cast %129 : vector<1x96x120xf32> to vector<96x120xf32>
    %cst_150 = arith.constant dense<0.000000e+00> : vector<30x120xf32>
    %131 = tpu.matmul %128, %130, %cst_150 {dimension_numbers = #tpu.dot_dimension_numbers<[1], [0], [0], [1], [0, 0, 1, 1], [], []>} : vector<30x96xf32>, vector<96x120xf32>, vector<30x120xf32> -> vector<30x120xf32>
    %132 = arith.addf %126, %131 : vector<30x120xf32>
    %c1_151 = arith.constant 1 : index
    %c2_152 = arith.constant 2 : index
    %c0_153 = arith.constant 0 : index
    %133 = vector.load %arg0[%c1_151, %c2_152, %c0_153] : memref<2x32x96xf32, #tpu.memory_space<vmem>>, vector<1x30x96xf32>
    %134 = vector.shape_cast %133 : vector<1x30x96xf32> to vector<30x96xf32>
    %c2_154 = arith.constant 2 : index
    %c0_155 = arith.constant 0 : index
    %c0_156 = arith.constant 0 : index
    %135 = vector.load %arg1[%c2_154, %c0_155, %c0_156] : memref<3x96x120xf32, #tpu.memory_space<vmem>>, vector<1x96x120xf32>
    %136 = vector.shape_cast %135 : vector<1x96x120xf32> to vector<96x120xf32>
    %cst_157 = arith.constant dense<0.000000e+00> : vector<30x120xf32>
    %137 = tpu.matmul %134, %136, %cst_157 {dimension_numbers = #tpu.dot_dimension_numbers<[1], [0], [0], [1], [0, 0, 1, 1], [], []>} : vector<30x96xf32>, vector<96x120xf32>, vector<30x120xf32> -> vector<30x120xf32>
    %138 = arith.addf %132, %137 : vector<30x120xf32>
    %c0_158 = arith.constant 0 : index
    %c0_159 = arith.constant 0 : index
    %139 = vector.load %arg2[%c0_158, %c0_159] : memref<1x120xf32, #tpu.memory_space<vmem>>, vector<1x120xf32>
    %140 = vector.broadcast %139 : vector<1x120xf32> to vector<30x120xf32>
    %141 = arith.addf %138, %140 : vector<30x120xf32>
    %cst_160 = arith.constant 0.000000e+00 : f32
    %142 = vector.broadcast %cst_160 : f32 to vector<30x120xf32>
    %143 = arith.maximumf %141, %142 : vector<30x120xf32>
    %c0_161 = arith.constant 0 : index
    %c0_162 = arith.constant 0 : index
    %144 = vector.load %arg24[%c0_161, %c0_162] : memref<30x120xf32, #tpu.memory_space<vmem>>, vector<30x120xf32>
    tpu.vector_store %arg24[%c0_161, %c0_162], %143 {strides = array<i32>} : memref<30x120xf32, #tpu.memory_space<vmem>>, vector<30x120xf32>,
    %c0_163 = arith.constant 0 : index
    %c0_164 = arith.constant 0 : index
    %145 = vector.load %arg24[%c0_163, %c0_164] : memref<30x120xf32, #tpu.memory_space<vmem>>, vector<28x120xf32>
    %c0_165 = arith.constant 0 : index
    %c0_166 = arith.constant 0 : index
    %c0_167 = arith.constant 0 : index
    %146 = vector.load %arg3[%c0_165, %c0_166, %c0_167] : memref<3x120x168xf32, #tpu.memory_space<vmem>>, vector<1x120x168xf32>
    %147 = vector.shape_cast %146 : vector<1x120x168xf32> to vector<120x168xf32>
    %cst_168 = arith.constant dense<0.000000e+00> : vector<28x168xf32>
    %148 = tpu.matmul %145, %147, %cst_168 {dimension_numbers = #tpu.dot_dimension_numbers<[1], [0], [0], [1], [0, 0, 1, 1], [], []>} : vector<28x120xf32>, vector<120x168xf32>, vector<28x168xf32> -> vector<28x168xf32>
    %c1_169 = arith.constant 1 : index
    %c0_170 = arith.constant 0 : index
    %149 = vector.load %arg24[%c1_169, %c0_170] : memref<30x120xf32, #tpu.memory_space<vmem>>, vector<28x120xf32>
    %c1_171 = arith.constant 1 : index
    %c0_172 = arith.constant 0 : index
    %c0_173 = arith.constant 0 : index
    %150 = vector.load %arg3[%c1_171, %c0_172, %c0_173] : memref<3x120x168xf32, #tpu.memory_space<vmem>>, vector<1x120x168xf32>
    %151 = vector.shape_cast %150 : vector<1x120x168xf32> to vector<120x168xf32>
    %cst_174 = arith.constant dense<0.000000e+00> : vector<28x168xf32>
    %152 = tpu.matmul %149, %151, %cst_174 {dimension_numbers = #tpu.dot_dimension_numbers<[1], [0], [0], [1], [0, 0, 1, 1], [], []>} : vector<28x120xf32>, vector<120x168xf32>, vector<28x168xf32> -> vector<28x168xf32>
    %153 = arith.addf %148, %152 : vector<28x168xf32>
    %c2_175 = arith.constant 2 : index
    %c0_176 = arith.constant 0 : index
    %154 = vector.load %arg24[%c2_175, %c0_176] : memref<30x120xf32, #tpu.memory_space<vmem>>, vector<28x120xf32>
    %c2_177 = arith.constant 2 : index
    %c0_178 = arith.constant 0 : index
    %c0_179 = arith.constant 0 : index
    %155 = vector.load %arg3[%c2_177, %c0_178, %c0_179] : memref<3x120x168xf32, #tpu.memory_space<vmem>>, vector<1x120x168xf32>
    %156 = vector.shape_cast %155 : vector<1x120x168xf32> to vector<120x168xf32>
    %cst_180 = arith.constant dense<0.000000e+00> : vector<28x168xf32>
    %157 = tpu.matmul %154, %156, %cst_180 {dimension_numbers = #tpu.dot_dimension_numbers<[1], [0], [0], [1], [0, 0, 1, 1], [], []>} : vector<28x120xf32>, vector<120x168xf32>, vector<28x168xf32> -> vector<28x168xf32>
    %158 = arith.addf %153, %157 : vector<28x168xf32>
    %c0_181 = arith.constant 0 : index
    %c0_182 = arith.constant 0 : index
    %159 = vector.load %arg4[%c0_181, %c0_182] : memref<1x168xf32, #tpu.memory_space<vmem>>, vector<1x168xf32>
    %160 = vector.broadcast %159 : vector<1x168xf32> to vector<28x168xf32>
    %161 = arith.addf %158, %160 : vector<28x168xf32>
    %cst_183 = arith.constant 0.000000e+00 : f32
    %162 = vector.broadcast %cst_183 : f32 to vector<28x168xf32>
    %163 = arith.maximumf %161, %162 : vector<28x168xf32>
    %c0_184 = arith.constant 0 : index
    %c0_185 = arith.constant 0 : index
    %164 = vector.load %arg5[%c0_184, %c0_185] : memref<14x28xf32, #tpu.memory_space<vmem>>, vector<14x28xf32>
    %cst_186 = arith.constant dense<0.000000e+00> : vector<14x168xf32>
    %165 = tpu.matmul %164, %163, %cst_186 {dimension_numbers = #tpu.dot_dimension_numbers<[1], [0], [0], [1], [0, 0, 1, 1], [], []>} : vector<14x28xf32>, vector<28x168xf32>, vector<14x168xf32> -> vector<14x168xf32>
    %c0_187 = arith.constant 0 : index
    %c0_188 = arith.constant 0 : index
    %166 = vector.load %arg6[%c0_187, %c0_188] : memref<14x28xf32, #tpu.memory_space<vmem>>, vector<14x28xf32>
    %cst_189 = arith.constant dense<0.000000e+00> : vector<14x168xf32>
    %167 = tpu.matmul %166, %163, %cst_189 {dimension_numbers = #tpu.dot_dimension_numbers<[1], [0], [0], [1], [0, 0, 1, 1], [], []>} : vector<14x28xf32>, vector<28x168xf32>, vector<14x168xf32> -> vector<14x168xf32>
    %168 = arith.maximumf %165, %167 : vector<14x168xf32>
    %c0_190 = arith.constant 0 : index
    %c0_191 = arith.constant 0 : index
    %169 = vector.load %arg7[%c0_190, %c0_191] : memref<168x84xf32, #tpu.memory_space<vmem>>, vector<168x84xf32>
    %cst_192 = arith.constant dense<0.000000e+00> : vector<14x84xf32>
    %170 = tpu.matmul %168, %169, %cst_192 {dimension_numbers = #tpu.dot_dimension_numbers<[1], [0], [0], [1], [0, 0, 1, 1], [], []>} : vector<14x168xf32>, vector<168x84xf32>, vector<14x84xf32> -> vector<14x84xf32>
    %c0_193 = arith.constant 0 : index
    %c0_194 = arith.constant 0 : index
    %171 = vector.load %arg8[%c0_193, %c0_194] : memref<168x84xf32, #tpu.memory_space<vmem>>, vector<168x84xf32>
    %cst_195 = arith.constant dense<0.000000e+00> : vector<14x84xf32>
    %172 = tpu.matmul %168, %171, %cst_195 {dimension_numbers = #tpu.dot_dimension_numbers<[1], [0], [0], [1], [0, 0, 1, 1], [], []>} : vector<14x168xf32>, vector<168x84xf32>, vector<14x84xf32> -> vector<14x84xf32>
    %173 = arith.maximumf %170, %172 : vector<14x84xf32>
    %c0_196 = arith.constant 0 : index
    %c0_197 = arith.constant 0 : index
    %174 = vector.load %arg25[%c0_196, %c0_197] : memref<14x84xf32, #tpu.memory_space<vmem>>, vector<14x84xf32>
    tpu.vector_store %arg25[%c0_196, %c0_197], %173 {strides = array<i32>} : memref<14x84xf32, #tpu.memory_space<vmem>>, vector<14x84xf32>,
    %c0_198 = arith.constant 0 : index
    %c0_199 = arith.constant 0 : index
    %175 = vector.load %arg25[%c0_198, %c0_199] : memref<14x84xf32, #tpu.memory_space<vmem>>, vector<10x84xf32>
    %c0_200 = arith.constant 0 : index
    %c0_201 = arith.constant 0 : index
    %c0_202 = arith.constant 0 : index
    %176 = vector.load %arg9[%c0_200, %c0_201, %c0_202] : memref<5x84x160xf32, #tpu.memory_space<vmem>>, vector<1x84x160xf32>
    %177 = vector.shape_cast %176 : vector<1x84x160xf32> to vector<84x160xf32>
    %cst_203 = arith.constant dense<0.000000e+00> : vector<10x160xf32>
    %178 = tpu.matmul %175, %177, %cst_203 {dimension_numbers = #tpu.dot_dimension_numbers<[1], [0], [0], [1], [0, 0, 1, 1], [], []>} : vector<10x84xf32>, vector<84x160xf32>, vector<10x160xf32> -> vector<10x160xf32>
    %c1_204 = arith.constant 1 : index
    %c0_205 = arith.constant 0 : index
    %179 = vector.load %arg25[%c1_204, %c0_205] : memref<14x84xf32, #tpu.memory_space<vmem>>, vector<10x84xf32>
    %c1_206 = arith.constant 1 : index
    %c0_207 = arith.constant 0 : index
    %c0_208 = arith.constant 0 : index
    %180 = vector.load %arg9[%c1_206, %c0_207, %c0_208] : memref<5x84x160xf32, #tpu.memory_space<vmem>>, vector<1x84x160xf32>
    %181 = vector.shape_cast %180 : vector<1x84x160xf32> to vector<84x160xf32>
    %cst_209 = arith.constant dense<0.000000e+00> : vector<10x160xf32>
    %182 = tpu.matmul %179, %181, %cst_209 {dimension_numbers = #tpu.dot_dimension_numbers<[1], [0], [0], [1], [0, 0, 1, 1], [], []>} : vector<10x84xf32>, vector<84x160xf32>, vector<10x160xf32> -> vector<10x160xf32>
    %183 = arith.addf %178, %182 : vector<10x160xf32>
    %c2_210 = arith.constant 2 : index
    %c0_211 = arith.constant 0 : index
    %184 = vector.load %arg25[%c2_210, %c0_211] : memref<14x84xf32, #tpu.memory_space<vmem>>, vector<10x84xf32>
    %c2_212 = arith.constant 2 : index
    %c0_213 = arith.constant 0 : index
    %c0_214 = arith.constant 0 : index
    %185 = vector.load %arg9[%c2_212, %c0_213, %c0_214] : memref<5x84x160xf32, #tpu.memory_space<vmem>>, vector<1x84x160xf32>
    %186 = vector.shape_cast %185 : vector<1x84x160xf32> to vector<84x160xf32>
    %cst_215 = arith.constant dense<0.000000e+00> : vector<10x160xf32>
    %187 = tpu.matmul %184, %186, %cst_215 {dimension_numbers = #tpu.dot_dimension_numbers<[1], [0], [0], [1], [0, 0, 1, 1], [], []>} : vector<10x84xf32>, vector<84x160xf32>, vector<10x160xf32> -> vector<10x160xf32>
    %188 = arith.addf %183, %187 : vector<10x160xf32>
    %c3_216 = arith.constant 3 : index
    %c0_217 = arith.constant 0 : index
    %189 = vector.load %arg25[%c3_216, %c0_217] : memref<14x84xf32, #tpu.memory_space<vmem>>, vector<10x84xf32>
    %c3_218 = arith.constant 3 : index
    %c0_219 = arith.constant 0 : index
    %c0_220 = arith.constant 0 : index
    %190 = vector.load %arg9[%c3_218, %c0_219, %c0_220] : memref<5x84x160xf32, #tpu.memory_space<vmem>>, vector<1x84x160xf32>
    %191 = vector.shape_cast %190 : vector<1x84x160xf32> to vector<84x160xf32>
    %cst_221 = arith.constant dense<0.000000e+00> : vector<10x160xf32>
    %192 = tpu.matmul %189, %191, %cst_221 {dimension_numbers = #tpu.dot_dimension_numbers<[1], [0], [0], [1], [0, 0, 1, 1], [], []>} : vector<10x84xf32>, vector<84x160xf32>, vector<10x160xf32> -> vector<10x160xf32>
    %193 = arith.addf %188, %192 : vector<10x160xf32>
    %c4_222 = arith.constant 4 : index
    %c0_223 = arith.constant 0 : index
    %194 = vector.load %arg25[%c4_222, %c0_223] : memref<14x84xf32, #tpu.memory_space<vmem>>, vector<10x84xf32>
    %c4_224 = arith.constant 4 : index
    %c0_225 = arith.constant 0 : index
    %c0_226 = arith.constant 0 : index
    %195 = vector.load %arg9[%c4_224, %c0_225, %c0_226] : memref<5x84x160xf32, #tpu.memory_space<vmem>>, vector<1x84x160xf32>
    %196 = vector.shape_cast %195 : vector<1x84x160xf32> to vector<84x160xf32>
    %cst_227 = arith.constant dense<0.000000e+00> : vector<10x160xf32>
    %197 = tpu.matmul %194, %196, %cst_227 {dimension_numbers = #tpu.dot_dimension_numbers<[1], [0], [0], [1], [0, 0, 1, 1], [], []>} : vector<10x84xf32>, vector<84x160xf32>, vector<10x160xf32> -> vector<10x160xf32>
    %198 = arith.addf %193, %197 : vector<10x160xf32>
    %c0_228 = arith.constant 0 : index
    %c0_229 = arith.constant 0 : index
    %199 = vector.load %arg10[%c0_228, %c0_229] : memref<1x160xf32, #tpu.memory_space<vmem>>, vector<1x160xf32>
    %200 = vector.broadcast %199 : vector<1x160xf32> to vector<10x160xf32>
    %201 = arith.addf %198, %200 : vector<10x160xf32>
    %cst_230 = arith.constant 0.000000e+00 : f32
    %202 = vector.broadcast %cst_230 : f32 to vector<10x160xf32>
    %203 = arith.maximumf %201, %202 : vector<10x160xf32>
    %c0_231 = arith.constant 0 : index
    %c0_232 = arith.constant 0 : index
    %204 = vector.load %arg11[%c0_231, %c0_232] : memref<5x10xf32, #tpu.memory_space<vmem>>, vector<5x10xf32>
    %cst_233 = arith.constant dense<0.000000e+00> : vector<5x160xf32>
    %205 = tpu.matmul %204, %203, %cst_233 {dimension_numbers = #tpu.dot_dimension_numbers<[1], [0], [0], [1], [0, 0, 1, 1], [], []>} : vector<5x10xf32>, vector<10x160xf32>, vector<5x160xf32> -> vector<5x160xf32>
    %c0_234 = arith.constant 0 : index
    %c0_235 = arith.constant 0 : index
    %206 = vector.load %arg12[%c0_234, %c0_235] : memref<5x10xf32, #tpu.memory_space<vmem>>, vector<5x10xf32>
    %cst_236 = arith.constant dense<0.000000e+00> : vector<5x160xf32>
    %207 = tpu.matmul %206, %203, %cst_236 {dimension_numbers = #tpu.dot_dimension_numbers<[1], [0], [0], [1], [0, 0, 1, 1], [], []>} : vector<5x10xf32>, vector<10x160xf32>, vector<5x160xf32> -> vector<5x160xf32>
    %208 = arith.maximumf %205, %207 : vector<5x160xf32>
    %c0_237 = arith.constant 0 : index
    %c0_238 = arith.constant 0 : index
    %209 = vector.load %arg13[%c0_237, %c0_238] : memref<160x80xf32, #tpu.memory_space<vmem>>, vector<160x80xf32>
    %cst_239 = arith.constant dense<0.000000e+00> : vector<5x80xf32>
    %210 = tpu.matmul %208, %209, %cst_239 {dimension_numbers = #tpu.dot_dimension_numbers<[1], [0], [0], [1], [0, 0, 1, 1], [], []>} : vector<5x160xf32>, vector<160x80xf32>, vector<5x80xf32> -> vector<5x80xf32>
    %c0_240 = arith.constant 0 : index
    %c0_241 = arith.constant 0 : index
    %211 = vector.load %arg14[%c0_240, %c0_241] : memref<160x80xf32, #tpu.memory_space<vmem>>, vector<160x80xf32>
    %cst_242 = arith.constant dense<0.000000e+00> : vector<5x80xf32>
    %212 = tpu.matmul %208, %211, %cst_242 {dimension_numbers = #tpu.dot_dimension_numbers<[1], [0], [0], [1], [0, 0, 1, 1], [], []>} : vector<5x160xf32>, vector<160x80xf32>, vector<5x80xf32> -> vector<5x80xf32>
    %213 = arith.maximumf %210, %212 : vector<5x80xf32>
    %c0_243 = arith.constant 0 : index
    %c0_244 = arith.constant 0 : index
    %214 = vector.load %arg26[%c0_243, %c0_244] : memref<5x80xf32, #tpu.memory_space<vmem>>, vector<5x80xf32>
    tpu.vector_store %arg26[%c0_243, %c0_244], %213 {strides = array<i32>} : memref<5x80xf32, #tpu.memory_space<vmem>>, vector<5x80xf32>,
    %c0_245 = arith.constant 0 : index
    %c0_246 = arith.constant 0 : index
    %215 = vector.load %arg26[%c0_245, %c0_246] : memref<5x80xf32, #tpu.memory_space<vmem>>, vector<1x80xf32>
    %c0_247 = arith.constant 0 : index
    %c0_248 = arith.constant 0 : index
    %c0_249 = arith.constant 0 : index
    %216 = vector.load %arg15[%c0_247, %c0_248, %c0_249] : memref<5x80x32xf32, #tpu.memory_space<vmem>>, vector<1x80x32xf32>
    %217 = vector.shape_cast %216 : vector<1x80x32xf32> to vector<80x32xf32>
    %cst_250 = arith.constant dense<0.000000e+00> : vector<1x32xf32>
    %218 = tpu.matmul %215, %217, %cst_250 {dimension_numbers = #tpu.dot_dimension_numbers<[1], [0], [0], [1], [0, 0, 1, 1], [], []>} : vector<1x80xf32>, vector<80x32xf32>, vector<1x32xf32> -> vector<1x32xf32>
    %c1_251 = arith.constant 1 : index
    %c0_252 = arith.constant 0 : index
    %219 = vector.load %arg26[%c1_251, %c0_252] : memref<5x80xf32, #tpu.memory_space<vmem>>, vector<1x80xf32>
    %c1_253 = arith.constant 1 : index
    %c0_254 = arith.constant 0 : index
    %c0_255 = arith.constant 0 : index
    %220 = vector.load %arg15[%c1_253, %c0_254, %c0_255] : memref<5x80x32xf32, #tpu.memory_space<vmem>>, vector<1x80x32xf32>
    %221 = vector.shape_cast %220 : vector<1x80x32xf32> to vector<80x32xf32>
    %cst_256 = arith.constant dense<0.000000e+00> : vector<1x32xf32>
    %222 = tpu.matmul %219, %221, %cst_256 {dimension_numbers = #tpu.dot_dimension_numbers<[1], [0], [0], [1], [0, 0, 1, 1], [], []>} : vector<1x80xf32>, vector<80x32xf32>, vector<1x32xf32> -> vector<1x32xf32>
    %223 = arith.addf %218, %222 : vector<1x32xf32>
    %c2_257 = arith.constant 2 : index
    %c0_258 = arith.constant 0 : index
    %224 = vector.load %arg26[%c2_257, %c0_258] : memref<5x80xf32, #tpu.memory_space<vmem>>, vector<1x80xf32>
    %c2_259 = arith.constant 2 : index
    %c0_260 = arith.constant 0 : index
    %c0_261 = arith.constant 0 : index
    %225 = vector.load %arg15[%c2_259, %c0_260, %c0_261] : memref<5x80x32xf32, #tpu.memory_space<vmem>>, vector<1x80x32xf32>
    %226 = vector.shape_cast %225 : vector<1x80x32xf32> to vector<80x32xf32>
    %cst_262 = arith.constant dense<0.000000e+00> : vector<1x32xf32>
    %227 = tpu.matmul %224, %226, %cst_262 {dimension_numbers = #tpu.dot_dimension_numbers<[1], [0], [0], [1], [0, 0, 1, 1], [], []>} : vector<1x80xf32>, vector<80x32xf32>, vector<1x32xf32> -> vector<1x32xf32>
    %228 = arith.addf %223, %227 : vector<1x32xf32>
    %c3_263 = arith.constant 3 : index
    %c0_264 = arith.constant 0 : index
    %229 = vector.load %arg26[%c3_263, %c0_264] : memref<5x80xf32, #tpu.memory_space<vmem>>, vector<1x80xf32>
    %c3_265 = arith.constant 3 : index
    %c0_266 = arith.constant 0 : index
    %c0_267 = arith.constant 0 : index
    %230 = vector.load %arg15[%c3_265, %c0_266, %c0_267] : memref<5x80x32xf32, #tpu.memory_space<vmem>>, vector<1x80x32xf32>
    %231 = vector.shape_cast %230 : vector<1x80x32xf32> to vector<80x32xf32>
    %cst_268 = arith.constant dense<0.000000e+00> : vector<1x32xf32>
    %232 = tpu.matmul %229, %231, %cst_268 {dimension_numbers = #tpu.dot_dimension_numbers<[1], [0], [0], [1], [0, 0, 1, 1], [], []>} : vector<1x80xf32>, vector<80x32xf32>, vector<1x32xf32> -> vector<1x32xf32>
    %233 = arith.addf %228, %232 : vector<1x32xf32>
    %c4_269 = arith.constant 4 : index
    %c0_270 = arith.constant 0 : index
    %234 = vector.load %arg26[%c4_269, %c0_270] : memref<5x80xf32, #tpu.memory_space<vmem>>, vector<1x80xf32>
    %c4_271 = arith.constant 4 : index
    %c0_272 = arith.constant 0 : index
    %c0_273 = arith.constant 0 : index
    %235 = vector.load %arg15[%c4_271, %c0_272, %c0_273] : memref<5x80x32xf32, #tpu.memory_space<vmem>>, vector<1x80x32xf32>
    %236 = vector.shape_cast %235 : vector<1x80x32xf32> to vector<80x32xf32>
    %cst_274 = arith.constant dense<0.000000e+00> : vector<1x32xf32>
    %237 = tpu.matmul %234, %236, %cst_274 {dimension_numbers = #tpu.dot_dimension_numbers<[1], [0], [0], [1], [0, 0, 1, 1], [], []>} : vector<1x80xf32>, vector<80x32xf32>, vector<1x32xf32> -> vector<1x32xf32>
    %238 = arith.addf %233, %237 : vector<1x32xf32>
    %c0_275 = arith.constant 0 : index
    %c0_276 = arith.constant 0 : index
    %239 = vector.load %arg16[%c0_275, %c0_276] : memref<1x32xf32, #tpu.memory_space<vmem>>, vector<1x32xf32>
    %240 = arith.addf %238, %239 : vector<1x32xf32>
    %cst_277 = arith.constant 0.000000e+00 : f32
    %241 = vector.broadcast %cst_277 : f32 to vector<1x32xf32>
    %242 = arith.maximumf %240, %241 : vector<1x32xf32>
    %c1_278 = arith.constant 1 : index
    %c0_279 = arith.constant 0 : index
    %243 = vector.load %arg27[%c1_278, %c0_279] : memref<2x32xf32, #tpu.memory_space<vmem>>, vector<1x32xf32>
    tpu.vector_store %arg27[%c1_278, %c0_279], %242 {strides = array<i32>} : memref<2x32xf32, #tpu.memory_space<vmem>>, vector<1x32xf32>,
    %c0_280 = arith.constant 0 : index
    %c0_281 = arith.constant 0 : index
    %244 = vector.load %arg27[%c0_280, %c0_281] : memref<2x32xf32, #tpu.memory_space<vmem>>, vector<2x32xf32>
    %c0_282 = arith.constant 0 : index
    %c0_283 = arith.constant 0 : index
    %245 = vector.load %arg17[%c0_282, %c0_283] : memref<32x120xf32, #tpu.memory_space<vmem>>, vector<32x120xf32>
    %cst_284 = arith.constant dense<0.000000e+00> : vector<2x120xf32>
    %246 = tpu.matmul %244, %245, %cst_284 {dimension_numbers = #tpu.dot_dimension_numbers<[1], [0], [0], [1], [0, 0, 1, 1], [], []>} : vector<2x32xf32>, vector<32x120xf32>, vector<2x120xf32> -> vector<2x120xf32>
    %c0_285 = arith.constant 0 : index
    %c0_286 = arith.constant 0 : index
    %247 = vector.load %arg18[%c0_285, %c0_286] : memref<1x120xf32, #tpu.memory_space<vmem>>, vector<1x120xf32>
    %248 = vector.broadcast %247 : vector<1x120xf32> to vector<2x120xf32>
    %249 = arith.addf %246, %248 : vector<2x120xf32>
    %cst_287 = arith.constant 0.000000e+00 : f32
    %250 = vector.broadcast %cst_287 : f32 to vector<2x120xf32>
    %251 = arith.maximumf %249, %250 : vector<2x120xf32>
    %c0_288 = arith.constant 0 : index
    %c0_289 = arith.constant 0 : index
    %252 = vector.load %arg19[%c0_288, %c0_289] : memref<120x84xf32, #tpu.memory_space<vmem>>, vector<120x84xf32>
    %cst_290 = arith.constant dense<0.000000e+00> : vector<2x84xf32>
    %253 = tpu.matmul %251, %252, %cst_290 {dimension_numbers = #tpu.dot_dimension_numbers<[1], [0], [0], [1], [0, 0, 1, 1], [], []>} : vector<2x120xf32>, vector<120x84xf32>, vector<2x84xf32> -> vector<2x84xf32>
    %c0_291 = arith.constant 0 : index
    %c0_292 = arith.constant 0 : index
    %254 = vector.load %arg20[%c0_291, %c0_292] : memref<1x84xf32, #tpu.memory_space<vmem>>, vector<1x84xf32>
    %255 = vector.broadcast %254 : vector<1x84xf32> to vector<2x84xf32>
    %256 = arith.addf %253, %255 : vector<2x84xf32>
    %cst_293 = arith.constant 0.000000e+00 : f32
    %257 = vector.broadcast %cst_293 : f32 to vector<2x84xf32>
    %258 = arith.maximumf %256, %257 : vector<2x84xf32>
    %c0_294 = arith.constant 0 : index
    %c0_295 = arith.constant 0 : index
    %259 = vector.load %arg21[%c0_294, %c0_295] : memref<84x10xf32, #tpu.memory_space<vmem>>, vector<84x10xf32>
    %cst_296 = arith.constant dense<0.000000e+00> : vector<2x10xf32>
    %260 = tpu.matmul %258, %259, %cst_296 {dimension_numbers = #tpu.dot_dimension_numbers<[1], [0], [0], [1], [0, 0, 1, 1], [], []>} : vector<2x84xf32>, vector<84x10xf32>, vector<2x10xf32> -> vector<2x10xf32>
    %c0_297 = arith.constant 0 : index
    %c0_298 = arith.constant 0 : index
    %261 = vector.load %arg22[%c0_297, %c0_298] : memref<1x10xf32, #tpu.memory_space<vmem>>, vector<1x10xf32>
    %262 = vector.broadcast %261 : vector<1x10xf32> to vector<2x10xf32>
    %263 = arith.addf %260, %262 : vector<2x10xf32>
    %c0_299 = arith.constant 0 : index
    %c0_300 = arith.constant 0 : index
    %264 = vector.load %arg23[%c0_299, %c0_300] : memref<2x10xf32, #tpu.memory_space<vmem>>, vector<2x10xf32>
    tpu.vector_store %arg23[%c0_299, %c0_300], %263 {strides = array<i32>} : memref<2x10xf32, #tpu.memory_space<vmem>>, vector<2x10xf32>,
    return
  }
}

</mosaic_0001>

<bundles_post_ra>
// kernel: net_forward.1
= control target key start
LH: loop header
LB: loop body
LE: loop exit
PB: predicated region body
PF: predicated region fallthrough
CT: control target
= control target key end

     0   :  { %s9935_s0 = inlined_call_operand.vmem [shape: f32[2,32,96], index: 0, kind: input, shape index: {}]   ;;  %s9936_s1 = inlined_call_operand.vmem [shape: f32[3,96,120], index: 1, kind: input, shape index: {}]   ;;  %s9937_s2 = inlined_call_operand.vmem [shape: f32[1,120], index: 2, kind: input, shape index: {}]   ;;  %s9938_s3 = inlined_call_operand.vmem [shape: f32[3,120,168], index: 3, kind: input, shape index: {}]   ;;  %s9939_s4 = inlined_call_operand.vmem [shape: f32[1,168], index: 4, kind: input, shape index: {}]   ;;  %s9940_s5 = inlined_call_operand.vmem [shape: f32[14,28], index: 5, kind: input, shape index: {}]   ;;  %s9941_s6 = inlined_call_operand.vmem [shape: f32[14,28], index: 6, kind: input, shape index: {}]   ;;  %s9942_s7 = inlined_call_operand.vmem [shape: f32[168,84], index: 7, kind: input, shape index: {}]   ;;  %s9943_s8 = inlined_call_operand.vmem [shape: f32[168,84], index: 8, kind: input, shape index: {}]   ;;  %s9944_s9 = inlined_call_operand.vmem [shape: f32[5,84,160], index: 9, kind: input, shape index: {}]   ;;  %s9945_s10 = inlined_call_operand.vmem [shape: f32[1,160], index: 10, kind: input, shape index: {}]   ;;  %s9946_s11 = inlined_call_operand.vmem [shape: f32[5,10], index: 11, kind: input, shape index: {}]   ;;  %s9947_s12 = inlined_call_operand.vmem [shape: f32[5,10], index: 12, kind: input, shape index: {}]   ;;  %s9948_s13 = inlined_call_operand.vmem [shape: f32[160,80], index: 13, kind: input, shape index: {}]   ;;  %s9949_s14 = inlined_call_operand.vmem [shape: f32[160,80], index: 14, kind: input, shape index: {}]   ;;  %s9950_s15 = inlined_call_operand.vmem [shape: f32[5,80,32], index: 15, kind: input, shape index: {}]   ;;  %s9951_s16 = inlined_call_operand.vmem [shape: f32[1,32], index: 16, kind: input, shape index: {}]   ;;  %s9952_s17 = inlined_call_operand.vmem [shape: f32[32,120], index: 17, kind: input, shape index: {}]   ;;  %s9953_s18 = inlined_call_operand.vmem [shape: f32[1,120], index: 18, kind: input, shape index: {}]   ;;  %s9954_s19 = inlined_call_operand.vmem [shape: f32[120,84], index: 19, kind: input, shape index: {}]   ;;  %s9955_s20 = inlined_call_operand.vmem [shape: f32[1,84], index: 20, kind: input, shape index: {}]   ;;  %s9956_s21 = inlined_call_operand.vmem [shape: f32[84,10], index: 21, kind: input, shape index: {}]   ;;  %s9957_s22 = inlined_call_operand.vmem [shape: f32[1,10], index: 22, kind: input, shape index: {}]   ;;  %s9958_s23 = inlined_call_operand.hbm [shape: f32[2,10], index: 23, kind: output, shape index: {}]  }
   0x1   :  { %9967 = sst [smem:[#allocation9_spill]] %s9935_s0 }
   0x2   :  { %9968 = sst [smem:[#allocation10_spill]] %s9936_s1 }
   0x3   :  { %9969 = sst [smem:[#allocation11_spill]] %s9937_s2 }
   0x4   :  { %9970 = sst [smem:[#allocation12_spill]] %s9938_s3 }
   0x5   :  { %9971 = sst [smem:[#allocation13_spill]] %s9939_s4 }
   0x6   :  { %9972 = sst [smem:[#allocation14_spill]] %s9940_s5 }
   0x7   :  { %9973 = sst [smem:[#allocation15_spill]] %s9941_s6 }
   0x8   :  { %9974 = sst [smem:[#allocation16_spill]] %s9942_s7 }
   0x9   :  { %9975 = sst [smem:[#allocation17_spill]] %s9955_s20 }
   0xa   :  { %9976 = sst [smem:[#allocation18_spill]] %s9957_s22 }
   0xb   :  { %9977 = sst [smem:[#allocation19_spill]] %s9958_s23 }
   0xc   :  { %s9978_s24 = sld [smem:[#allocation10_spill]] }
  0x12   :  { %v5509_v0 = vld [vmem:[%s9978_s24 + $0xb8] sm:$0xff]  ;;  %v5508_v2 = vld [vmem:[%s9978_s24 + $0xb0] sm:$0xff]  ;;  %v5507_v4 = vld [vmem:[%s9978_s24 + $0xa8] sm:$0xff] }
  0x13   :  { %v90_v1 = vld [vmem:[%s9978_s24 + $0x58] sm:$0xff]  ;;  %6320 = vmatprep.subr.mxu0 %v5509_v0  ;;  %v89_v3 = vld [vmem:[%s9978_s24 + $0x50] sm:$0xff]  ;;  %v88_v5 = vld [vmem:[%s9978_s24 + $0x48] sm:$0xff] }
  0x14   :  { %6350 = vmatprep.subr.mxu1 %v90_v1  ;;  %6321 = vmatpush3.msra.mxu0 %v5509_v0  ;;  %v5506_v6 = vld [vmem:[%s9978_s24 + $0xa0] sm:$0xff]  ;;  %v5505_v8 = vld [vmem:[%s9978_s24 + $0x98] sm:$0xff]  ;;  %v5504_v10 = vld [vmem:[%s9978_s24 + $0x90] sm:$0xff] }
  0x15   :  { %6351 = vmatpush3.msra.mxu1 %v90_v1  ;;  %6322 = vmatprep.subr.mxu0 %v5508_v2  ;;  %v87_v7 = vld [vmem:[%s9978_s24 + $0x40] sm:$0xff]  ;;  %v86_v9 = vld [vmem:[%s9978_s24 + $0x38] sm:$0xff]  ;;  %v85_v11 = vld [vmem:[%s9978_s24 + $0x30] sm:$0xff] }
  0x16   :  { %6352 = vmatprep.subr.mxu1 %v89_v3  ;;  %6323 = vmatpush3.msra.mxu0 %v5508_v2  ;;  %v5503_v12 = vld [vmem:[%s9978_s24 + $0x88] sm:$0xff]  ;;  %v5502_v14 = vld [vmem:[%s9978_s24 + $0x80] sm:$0xff]  ;;  %v5501_v16 = vld [vmem:[%s9978_s24 + $0x78] sm:$0xff] }
  0x17   :  { %6353 = vmatpush3.msra.mxu1 %v89_v3  ;;  %6324 = vmatprep.subr.mxu0 %v5507_v4  ;;  %v84_v13 = vld [vmem:[%s9978_s24 + $0x28] sm:$0xff]  ;;  %v83_v15 = vld [vmem:[%s9978_s24 + $0x20] sm:$0xff]  ;;  %v82_v17 = vld [vmem:[%s9978_s24 + $0x18] sm:$0xff] }
  0x18   :  { %6354 = vmatprep.subr.mxu1 %v88_v5  ;;  %6325 = vmatpush3.msra.mxu0 %v5507_v4  ;;  %v5500_v18 = vld [vmem:[%s9978_s24 + $0x70] sm:$0xff] }
  0x19   :  { %6355 = vmatpush3.msra.mxu1 %v88_v5  ;;  %6326 = vmatprep.subr.mxu0 %v5506_v6  ;;  %v81_v19 = vld [vmem:[%s9978_s24 + $0x10] sm:$0xff] }
  0x1a   :  { %6356 = vmatprep.subr.mxu1 %v87_v7  ;;  %6327 = vmatpush3.msra.mxu0 %v5506_v6 }
  0x1b   :  { %6357 = vmatpush3.msra.mxu1 %v87_v7  ;;  %6328 = vmatprep.subr.mxu0 %v5505_v8 }
  0x1c   :  { %6358 = vmatprep.subr.mxu1 %v86_v9  ;;  %6329 = vmatpush3.msra.mxu0 %v5505_v8 }
  0x1d   :  { %6359 = vmatpush3.msra.mxu1 %v86_v9  ;;  %6330 = vmatprep.subr.mxu0 %v5504_v10 }
  0x1e   :  { %6360 = vmatprep.subr.mxu1 %v85_v11  ;;  %6331 = vmatpush3.msra.mxu0 %v5504_v10 }
  0x1f   :  { %6361 = vmatpush3.msra.mxu1 %v85_v11  ;;  %6332 = vmatprep.subr.mxu0 %v5503_v12 }
  0x20   :  { %6362 = vmatprep.subr.mxu1 %v84_v13  ;;  %6333 = vmatpush3.msra.mxu0 %v5503_v12 }
  0x21   :  { %6363 = vmatpush3.msra.mxu1 %v84_v13  ;;  %6334 = vmatprep.subr.mxu0 %v5502_v14 }
  0x22   :  { %6364 = vmatprep.subr.mxu1 %v83_v15  ;;  %6335 = vmatpush3.msra.mxu0 %v5502_v14 }
  0x23   :  { %6365 = vmatpush3.msra.mxu1 %v83_v15 }
  0x24   :  { %28 = vsyncpa [#allocation7], 0  ;;  %6336 = vmatprep.subr.mxu0 %v5501_v16  ;;  %6366 = vmatprep.subr.mxu1 %v82_v17  ;;  %v5499_v20 = vld [vmem:[%s9978_s24 + $0x68] sm:$0xff]  ;;  %v5498_v22 = vld [vmem:[%s9978_s24 + $0x60] sm:$0xff]  ;;  %s9979_s27 = sld [smem:[#allocation9_spill]]  ;;  %vm108_vm0 = vcmask 785408  }
  0x25   :  { %6337 = vmatpush3.msra.mxu0 %v5501_v16  ;;  %6367 = vmatpush3.msra.mxu1 %v82_v17  ;;  %v80_v21 = vld [vmem:[%s9978_s24 + $0x8] sm:$0xff]  ;;  %v79_v23 = vld [vmem:[%s9978_s24] sm:$0xff]  ;;  %v5529_v28 = vld [vmem:[%s9978_s24 + $0x118] sm:$0xff]  ;;  %s9980_s1 = sld [smem:[#allocation12_spill]]  ;;  %vm436_vm1 = vcmask 982016   ;;  %vm440_vm2 = vcmask 979968  }
  0x26   :  { %6338 = vmatprep.subr.mxu0 %v5500_v18  ;;  %6368 = vmatprep.subr.mxu1 %v81_v19  ;;  %v5528_v31 = vld [vmem:[%s9978_s24 + $0x110] sm:$0xff]  ;;  %v5527_v33 = vld [vmem:[%s9978_s24 + $0x108] sm:$0xff]  ;;  %v5526_v36 = vld [vmem:[%s9978_s24 + $0x100] sm:$0xff]  ;;  %s9981_s6 = sld [smem:[#allocation11_spill]]  ;;  %vm894_vm3 = vcmask 1043456   ;;  %vm887_vm4 = vcmask 228352  }
  0x27   :  { %6339 = vmatpush3.msra.mxu0 %v5500_v18  ;;  %6369 = vmatpush3.msra.mxu1 %v81_v19  ;;  %v5525_v37 = vld [vmem:[%s9978_s24 + $0xf8] sm:$0xff]  ;;  %v5524_v38 = vld [vmem:[%s9978_s24 + $0xf0] sm:$0xff]  ;;  %v5523_v39 = vld [vmem:[%s9978_s24 + $0xe8] sm:$0xff]  ;;  %s9982_s4 = sld [smem:[#allocation13_spill]]  ;;  %vm1088_vm5 = vcmask 326656   ;;  %vm1268_vm6 = vcmask 687104  }
  0x28   :  { %6340 = vmatprep.subr.mxu0 %v5499_v20  ;;  %6370 = vmatprep.subr.mxu1 %v80_v21  ;;  %v5522_v40 = vld [vmem:[%s9978_s24 + $0xe0] sm:$0xff]  ;;  %v5521_v41 = vld [vmem:[%s9978_s24 + $0xd8] sm:$0xff]  ;;  %v5520_v42 = vld [vmem:[%s9978_s24 + $0xd0] sm:$0xff]  ;;  %s9983_s5 = sld [smem:[#allocation14_spill]]  ;;  %vm1270_vm7 = vcmask 685056   ;;  %vm1878_vm8 = vcmask 1041408  }
  0x29   :  { %6341 = vmatpush3.msra.mxu0 %v5499_v20  ;;  %6371 = vmatpush3.msra.mxu1 %v80_v21  ;;  %v5519_v43 = vld [vmem:[%s9978_s24 + $0xc8] sm:$0xff]  ;;  %v5518_v44 = vld [vmem:[%s9978_s24 + $0xc0] sm:$0xff]  ;;  %s9984_s7 = sld [smem:[#allocation15_spill]]  ;;  %vm1874_vm9 = vcmask 80896   ;;  %vm2053_vm10 = vcmask 261120   ;;  %vm6825_vm11 = vmmov 0  }
  0x2a   :  { %v91_v24 = vld [vmem:[%s9979_s27 + $0x1] sm:$0xff]  ;;  %6342 = vmatprep.subr.mxu0 %v5498_v22  ;;  %6372 = vmatprep.subr.mxu1 %v79_v23  ;;  %v92_v26 = vld [vmem:[%s9979_s27 + $0x9] sm:$0xff]  ;;  %v93_v29 = vld [vmem:[%s9979_s27 + $0x11] sm:$0xff]  ;;  %s9985_s3 = sld [smem:[#allocation16_spill]]  ;;  %vm2218_vm12 = vcmask 651264   ;;  %vm2243_vm13 = vcmask 654336  }
  0x2b   :  { %v75_v25 = vld [vmem:[%s9979_s27] sm:$0xff]  ;;  %v76_v27 = vld [vmem:[%s9979_s27 + $0x8] sm:$0xff]  ;;  %6343 = vmatpush3.msra.mxu0 %v5498_v22  ;;  %6344 = vmatprep.mubr.msk.f32.mxu0 %vm108_vm0, %v91_v24  ;;  %v77_v30 = vld [vmem:[%s9979_s27 + $0x10] sm:$0xff]  ;;  %vm2651_vm14 = vcmask 253952   ;;  %s6826_s29 = smov [#allocation6]   ;;  %vm5482_vm15 = vcmask 74752  }
  0x2c   :  { %6373 = vmatpush3.msra.mxu1 %v79_v23  ;;  %6374 = vmatprep.mubr.msk.f32.mxu1 %vm108_vm0, %v75_v25  ;;  %v78_v32 = vld [vmem:[%s9979_s27 + $0x18] sm:$0x3f]  ;;  %v303_v35 = vld [vmem:[%s9979_s27 + $0x2] sm:$0xff]  ;;  %v304_v45 = vld [vmem:[%s9979_s27 + $0xa] sm:$0xff] }
  0x2d   :  { %6345 = vmatmul.mubr.msk.f32.vlgmr.msra.gmra.mxu0 %vm108_vm0, %v92_v26  ;;  %6375 = vmatmul.mubr.msk.f32.vlgmr.msra.gmra.mxu1 %vm108_vm0, %v76_v27  ;;  %v94_v34 = vld [vmem:[%s9979_s27 + $0x19] sm:$0x3f]  ;;  %v5563_v49 = vld [vmem:[%s9980_s1 + $0x1d0] sm:$0xff]  ;;  %v475_v50 = vld [vmem:[%s9980_s1 + $0xe8] sm:$0xff] }
  0x2e   :  { %6380 = vmatprep.subr.mxu0 %v5529_v28  ;;  %6347 = vmatprep.mubr.msk.f32.mxu0 %vm108_vm0, %v93_v29  ;;  %v305_v46 = vld [vmem:[%s9979_s27 + $0x12] sm:$0xff]  ;;  %v306_v47 = vld [vmem:[%s9979_s27 + $0x1a] sm:$0x3f]  ;;  %v5562_v51 = vld [vmem:[%s9980_s1 + $0x1c8] sm:$0xff] }
  0x2f   :  { %6381 = vmatpush3.msra.mxu0 %v5529_v28  ;;  %6377 = vmatprep.mubr.msk.f32.mxu1 %vm108_vm0, %v77_v30  ;;  %v5564_v48 = vld [vmem:[%s9980_s1 + $0x1d8] sm:$0xff]  ;;  %v474_v52 = vld [vmem:[%s9980_s1 + $0xe0] sm:$0xff]  ;;  %v472_v56 = vld [vmem:[%s9980_s1 + $0xd0] sm:$0xff] }
  0x30   :  { %6382 = vmatprep.subr.mxu0 %v5528_v31  ;;  %525 = vmatprep.subr.mxu1 %v5564_v48  ;;  %v5561_v53 = vld [vmem:[%s9980_s1 + $0x1c0] sm:$0xff]  ;;  %v473_v54 = vld [vmem:[%s9980_s1 + $0xd8] sm:$0xff]  ;;  %v5559_v57 = vld [vmem:[%s9980_s1 + $0x1b0] sm:$0xff] }
  0x31   :  { %6383 = vmatpush3.msra.mxu0 %v5528_v31  ;;  %6378 = vmatmul.mubr.msk.f32.gmra.mxu1 %vm108_vm0, %v78_v32  ;;  %v5560_v55 = vld [vmem:[%s9980_s1 + $0x1b8] sm:$0xff]  ;;  %v471_v58 = vld [vmem:[%s9980_s1 + $0xc8] sm:$0xff]  ;;  %v470_v60 = vld [vmem:[%s9980_s1 + $0xc0] sm:$0xff] }
  0x32   :  { %6384 = vmatprep.subr.mxu0 %v5527_v33  ;;  %6348 = vmatmul.mubr.msk.f32.gmra.mxu0 %vm108_vm0, %v94_v34  ;;  %v5558_v59 = vld [vmem:[%s9980_s1 + $0x1a8] sm:$0xff]  ;;  %v469_v61 = vld [vmem:[%s9980_s1 + $0xb8] sm:$0xff]  ;;  %v5557_v62 = vld [vmem:[%s9980_s1 + $0x1a0] sm:$0xff] }
  0x33   :  { %6385 = vmatpush3.msra.mxu0 %v5527_v33  ;;  %6404 = vmatprep.mubr.msk.f32.mxu0 %vm108_vm0, %v303_v35  ;;  %v468_v63 = vld [vmem:[%s9980_s1 + $0xb0] sm:$0xff]  ;;  %v5556_v0 = vld [vmem:[%s9980_s1 + $0x198] sm:$0xff]  ;;  %v467_v1 = vld [vmem:[%s9980_s1 + $0xa8] sm:$0xff] }
  0x34   :  { %6386 = vmatprep.subr.mxu0 %v5526_v36  ;;  %526 = vmatpush1.msra.mxu1 %v5563_v49  ;;  %v5555_v2 = vld [vmem:[%s9980_s1 + $0x190] sm:$0xff]  ;;  %v466_v3 = vld [vmem:[%s9980_s1 + $0xa0] sm:$0xff]  ;;  %v5554_v4 = vld [vmem:[%s9980_s1 + $0x188] sm:$0xff] }
  0x35   :  { %6387 = vmatpush3.msra.mxu0 %v5526_v36  ;;  %527 = vmatprep.subr.mxu1 %v5562_v51  ;;  %v465_v5 = vld [vmem:[%s9980_s1 + $0x98] sm:$0xff]  ;;  %v5553_v6 = vld [vmem:[%s9980_s1 + $0x180] sm:$0xff]  ;;  %v464_v7 = vld [vmem:[%s9980_s1 + $0x90] sm:$0xff] }
  0x36   :  { %6388 = vmatprep.subr.mxu0 %v5525_v37  ;;  %528 = vmatpush1.msra.mxu1 %v5561_v53  ;;  %v5552_v8 = vld [vmem:[%s9980_s1 + $0x178] sm:$0xff]  ;;  %v463_v9 = vld [vmem:[%s9980_s1 + $0x88] sm:$0xff]  ;;  %v5551_v10 = vld [vmem:[%s9980_s1 + $0x170] sm:$0xff] }
  0x37   :  { %6389 = vmatpush3.msra.mxu0 %v5525_v37  ;;  %529 = vmatprep.subr.mxu1 %v5560_v55  ;;  %v5550_v11 = vld [vmem:[%s9980_s1 + $0x168] sm:$0xff]  ;;  %v462_v12 = vld [vmem:[%s9980_s1 + $0x80] sm:$0xff]  ;;  %v461_v14 = vld [vmem:[%s9980_s1 + $0x78] sm:$0xff] }
  0x38   :  { %6390 = vmatprep.subr.mxu0 %v5524_v38  ;;  %530 = vmatpush1.msra.mxu1 %v5559_v57  ;;  %v5549_v13 = vld [vmem:[%s9980_s1 + $0x160] sm:$0xff]  ;;  %v5548_v15 = vld [vmem:[%s9980_s1 + $0x158] sm:$0xff]  ;;  %v460_v16 = vld [vmem:[%s9980_s1 + $0x70] sm:$0xff] }
  0x39   :  { %6391 = vmatpush3.msra.mxu0 %v5524_v38  ;;  %531 = vmatprep.subr.mxu1 %v5558_v59  ;;  %v5547_v17 = vld [vmem:[%s9980_s1 + $0x150] sm:$0xff]  ;;  %v459_v18 = vld [vmem:[%s9980_s1 + $0x68] sm:$0xff]  ;;  %v458_v20 = vld [vmem:[%s9980_s1 + $0x60] sm:$0xff] }
  0x3a   :  { %6392 = vmatprep.subr.mxu0 %v5523_v39  ;;  %532 = vmatpush1.msra.mxu1 %v5557_v62  ;;  %v5546_v19 = vld [vmem:[%s9980_s1 + $0x148] sm:$0xff]  ;;  %v5545_v21 = vld [vmem:[%s9980_s1 + $0x140] sm:$0xff]  ;;  %v457_v22 = vld [vmem:[%s9980_s1 + $0x58] sm:$0xff] }
  0x3b   :  { %6393 = vmatpush3.msra.mxu0 %v5523_v39  ;;  %533 = vmatprep.subr.mxu1 %v5556_v0  ;;  %v5544_v23 = vld [vmem:[%s9980_s1 + $0x138] sm:$0xff]  ;;  %v456_v24 = vld [vmem:[%s9980_s1 + $0x50] sm:$0xff]  ;;  %v455_v26 = vld [vmem:[%s9980_s1 + $0x48] sm:$0xff] }
  0x3c   :  { %6394 = vmatprep.subr.mxu0 %v5522_v40  ;;  %534 = vmatpush1.msra.mxu1 %v5555_v2  ;;  %v5543_v25 = vld [vmem:[%s9980_s1 + $0x130] sm:$0xff]  ;;  %v5542_v27 = vld [vmem:[%s9980_s1 + $0x128] sm:$0xff]  ;;  %v454_v28 = vld [vmem:[%s9980_s1 + $0x40] sm:$0xff] }
  0x3d   :  { %6395 = vmatpush3.msra.mxu0 %v5522_v40  ;;  %535 = vmatprep.subr.mxu1 %v5554_v4  ;;  %v5541_v29 = vld [vmem:[%s9980_s1 + $0x120] sm:$0xff]  ;;  %v453_v30 = vld [vmem:[%s9980_s1 + $0x38] sm:$0xff]  ;;  %v452_v32 = vld [vmem:[%s9980_s1 + $0x30] sm:$0xff] }
  0x3e   :  { %6396 = vmatprep.subr.mxu0 %v5521_v41  ;;  %536 = vmatpush1.msra.mxu1 %v5553_v6  ;;  %v5540_v31 = vld [vmem:[%s9980_s1 + $0x118] sm:$0xff]  ;;  %v5539_v33 = vld [vmem:[%s9980_s1 + $0x110] sm:$0xff]  ;;  %v451_v34 = vld [vmem:[%s9980_s1 + $0x28] sm:$0xff] }
  0x3f   :  { %6397 = vmatpush3.msra.mxu0 %v5521_v41  ;;  %537 = vmatprep.subr.mxu1 %v5552_v8  ;;  %v5538_v35 = vld [vmem:[%s9980_s1 + $0x108] sm:$0xff]  ;;  %v450_v36 = vld [vmem:[%s9980_s1 + $0x20] sm:$0xff]  ;;  %v449_v38 = vld [vmem:[%s9980_s1 + $0x18] sm:$0xff] }
  0x40   :  { %6398 = vmatprep.subr.mxu0 %v5520_v42  ;;  %538 = vmatpush1.msra.mxu1 %v5551_v10  ;;  %v5537_v37 = vld [vmem:[%s9980_s1 + $0x100] sm:$0xff]  ;;  %v5536_v39 = vld [vmem:[%s9980_s1 + $0xf8] sm:$0xff]  ;;  %v448_v40 = vld [vmem:[%s9980_s1 + $0x10] sm:$0xff] }
  0x41   :  { %6399 = vmatpush3.msra.mxu0 %v5520_v42  ;;  %539 = vmatprep.subr.mxu1 %v5550_v11  ;;  %v5535_v41 = vld [vmem:[%s9980_s1 + $0xf0] sm:$0xff]  ;;  %v447_v42 = vld [vmem:[%s9980_s1 + $0x8] sm:$0xff]  ;;  %v5534_v55 = vld [vmem:[%s9981_s6] ss:$0 sm:$0xff] }
  0x42   :  { %6400 = vmatprep.subr.mxu0 %v5519_v43  ;;  %540 = vmatpush1.msra.mxu1 %v5549_v13  ;;  %v5601_v11 = vld [vmem:[%s9980_s1 + $0x2c0] sm:$0xff] }
  0x43   :  { %6401 = vmatpush3.msra.mxu0 %v5519_v43  ;;  %541 = vmatprep.subr.mxu1 %v5548_v15  ;;  %v446_v43 = vld [vmem:[%s9980_s1] sm:$0xff]  ;;  %v5599_v15 = vld [vmem:[%s9980_s1 + $0x2b0] sm:$0xff] }
  0x44   :  { %6402 = vmatprep.subr.mxu0 %v5518_v44  ;;  %542 = vmatpush1.msra.mxu1 %v5547_v17  ;;  %v5597_v17 = vld [vmem:[%s9980_s1 + $0x2a0] sm:$0xff] }
  0x45   :  { %6403 = vmatpush3.msra.mxu0 %v5518_v44  ;;  %543 = vmatprep.subr.mxu1 %v5546_v19  ;;  %v5602_v44 = vld [vmem:[%s9980_s1 + $0x2c8] sm:$0xff]  ;;  %v5596_v19 = vld [vmem:[%s9980_s1 + $0x298] sm:$0xff] }
  0x46   :  { %6405 = vmatmul.mubr.msk.f32.vlgmr.msra.gmra.mxu0 %vm108_vm0, %v304_v45  ;;  %626 = vmatprep.subr.mxu0 %v475_v50  ;;  %v6824_v45 = vmov 0.0  }
  0x47   :  { %6407 = vmatprep.mubr.msk.f32.mxu0 %vm108_vm0, %v305_v46  ;;  %627 = vmatpush1.msra.mxu0 %v474_v52 }
  0x48   :  { %628 = vmatprep.subr.mxu0 %v473_v54  ;;  %544 = vmatpush1.msra.mxu1 %v5545_v21  ;;  %v5595_v21 = vld [vmem:[%s9980_s1 + $0x290] sm:$0xff] }
  0x49   :  { %629 = vmatpush1.msra.mxu0 %v472_v56  ;;  %545 = vmatprep.subr.mxu1 %v5544_v23  ;;  %v5593_v23 = vld [vmem:[%s9980_s1 + $0x280] sm:$0xff] }
  0x4a   :  { %6408 = vmatmul.mubr.msk.f32.gmra.mxu0 %vm108_vm0, %v306_v47  ;;  %630 = vmatprep.subr.mxu0 %v471_v58 }
  0x4b   :  { %631 = vmatpush1.msra.mxu0 %v470_v60  ;;  %546 = vmatpush1.msra.mxu1 %v5543_v25  ;;  %v5592_v25 = vld [vmem:[%s9980_s1 + $0x278] sm:$0xff] }
  0x4c   :  { %632 = vmatprep.subr.mxu0 %v469_v61  ;;  %547 = vmatprep.subr.mxu1 %v5542_v27  ;;  %v5591_v27 = vld [vmem:[%s9980_s1 + $0x270] sm:$0xff] }
  0x4d   :  { %633 = vmatpush1.msra.mxu0 %v468_v63  ;;  %548 = vmatpush1.msra.mxu1 %v5541_v29  ;;  %v5589_v29 = vld [vmem:[%s9980_s1 + $0x260] sm:$0xff] }
  0x4e   :  { %634 = vmatprep.subr.mxu0 %v467_v1  ;;  %549 = vmatprep.subr.mxu1 %v5540_v31  ;;  %v5588_v31 = vld [vmem:[%s9980_s1 + $0x258] sm:$0xff] }
  0x4f   :  { %635 = vmatpush1.msra.mxu0 %v466_v3  ;;  %550 = vmatpush1.msra.mxu1 %v5539_v33  ;;  %v5587_v33 = vld [vmem:[%s9980_s1 + $0x250] sm:$0xff] }
  0x50   :  { %636 = vmatprep.subr.mxu0 %v465_v5  ;;  %551 = vmatprep.subr.mxu1 %v5538_v35  ;;  %v5585_v35 = vld [vmem:[%s9980_s1 + $0x240] sm:$0xff] }
  0x51   :  { %637 = vmatpush1.msra.mxu0 %v464_v7  ;;  %552 = vmatpush1.msra.mxu1 %v5537_v37  ;;  %v5583_v37 = vld [vmem:[%s9980_s1 + $0x230] sm:$0xff] }
  0x52   :  { %638 = vmatprep.subr.mxu0 %v463_v9  ;;  %553 = vmatprep.subr.mxu1 %v5536_v39  ;;  %v5581_v39 = vld [vmem:[%s9980_s1 + $0x220] sm:$0xff] }
  0x53   :  { %639 = vmatpush1.msra.mxu0 %v462_v12  ;;  %554 = vmatpush1.msra.mxu1 %v5535_v41  ;;  %v5579_v41 = vld [vmem:[%s9980_s1 + $0x210] sm:$0xff] }
  0x54   :  { %640 = vmatprep.subr.mxu0 %v461_v14  ;;  %587 = vmatprep.mubr.f32.mxu1 %v6824_v45  ;;  %v5600_v14 = vld [vmem:[%s9980_s1 + $0x2b8] sm:$0xff] }
  0x55   :  { %641 = vmatpush1.msra.mxu0 %v460_v16  ;;  %688 = vmatprep.mubr.f32.mxu0 %v6824_v45  ;;  %v5598_v16 = vld [vmem:[%s9980_s1 + $0x2a8] sm:$0xff] }
  0x56   :  { %642 = vmatprep.subr.mxu0 %v459_v18  ;;  %762 = vmatprep.subr.mxu1 %v5602_v44  ;;  %v5576_v44 = vld [vmem:[%s9980_s1 + $0x1f8] sm:$0xff] }
  0x57   :  { %643 = vmatpush1.msra.mxu0 %v458_v20 }
  0x58   :  { %644 = vmatprep.subr.mxu0 %v457_v22  ;;  %v5594_v22 = vld [vmem:[%s9980_s1 + $0x288] sm:$0xff] }
  0x59   :  { %645 = vmatpush1.msra.mxu0 %v456_v24 }
  0x5a   :  { %646 = vmatprep.subr.mxu0 %v455_v26 }
  0x5b   :  { %647 = vmatpush1.msra.mxu0 %v454_v28  ;;  %v5590_v28 = vld [vmem:[%s9980_s1 + $0x268] sm:$0xff] }
  0x5c   :  { %648 = vmatprep.subr.mxu0 %v453_v30 }
  0x5d   :  { %649 = vmatpush1.msra.mxu0 %v452_v32 }
  0x5e   :  { %650 = vmatprep.subr.mxu0 %v451_v34  ;;  %v5586_v34 = vld [vmem:[%s9980_s1 + $0x248] sm:$0xff] }
  0x5f   :  { %651 = vmatpush1.msra.mxu0 %v450_v36  ;;  %v5584_v36 = vld [vmem:[%s9980_s1 + $0x238] sm:$0xff] }
  0x60   :  { %652 = vmatprep.subr.mxu0 %v449_v38  ;;  %v5582_v38 = vld [vmem:[%s9980_s1 + $0x228] sm:$0xff] }
  0x61   :  { %653 = vmatpush1.msra.mxu0 %v448_v40  ;;  %v5580_v40 = vld [vmem:[%s9980_s1 + $0x218] sm:$0xff] }
  0x62   :  { %654 = vmatprep.subr.mxu0 %v447_v42  ;;  %v5578_v42 = vld [vmem:[%s9980_s1 + $0x208] sm:$0xff] }
  0x63   :  { %655 = vmatpush1.msra.mxu0 %v446_v43  ;;  %v5577_v43 = vld [vmem:[%s9980_s1 + $0x200] sm:$0xff] }
  0xed   :  { %v6346_v46 = vpop.f32.mrf.mxu0  ;;  %v6376_v47 = vpop.f32.mrf.mxu1 }
  0xee   :  { %v290_v53 = vadd.f32 %v6376_v47, %v6346_v46  ;;  %v5575_v46 = vld [vmem:[%s9980_s1 + $0x1f0] sm:$0xff]  ;;  %v5574_v47 = vld [vmem:[%s9980_s1 + $0x1e8] sm:$0xff] }
  0xef   :  { %v187_v48 = vpop.f32.mrf.mxu0  ;;  %v284_v50 = vpop.f32.mrf.mxu1 }
  0xf0   :  { %v285_v56 = vadd.f32 %v284_v50, %v187_v48  ;;  %v5573_v48 = vld [vmem:[%s9980_s1 + $0x1e0] sm:$0xff] }
  0xf1   :  { %v6379_v51 = vpop.f32.mrf.mxu1 }
  0xf2   :  { %v6349_v49 = vpop.f32.mrf.mxu0 }
  0xf3   :  { %v294_v58 = vpop.f32.mrf.mxu1  ;;  %v300_v60 = vadd.f32 %v6379_v51, %v6349_v49 }
  0xf4   :  { %v197_v52 = vpop.f32.mrf.mxu0 }
  0xf5   :  { %v295_v0 = vadd.f32 %v294_v58, %v197_v52 }
 0x106   :  { %v6406_v54 = vpop.f32.mrf.mxu0 }
 0x107   :  { %v418_v57 = vadd.f32 %v6406_v54, %v290_v53 }
 0x108   :  { %v398_v59 = vpop.f32.mrf.mxu0 }
 0x109   :  { %v429_v61 = vadd.f32 %v5534_v55, %v418_v57  ;;  %v417_v62 = vadd.f32 %v398_v59, %v285_v56 }
 0x10a   :  { %v6409_v63 = vpop.f32.mrf.mxu0 }
 0x10b   :  { %v433_v1 = vmax.f32 %v429_v61, 0.0  ;;  %v428_v2 = vadd.f32 %v5534_v55, %v417_v62  ;;  %v420_v3 = vadd.f32 %v6409_v63, %v300_v60 }
 0x10c   :  { %v408_v4 = vpop.f32.mrf.mxu0 }
 0x10d   :  { %438 = vst.msk [vmem:[#allocation2 + $0x8] sm:$0xff] %vm436_vm1, %v433_v1  ;;  %v432_v5 = vmax.f32 %v428_v2, 0.0  ;;  %v431_v6 = vadd.f32 %v5534_v55, %v420_v3  ;;  %v419_v7 = vadd.f32 %v408_v4, %v295_v0  ;;  %v859_v4 = vlaneseq }
 0x10f   :  { %437 = vst.msk [vmem:[#allocation2] sm:$0xff] %vm436_vm1, %v432_v5  ;;  %v435_v8 = vmax.f32 %v431_v6, 0.0  ;;  %v430_v9 = vadd.f32 %v5534_v55, %v419_v7 }
 0x111   :  { %441 = vst.msk [vmem:[#allocation2 + $0x18] sm:$0x3f] %vm440_vm2, %v435_v8  ;;  %v434_v10 = vmax.f32 %v430_v9, 0.0  ;;  %v860_v8 = vshrl.u32 %v859_v4, 7  ;;  %v1180_v4 = vld [vmem:[%s9943_s8 + $0x50] sm:$0xff] }
 0x113   :  { %439 = vst.msk [vmem:[#allocation2 + $0x10] sm:$0xff] %vm436_vm1, %v434_v10 }
 0x114   :  { %v443_v20 = vld [vmem:[#allocation2 + $0x8] sm:$0xff] }
 0x116   :  { %v476_v12 = vld [vmem:[#allocation2 + $0x1] sm:$0xff] }
 0x117   :  { %v442_v13 = vld [vmem:[#allocation2] sm:$0xff]  ;;  %5565 = vmatmul.mubr.msk.f32.vlgmr.msra.gmra.mxu1 %vm436_vm1, %v476_v12  ;;  %v7406_v12 = vsub.s32 0, %v860_v8 }
 0x118   :  { %5569 = vmatmul.mubr.msk.f32.vlgmr.msra.gmra.mxu0 %vm436_vm1, %v442_v13  ;;  %763 = vmatpush1.msra.mxu1 %v5601_v11  ;;  %v479_v30 = vld [vmem:[#allocation2 + $0x19] sm:$0xf]  ;;  %v713_v49 = vld [vmem:[#allocation2 + $0x2] sm:$0xff] }
 0x119   :  { %593 = vmatprep.mubr.f32.mxu1 %v6824_v45  ;;  %764 = vmatprep.subr.mxu1 %v5600_v14  ;;  %v445_v32 = vld [vmem:[#allocation2 + $0x18] sm:$0xf] }
 0x11a   :  { %694 = vmatprep.mubr.f32.mxu0 %v6824_v45  ;;  %765 = vmatpush1.msra.mxu1 %v5599_v15  ;;  %v477_v18 = vld [vmem:[#allocation2 + $0x9] sm:$0xff]  ;;  %v478_v24 = vld [vmem:[#allocation2 + $0x11] sm:$0xff]  ;;  %v716_v52 = vld [vmem:[#allocation2 + $0x1a] sm:$0xf] }
 0x11b   :  { %766 = vmatprep.subr.mxu1 %v5598_v16  ;;  %5566 = vmatmul.mubr.msk.f32.gmra.mxu1 %vm436_vm1, %v477_v18  ;;  %v444_v26 = vld [vmem:[#allocation2 + $0x10] sm:$0xff]  ;;  %v857_v16 = vld [vmem:[%s9982_s4] sm:$0x3] }
 0x11c   :  { %5570 = vmatmul.mubr.msk.f32.gmra.mxu0 %vm436_vm1, %v443_v20  ;;  %767 = vmatpush1.msra.mxu1 %v5597_v17  ;;  %v714_v50 = vld [vmem:[#allocation2 + $0xa] sm:$0xff]  ;;  %v715_v51 = vld [vmem:[#allocation2 + $0x12] sm:$0xff]  ;;  %v7411_v17 = vsub.s32 1, %v860_v8  ;;  %v1178_v8 = vld [vmem:[%s9943_s8 + $0x40] sm:$0xff] }
 0x11d   :  { %768 = vmatprep.subr.mxu1 %v5596_v19  ;;  %599 = vmatprep.mubr.f32.mxu1 %v6824_v45 }
 0x11e   :  { %769 = vmatpush1.msra.mxu1 %v5595_v21  ;;  %700 = vmatprep.mubr.f32.mxu0 %v6824_v45 }
 0x11f   :  { %770 = vmatprep.subr.mxu1 %v5594_v22  ;;  %5567 = vmatmul.mubr.msk.f32.gmra.mxu1 %vm436_vm1, %v478_v24 }
 0x120   :  { %5571 = vmatmul.mubr.msk.f32.gmra.mxu0 %vm436_vm1, %v444_v26  ;;  %771 = vmatpush1.msra.mxu1 %v5593_v23 }
 0x121   :  { %772 = vmatprep.subr.mxu1 %v5592_v25  ;;  %605 = vmatprep.mubr.f32.mxu1 %v6824_v45  ;;  %v862_v25 = vrot.slane %v857_v16, %v7406_v12 }
 0x122   :  { %773 = vmatpush1.msra.mxu1 %v5591_v27  ;;  %706 = vmatprep.mubr.f32.mxu0 %v6824_v45 }
 0x123   :  { %774 = vmatprep.subr.mxu1 %v5590_v28  ;;  %5568 = vmatmul.mubr.msk.f32.gmra.mxu1 %vm436_vm1, %v479_v30 }
 0x124   :  { %5572 = vmatmul.mubr.msk.f32.gmra.mxu0 %vm436_vm1, %v445_v32  ;;  %775 = vmatpush1.msra.mxu1 %v5589_v29  ;;  %v866_v29 = vrot.slane %v857_v16, %v7411_v17  ;;  %v1071_v16 = vld [vmem:[%s9985_s3 + $0x20] sm:$0xff] }
 0x125   :  { %776 = vmatprep.subr.mxu1 %v5588_v31  ;;  %824 = vmatprep.mubr.f32.mxu1 %v6824_v45 }
 0x126   :  { %777 = vmatpush1.msra.mxu1 %v5587_v33  ;;  %965 = vmatprep.mubr.f32.mxu0 %v6824_v45 }
 0x127   :  { %778 = vmatprep.subr.mxu1 %v5586_v34 }
 0x128   :  { %779 = vmatpush1.msra.mxu1 %v5585_v35 }
 0x129   :  { %780 = vmatprep.subr.mxu1 %v5584_v36 }
 0x12a   :  { %781 = vmatpush1.msra.mxu1 %v5583_v37 }
 0x12b   :  { %782 = vmatprep.subr.mxu1 %v5582_v38 }
 0x12c   :  { %783 = vmatpush1.msra.mxu1 %v5581_v39 }
 0x12d   :  { %784 = vmatprep.subr.mxu1 %v5580_v40 }
 0x12e   :  { %785 = vmatpush1.msra.mxu1 %v5579_v41 }
 0x12f   :  { %786 = vmatprep.subr.mxu1 %v5578_v42 }
 0x130   :  { %787 = vmatpush1.msra.mxu1 %v5577_v43 }
 0x131   :  { %788 = vmatprep.subr.mxu1 %v5576_v44 }
 0x132   :  { %789 = vmatpush1.msra.mxu1 %v5575_v46 }
 0x133   :  { %790 = vmatprep.subr.mxu1 %v5574_v47 }
 0x134   :  { %791 = vmatpush1.msra.mxu1 %v5573_v48 }
 0x135   :  { %5603 = vmatmul.mubr.msk.f32.vlgmr.msra.gmra.mxu1 %vm436_vm1, %v713_v49 }
 0x136   :  { %830 = vmatprep.mubr.f32.mxu1 %v6824_v45 }
 0x139   :  { %5604 = vmatmul.mubr.msk.f32.gmra.mxu1 %vm436_vm1, %v714_v50 }
 0x13a   :  { %836 = vmatprep.mubr.f32.mxu1 %v6824_v45 }
 0x13d   :  { %5605 = vmatmul.mubr.msk.f32.gmra.mxu1 %vm436_vm1, %v715_v51 }
 0x13e   :  { %842 = vmatprep.mubr.f32.mxu1 %v6824_v45 }
 0x141   :  { %5606 = vmatmul.mubr.msk.f32.gmra.mxu1 %vm436_vm1, %v716_v52 }
 0x142   :  { %1050 = vmatprep.mubr.f32.mxu1 %v6824_v45 }
 0x1d7   :  { %v589_v53 = vpop.f32.mrf.mxu1 }
 0x1d8   :  { %v690_v56 = vpop.f32.mrf.mxu0 }
 0x1d9   :  { %v591_v54 = vpop.f32.mrf.mxu1  ;;  %v691_v32 = vadd.f32 %v690_v56, %v589_v53  ;;  %v885_v53 = vld [vmem:[%s9983_s5] sm:$0xff]  ;;  %v1185_v56 = vld [vmem:[%s9943_s8 + $0x78] sm:$0xff] }
 0x1da   :  { %v692_v58 = vpop.f32.mrf.mxu0 }
 0x1db   :  { %v595_v55 = vpop.f32.mrf.mxu1  ;;  %v693_v28 = vadd.f32 %v692_v58, %v591_v54  ;;  %v978_v54 = vld [vmem:[%s9984_s7] sm:$0xff]  ;;  %v979_v58 = vld [vmem:[%s9984_s7 + $0x8] sm:$0x3f] }
 0x1dc   :  { %v696_v60 = vpop.f32.mrf.mxu0 }
 0x1dd   :  { %v597_v57 = vpop.f32.mrf.mxu1  ;;  %v697_v24 = vadd.f32 %v696_v60, %v595_v55  ;;  %v1082_v55 = vld [vmem:[%s9985_s3 + $0x78] sm:$0xff]  ;;  %v1184_v60 = vld [vmem:[%s9943_s8 + $0x70] sm:$0xff] }
 0x1de   :  { %v698_v62 = vpop.f32.mrf.mxu0 }
 0x1df   :  { %v601_v59 = vpop.f32.mrf.mxu1  ;;  %v699_v20 = vadd.f32 %v698_v62, %v597_v57  ;;  %v886_v57 = vld [vmem:[%s9983_s5 + $0x8] sm:$0x3f] }
 0x1e0   :  { %v702_v0 = vpop.f32.mrf.mxu0  ;;  %v1183_v62 = vld [vmem:[%s9943_s8 + $0x68] sm:$0xff] }
 0x1e1   :  { %v603_v61 = vpop.f32.mrf.mxu1  ;;  %v703_v18 = vadd.f32 %v702_v0, %v601_v59  ;;  %v1081_v59 = vld [vmem:[%s9985_s3 + $0x70] sm:$0xff]  ;;  %v1182_v0 = vld [vmem:[%s9943_s8 + $0x60] sm:$0xff] }
 0x1e2   :  { %v704_v3 = vpop.f32.mrf.mxu0 }
 0x1e3   :  { %v607_v63 = vpop.f32.mrf.mxu1  ;;  %v705_v14 = vadd.f32 %v704_v3, %v603_v61  ;;  %v1080_v61 = vld [vmem:[%s9985_s3 + $0x68] sm:$0xff]  ;;  %v1077_v3 = vld [vmem:[%s9985_s3 + $0x50] sm:$0xff] }
 0x1e4   :  { %v708_v7 = vpop.f32.mrf.mxu0 }
 0x1e5   :  { %v609_v1 = vpop.f32.mrf.mxu1  ;;  %v709_v15 = vadd.f32 %v708_v7, %v607_v63  ;;  %v1079_v63 = vld [vmem:[%s9985_s3 + $0x60] sm:$0xff] }
 0x1e6   :  { %v710_v11 = vpop.f32.mrf.mxu0  ;;  %v1075_v7 = vld [vmem:[%s9985_s3 + $0x40] sm:$0xff] }
 0x1e7   :  { %v711_v21 = vadd.f32 %v710_v11, %v609_v1  ;;  %v1078_v1 = vld [vmem:[%s9985_s3 + $0x58] sm:$0xff]  ;;  %v1073_v11 = vld [vmem:[%s9985_s3 + $0x30] sm:$0xff] }
 0x1f5   :  { %v826_v2 = vpop.f32.mrf.mxu1 }
 0x1f6   :  { %v849_v38 = vadd.f32 %v826_v2, %v691_v32  ;;  %v1181_v2 = vld [vmem:[%s9943_s8 + $0x58] sm:$0xff]  ;;  %v1188_v32 = vld [vmem:[%s9943_s8 + $0x90] sm:$0xff] }
 0x1f7   :  { %v828_v5 = vpop.f32.mrf.mxu1 }
 0x1f8   :  { %v850_v35 = vadd.f32 %v828_v5, %v693_v28  ;;  %v869_v47 = vadd.f32 %v862_v25, %v849_v38  ;;  %v1076_v5 = vld [vmem:[%s9985_s3 + $0x48] sm:$0xff]  ;;  %v1190_v28 = vld [vmem:[%s9943_s8 + $0xa0] sm:$0xff]  ;;  %v5640_v38 = vld [vmem:[%s9944_s9 + $0x158] sm:$0xf] }
 0x1f9   :  { %v832_v6 = vpop.f32.mrf.mxu1 }
 0x1fa   :  { %v851_v33 = vadd.f32 %v832_v6, %v697_v24  ;;  %v870_v44 = vadd.f32 %v866_v29, %v850_v35  ;;  %v877_v52 = vmax.f32 %v869_v47, 0.0  ;;  %v1179_v6 = vld [vmem:[%s9943_s8 + $0x48] sm:$0xff]  ;;  %v1083_v35 = vld [vmem:[%s9985_s3 + $0x80] sm:$0xff] }
 0x1fb   :  { %v834_v9 = vpop.f32.mrf.mxu1  ;;  %v1171_v24 = vld [vmem:[%s9943_s8 + $0x8] sm:$0xff] }
 0x1fc   :  { %v852_v30 = vadd.f32 %v834_v9, %v699_v20  ;;  %v871_v42 = vadd.f32 %v862_v25, %v851_v33  ;;  %v878_v51 = vmax.f32 %v870_v44, 0.0  ;;  %v1074_v9 = vld [vmem:[%s9985_s3 + $0x38] sm:$0xff]  ;;  %v1084_v33 = vld [vmem:[%s9985_s3 + $0x88] sm:$0xff] }
 0x1fd   :  { %v838_v10 = vpop.f32.mrf.mxu1  ;;  %v1173_v20 = vld [vmem:[%s9943_s8 + $0x18] sm:$0xff] }
 0x1fe   :  { %v853_v26 = vadd.f32 %v838_v10, %v703_v18  ;;  %v872_v40 = vadd.f32 %v866_v29, %v852_v30  ;;  %v879_v50 = vmax.f32 %v871_v42, 0.0  ;;  %v1177_v10 = vld [vmem:[%s9943_s8 + $0x38] sm:$0xff]  ;;  %v1174_v18 = vld [vmem:[%s9943_s8 + $0x20] sm:$0xff] }
 0x1ff   :  { %v840_v13 = vpop.f32.mrf.mxu1  ;;  %v1189_v30 = vld [vmem:[%s9943_s8 + $0x98] sm:$0xff] }
 0x200   :  { %v854_v22 = vadd.f32 %v840_v13, %v705_v14  ;;  %v873_v39 = vadd.f32 %v862_v25, %v853_v26  ;;  %v880_v49 = vmax.f32 %v872_v40, 0.0  ;;  %v1176_v13 = vld [vmem:[%s9943_s8 + $0x30] sm:$0xff]  ;;  %v1072_v14 = vld [vmem:[%s9985_s3 + $0x28] sm:$0xff]  ;;  %v1170_v26 = vld [vmem:[%s9943_s8] sm:$0xff] }
 0x201   :  { %v844_v19 = vpop.f32.mrf.mxu1 }
 0x202   :  { %v855_v23 = vadd.f32 %v844_v19, %v709_v15  ;;  %v874_v36 = vadd.f32 %v866_v29, %v854_v22  ;;  %v881_v48 = vmax.f32 %v873_v39, 0.0  ;;  %v1175_v15 = vld [vmem:[%s9943_s8 + $0x28] sm:$0xff]  ;;  %v1070_v19 = vld [vmem:[%s9985_s3 + $0x18] sm:$0xff]  ;;  %v1172_v22 = vld [vmem:[%s9943_s8 + $0x10] sm:$0xff] }
 0x203   :  { %v846_v27 = vpop.f32.mrf.mxu1 }
 0x204   :  { %v856_v31 = vadd.f32 %v846_v27, %v711_v21  ;;  %v875_v34 = vadd.f32 %v862_v25, %v855_v23  ;;  %v882_v46 = vmax.f32 %v874_v36, 0.0  ;;  %v1069_v21 = vld [vmem:[%s9985_s3 + $0x10] sm:$0xff]  ;;  %v1068_v23 = vld [vmem:[%s9985_s3 + $0x8] sm:$0xff]  ;;  %v1067_v25 = vld [vmem:[%s9985_s3] sm:$0xff] }
 0x205   :  { %v1087_v27 = vld [vmem:[%s9985_s3 + $0xa0] sm:$0xff] }
 0x206   :  { %v876_v37 = vadd.f32 %v866_v29, %v856_v31  ;;  %v883_v43 = vmax.f32 %v875_v34, 0.0  ;;  %v1086_v29 = vld [vmem:[%s9985_s3 + $0x98] sm:$0xff]  ;;  %v1085_v31 = vld [vmem:[%s9985_s3 + $0x90] sm:$0xff]  ;;  %v1187_v34 = vld [vmem:[%s9943_s8 + $0x88] sm:$0xff] }
 0x207   :  { %v1186_v36 = vld [vmem:[%s9943_s8 + $0x80] sm:$0xff] }
 0x208   :  { %v884_v41 = vmax.f32 %v876_v37, 0.0  ;;  %v1295_v37 = vld [vmem:[%s9944_s9 + $0xa8] sm:$0xf] }
 0x20a   :  { %5607 = vmatprep.subr.msk.mxu0 %vm894_vm3, %v884_v41  ;;  %5611 = vmatprep.subr.msk.mxu1 %vm894_vm3, %v884_v41 }
 0x20b   :  { %5608 = vmatpush1.msk.msra.mxu0 %vm894_vm3, %v883_v43  ;;  %5612 = vmatpush1.msk.msra.mxu1 %vm894_vm3, %v883_v43 }
 0x20c   :  { %927 = vmatprep.subr.mxu0 %v882_v46  ;;  %1012 = vmatprep.subr.mxu1 %v882_v46 }
 0x20d   :  { %928 = vmatpush1.msra.mxu0 %v881_v48  ;;  %1013 = vmatpush1.msra.mxu1 %v881_v48  ;;  %v1294_v48 = vld [vmem:[%s9944_s9 + $0xa0] sm:$0xf] }
 0x20e   :  { %929 = vmatprep.subr.mxu0 %v880_v49  ;;  %1014 = vmatprep.subr.mxu1 %v880_v49  ;;  %v5639_v49 = vld [vmem:[%s9944_s9 + $0x150] sm:$0xf] }
 0x20f   :  { %930 = vmatpush1.msra.mxu0 %v879_v50  ;;  %1015 = vmatpush1.msra.mxu1 %v879_v50  ;;  %v1293_v50 = vld [vmem:[%s9944_s9 + $0x98] sm:$0xff] }
 0x210   :  { %931 = vmatprep.subr.mxu0 %v878_v51  ;;  %1016 = vmatprep.subr.mxu1 %v878_v51  ;;  %v5638_v51 = vld [vmem:[%s9944_s9 + $0x148] sm:$0xff] }
 0x211   :  { %932 = vmatpush1.msra.mxu0 %v877_v52  ;;  %1017 = vmatpush1.msra.mxu1 %v877_v52 }
 0x212   :  { %5609 = vmatmul.mubr.msk.f32.vlgmr.msra.gmra.mxu0 %vm887_vm4, %v885_v53  ;;  %5613 = vmatmul.mubr.msk.f32.vlgmr.msra.gmra.mxu1 %vm887_vm4, %v978_v54 }
 0x213   :  { %971 = vmatprep.mubr.f32.mxu0 %v6824_v45  ;;  %1056 = vmatprep.mubr.f32.mxu1 %v6824_v45 }
 0x214   :  { %1095 = vmatprep.subr.mxu0 %v6824_v45  ;;  %1191 = vmatprep.subr.mxu1 %v6824_v45 }
 0x215   :  { %1096 = vmatpush1.msra.mxu0 %v1082_v55  ;;  %1192 = vmatpush1.msra.mxu1 %v1185_v56  ;;  %v1292_v56 = vld [vmem:[%s9944_s9 + $0x90] sm:$0xff] }
 0x216   :  { %5610 = vmatmul.mubr.msk.f32.gmra.mxu0 %vm887_vm4, %v886_v57  ;;  %5614 = vmatmul.mubr.msk.f32.gmra.mxu1 %vm887_vm4, %v979_v58  ;;  %v5637_v57 = vld [vmem:[%s9944_s9 + $0x140] sm:$0xff]  ;;  %v1291_v58 = vld [vmem:[%s9944_s9 + $0x88] sm:$0xff] }
 0x217   :  { %1097 = vmatprep.subr.mxu0 %v6824_v45  ;;  %1193 = vmatprep.subr.mxu1 %v6824_v45 }
 0x218   :  { %1098 = vmatpush1.msra.mxu0 %v1081_v59  ;;  %1194 = vmatpush1.msra.mxu1 %v1184_v60  ;;  %v5636_v59 = vld [vmem:[%s9944_s9 + $0x138] sm:$0xff]  ;;  %v1290_v60 = vld [vmem:[%s9944_s9 + $0x80] sm:$0xff] }
 0x219   :  { %1099 = vmatprep.subr.mxu0 %v6824_v45  ;;  %1195 = vmatprep.subr.mxu1 %v6824_v45 }
 0x21a   :  { %1100 = vmatpush1.msra.mxu0 %v1080_v61  ;;  %1196 = vmatpush1.msra.mxu1 %v1183_v62  ;;  %v5635_v61 = vld [vmem:[%s9944_s9 + $0x130] sm:$0xff]  ;;  %v1289_v62 = vld [vmem:[%s9944_s9 + $0x78] sm:$0xff] }
 0x21b   :  { %1101 = vmatprep.subr.mxu0 %v6824_v45  ;;  %1197 = vmatprep.subr.mxu1 %v6824_v45 }
 0x21c   :  { %1102 = vmatpush1.msra.mxu0 %v1079_v63  ;;  %1198 = vmatpush1.msra.mxu1 %v1182_v0  ;;  %v5634_v63 = vld [vmem:[%s9944_s9 + $0x128] sm:$0xff]  ;;  %v1288_v0 = vld [vmem:[%s9944_s9 + $0x70] sm:$0xff] }
 0x21d   :  { %1103 = vmatprep.subr.mxu0 %v6824_v45  ;;  %1199 = vmatprep.subr.mxu1 %v6824_v45 }
 0x21e   :  { %1104 = vmatpush1.msra.mxu0 %v1078_v1  ;;  %1200 = vmatpush1.msra.mxu1 %v1181_v2  ;;  %v5633_v1 = vld [vmem:[%s9944_s9 + $0x120] sm:$0xff]  ;;  %v1287_v2 = vld [vmem:[%s9944_s9 + $0x68] sm:$0xff] }
 0x21f   :  { %1105 = vmatprep.subr.mxu0 %v6824_v45  ;;  %1201 = vmatprep.subr.mxu1 %v6824_v45 }
 0x220   :  { %1106 = vmatpush1.msra.mxu0 %v1077_v3  ;;  %1202 = vmatpush1.msra.mxu1 %v1180_v4  ;;  %v1286_v3 = vld [vmem:[%s9944_s9 + $0x60] sm:$0xff]  ;;  %v1285_v4 = vld [vmem:[%s9944_s9 + $0x58] sm:$0xff] }
 0x221   :  { %1107 = vmatprep.subr.mxu0 %v6824_v45  ;;  %1203 = vmatprep.subr.mxu1 %v6824_v45 }
 0x222   :  { %1108 = vmatpush1.msra.mxu0 %v1076_v5  ;;  %1204 = vmatpush1.msra.mxu1 %v1179_v6  ;;  %v1284_v5 = vld [vmem:[%s9944_s9 + $0x50] sm:$0xff]  ;;  %v5632_v6 = vld [vmem:[%s9944_s9 + $0x118] sm:$0xff] }
 0x223   :  { %1109 = vmatprep.subr.mxu0 %v6824_v45  ;;  %1205 = vmatprep.subr.mxu1 %v6824_v45 }
 0x224   :  { %1110 = vmatpush1.msra.mxu0 %v1075_v7  ;;  %1206 = vmatpush1.msra.mxu1 %v1178_v8  ;;  %v1283_v7 = vld [vmem:[%s9944_s9 + $0x48] sm:$0xff]  ;;  %v5631_v8 = vld [vmem:[%s9944_s9 + $0x110] sm:$0xff] }
 0x225   :  { %1111 = vmatprep.subr.mxu0 %v6824_v45  ;;  %1207 = vmatprep.subr.mxu1 %v6824_v45 }
 0x226   :  { %1112 = vmatpush1.msra.mxu0 %v1074_v9  ;;  %1208 = vmatpush1.msra.mxu1 %v1177_v10  ;;  %v1282_v9 = vld [vmem:[%s9944_s9 + $0x40] sm:$0xff]  ;;  %v5630_v10 = vld [vmem:[%s9944_s9 + $0x108] sm:$0xff] }
 0x227   :  { %1113 = vmatprep.subr.mxu0 %v6824_v45  ;;  %1209 = vmatprep.subr.mxu1 %v6824_v45 }
 0x228   :  { %1114 = vmatpush1.msra.mxu0 %v1073_v11  ;;  %1210 = vmatpush1.msra.mxu1 %v1176_v13  ;;  %v1281_v11 = vld [vmem:[%s9944_s9 + $0x38] sm:$0xff]  ;;  %v5629_v13 = vld [vmem:[%s9944_s9 + $0x100] sm:$0xff] }
 0x229   :  { %1115 = vmatprep.subr.mxu0 %v6824_v45  ;;  %1211 = vmatprep.subr.mxu1 %v6824_v45 }
 0x22a   :  { %1116 = vmatpush1.msra.mxu0 %v1072_v14  ;;  %1212 = vmatpush1.msra.mxu1 %v1175_v15  ;;  %v1280_v14 = vld [vmem:[%s9944_s9 + $0x30] sm:$0xff]  ;;  %v5628_v15 = vld [vmem:[%s9944_s9 + $0xf8] sm:$0xff] }
 0x22b   :  { %1117 = vmatprep.subr.mxu0 %v6824_v45  ;;  %1213 = vmatprep.subr.mxu1 %v6824_v45 }
 0x22c   :  { %1118 = vmatpush1.msra.mxu0 %v1071_v16  ;;  %1214 = vmatpush1.msra.mxu1 %v1174_v18  ;;  %v1279_v16 = vld [vmem:[%s9944_s9 + $0x28] sm:$0xff]  ;;  %v5627_v18 = vld [vmem:[%s9944_s9 + $0xf0] sm:$0xff] }
 0x22d   :  { %1119 = vmatprep.subr.mxu0 %v6824_v45  ;;  %1215 = vmatprep.subr.mxu1 %v6824_v45 }
 0x22e   :  { %1120 = vmatpush1.msra.mxu0 %v1070_v19  ;;  %1216 = vmatpush1.msra.mxu1 %v1173_v20  ;;  %v1278_v19 = vld [vmem:[%s9944_s9 + $0x20] sm:$0xff]  ;;  %v5626_v20 = vld [vmem:[%s9944_s9 + $0xe8] sm:$0xff] }
 0x22f   :  { %1121 = vmatprep.subr.mxu0 %v6824_v45  ;;  %1217 = vmatprep.subr.mxu1 %v6824_v45 }
 0x230   :  { %1122 = vmatpush1.msra.mxu0 %v1069_v21  ;;  %1218 = vmatpush1.msra.mxu1 %v1172_v22  ;;  %v1277_v21 = vld [vmem:[%s9944_s9 + $0x18] sm:$0xff]  ;;  %v5625_v22 = vld [vmem:[%s9944_s9 + $0xe0] sm:$0xff] }
 0x231   :  { %1123 = vmatprep.subr.mxu0 %v6824_v45  ;;  %1219 = vmatprep.subr.mxu1 %v6824_v45 }
 0x232   :  { %1124 = vmatpush1.msra.mxu0 %v1068_v23  ;;  %1220 = vmatpush1.msra.mxu1 %v1171_v24  ;;  %v1276_v23 = vld [vmem:[%s9944_s9 + $0x10] sm:$0xff]  ;;  %v5624_v24 = vld [vmem:[%s9944_s9 + $0xd8] sm:$0xff] }
 0x233   :  { %1125 = vmatprep.subr.mxu0 %v6824_v45  ;;  %1221 = vmatprep.subr.mxu1 %v6824_v45 }
 0x234   :  { %1126 = vmatpush1.msra.mxu0 %v1067_v25  ;;  %1222 = vmatpush1.msra.mxu1 %v1170_v26  ;;  %v1275_v25 = vld [vmem:[%s9944_s9 + $0x8] sm:$0xff]  ;;  %v5623_v26 = vld [vmem:[%s9944_s9 + $0xd0] sm:$0xff] }
 0x235   :  { %1149 = vmatprep.subr.mxu0 %v6824_v45  ;;  %1245 = vmatprep.subr.mxu1 %v6824_v45 }
 0x236   :  { %1150 = vmatpush2.msra.mxu0 %v1087_v27  ;;  %1246 = vmatpush2.msra.mxu1 %v1190_v28  ;;  %v1274_v27 = vld [vmem:[%s9944_s9] sm:$0xff]  ;;  %v5622_v28 = vld [vmem:[%s9944_s9 + $0xc8] sm:$0xff] }
 0x237   :  { %1151 = vmatprep.subr.mxu0 %v6824_v45  ;;  %1247 = vmatprep.subr.mxu1 %v6824_v45 }
 0x238   :  { %1152 = vmatpush2.msra.mxu0 %v1086_v29  ;;  %1248 = vmatpush2.msra.mxu1 %v1189_v30  ;;  %v5696_v29 = vld [vmem:[%s9944_s9 + $0x2b8] sm:$0xf]  ;;  %v5621_v30 = vld [vmem:[%s9944_s9 + $0xc0] sm:$0xff] }
 0x239   :  { %1153 = vmatprep.subr.mxu0 %v6824_v45  ;;  %1249 = vmatprep.subr.mxu1 %v6824_v45 }
 0x23a   :  { %1154 = vmatpush2.msra.mxu0 %v1085_v31  ;;  %1250 = vmatpush2.msra.mxu1 %v1188_v32  ;;  %v5620_v31 = vld [vmem:[%s9944_s9 + $0xb8] sm:$0xff]  ;;  %v5619_v32 = vld [vmem:[%s9944_s9 + $0xb0] sm:$0xff] }
 0x23b   :  { %1155 = vmatprep.subr.mxu0 %v6824_v45  ;;  %1251 = vmatprep.subr.mxu1 %v6824_v45 }
 0x23c   :  { %1156 = vmatpush2.msra.mxu0 %v1084_v33  ;;  %1252 = vmatpush2.msra.mxu1 %v1187_v34  ;;  %v5670_v33 = vld [vmem:[%s9944_s9 + $0x208] sm:$0xf] }
 0x23d   :  { %1157 = vmatprep.subr.mxu0 %v6824_v45  ;;  %1253 = vmatprep.subr.mxu1 %v6824_v45 }
 0x23e   :  { %1158 = vmatpush2.msra.mxu0 %v1083_v35  ;;  %1254 = vmatpush2.msra.mxu1 %v1186_v36 }
 0x23f   :  { %5645 = vmatprep.subr.msk.mxu1 %vm894_vm3, %v1295_v37  ;;  %5641 = vmatprep.subr.msk.mxu0 %vm894_vm3, %v5640_v38 }
 0x2d2   :  { %v967_v39 = vpop.f32.mrf.mxu0  ;;  %v1052_v40 = vpop.f32.mrf.mxu1 }
 0x2d3   :  { %v1063_v44 = vmax.f32 %v967_v39, %v1052_v40 }
 0x2d4   :  { %v969_v41 = vpop.f32.mrf.mxu0  ;;  %v1054_v42 = vpop.f32.mrf.mxu1 }
 0x2d5   :  { %v1064_v43 = vmax.f32 %v969_v41, %v1054_v42 }
 0x2d6   :  { %v973_v46 = vpop.f32.mrf.mxu0  ;;  %v1058_v47 = vpop.f32.mrf.mxu1 }
 0x2d7   :  { %5615 = vmatprep.mubr.msk.f32.mxu0 %vm1088_vm5, %v1064_v43  ;;  %5617 = vmatprep.mubr.msk.f32.mxu1 %vm1088_vm5, %v1064_v43  ;;  %v1065_v55 = vmax.f32 %v973_v46, %v1058_v47  ;;  %v5694_v47 = vld [vmem:[%s9944_s9 + $0x2a8] sm:$0xff] }
 0x2d8   :  { %v975_v52 = vpop.f32.mrf.mxu0  ;;  %v1060_v53 = vpop.f32.mrf.mxu1  ;;  %1160 = vmatmul.mubr.f32.vlgmr.msra.gmra.mxu0 %v1063_v44  ;;  %1256 = vmatmul.mubr.f32.vlgmr.msra.gmra.mxu1 %v1063_v44  ;;  %v5695_v44 = vld [vmem:[%s9944_s9 + $0x2b0] sm:$0xf] }
 0x2d9   :  { %v1066_v54 = vmax.f32 %v975_v52, %v1060_v53  ;;  %5646 = vmatpush1.msk.msra.mxu1 %vm894_vm3, %v1294_v48  ;;  %5642 = vmatpush1.msk.msra.mxu0 %vm894_vm3, %v5639_v49  ;;  %v5693_v48 = vld [vmem:[%s9944_s9 + $0x2a0] sm:$0xff]  ;;  %v5692_v49 = vld [vmem:[%s9944_s9 + $0x298] sm:$0xff] }
 0x2da   :  { %1434 = vmatprep.subr.mxu1 %v1293_v50  ;;  %1345 = vmatprep.subr.mxu0 %v5638_v51  ;;  %v5669_v50 = vld [vmem:[%s9944_s9 + $0x200] sm:$0xf]  ;;  %v5691_v51 = vld [vmem:[%s9944_s9 + $0x290] sm:$0xff] }
 0x2db   :  { %5616 = vmatprep.mubr.msk.f32.mxu0 %vm1088_vm5, %v1066_v54  ;;  %5618 = vmatprep.mubr.msk.f32.mxu1 %vm1088_vm5, %v1066_v54  ;;  %v5668_v54 = vld [vmem:[%s9944_s9 + $0x1f8] sm:$0xff] }
 0x2dc   :  { %1165 = vmatmul.mubr.f32.gmra.mxu0 %v1065_v55  ;;  %1261 = vmatmul.mubr.f32.gmra.mxu1 %v1065_v55  ;;  %v5690_v55 = vld [vmem:[%s9944_s9 + $0x288] sm:$0xff] }
 0x2dd   :  { %1435 = vmatpush1.msra.mxu1 %v1292_v56  ;;  %1346 = vmatpush1.msra.mxu0 %v5637_v57  ;;  %v5667_v56 = vld [vmem:[%s9944_s9 + $0x1f0] sm:$0xff]  ;;  %v5689_v57 = vld [vmem:[%s9944_s9 + $0x280] sm:$0xff] }
 0x2de   :  { %1436 = vmatprep.subr.mxu1 %v1291_v58  ;;  %1347 = vmatprep.subr.mxu0 %v5636_v59  ;;  %v5666_v58 = vld [vmem:[%s9944_s9 + $0x1e8] sm:$0xff]  ;;  %v5688_v59 = vld [vmem:[%s9944_s9 + $0x278] sm:$0xff] }
 0x2df   :  { %1437 = vmatpush1.msra.mxu1 %v1290_v60  ;;  %1348 = vmatpush1.msra.mxu0 %v5635_v61  ;;  %v5687_v60 = vld [vmem:[%s9944_s9 + $0x270] sm:$0xff]  ;;  %v5665_v61 = vld [vmem:[%s9944_s9 + $0x1e0] sm:$0xff] }
 0x2e0   :  { %1438 = vmatprep.subr.mxu1 %v1289_v62  ;;  %1349 = vmatprep.subr.mxu0 %v5634_v63  ;;  %v5686_v62 = vld [vmem:[%s9944_s9 + $0x268] sm:$0xff] }
 0x2e1   :  { %1439 = vmatpush1.msra.mxu1 %v1288_v0  ;;  %1350 = vmatpush1.msra.mxu0 %v5633_v1  ;;  %v5664_v0 = vld [vmem:[%s9944_s9 + $0x1d8] sm:$0xff]  ;;  %v5685_v1 = vld [vmem:[%s9944_s9 + $0x260] sm:$0xff] }
 0x2e2   :  { %1440 = vmatprep.subr.mxu1 %v1287_v2  ;;  %1486 = vmatprep.mubr.f32.mxu1 %v6824_v45  ;;  %v5663_v2 = vld [vmem:[%s9944_s9 + $0x1d0] sm:$0xff] }
 0x2e3   :  { %1441 = vmatpush1.msra.mxu1 %v1286_v3  ;;  %1397 = vmatprep.mubr.f32.mxu0 %v6824_v45  ;;  %v5684_v3 = vld [vmem:[%s9944_s9 + $0x258] sm:$0xff] }
 0x2e4   :  { %1442 = vmatprep.subr.mxu1 %v1285_v4  ;;  %1351 = vmatprep.subr.mxu0 %v5632_v6  ;;  %v5662_v4 = vld [vmem:[%s9944_s9 + $0x1c8] sm:$0xff]  ;;  %v5661_v6 = vld [vmem:[%s9944_s9 + $0x1c0] sm:$0xff] }
 0x2e5   :  { %1443 = vmatpush1.msra.mxu1 %v1284_v5  ;;  %1352 = vmatpush1.msra.mxu0 %v5631_v8  ;;  %v5683_v5 = vld [vmem:[%s9944_s9 + $0x250] sm:$0xff]  ;;  %v5660_v8 = vld [vmem:[%s9944_s9 + $0x1b8] sm:$0xff] }
 0x2e6   :  { %1444 = vmatprep.subr.mxu1 %v1283_v7  ;;  %1353 = vmatprep.subr.mxu0 %v5630_v10  ;;  %v5682_v7 = vld [vmem:[%s9944_s9 + $0x248] sm:$0xff]  ;;  %v5659_v10 = vld [vmem:[%s9944_s9 + $0x1b0] sm:$0xff] }
 0x2e7   :  { %1445 = vmatpush1.msra.mxu1 %v1282_v9  ;;  %1354 = vmatpush1.msra.mxu0 %v5629_v13  ;;  %v5681_v9 = vld [vmem:[%s9944_s9 + $0x240] sm:$0xff]  ;;  %v5658_v13 = vld [vmem:[%s9944_s9 + $0x1a8] sm:$0xff] }
 0x2e8   :  { %1446 = vmatprep.subr.mxu1 %v1281_v11  ;;  %1355 = vmatprep.subr.mxu0 %v5628_v15  ;;  %v5680_v11 = vld [vmem:[%s9944_s9 + $0x238] sm:$0xff]  ;;  %v5657_v15 = vld [vmem:[%s9944_s9 + $0x1a0] sm:$0xff] }
 0x2e9   :  { %1447 = vmatpush1.msra.mxu1 %v1280_v14  ;;  %1356 = vmatpush1.msra.mxu0 %v5627_v18  ;;  %v5679_v14 = vld [vmem:[%s9944_s9 + $0x230] sm:$0xff]  ;;  %v5656_v18 = vld [vmem:[%s9944_s9 + $0x198] sm:$0xff] }
 0x2ea   :  { %1448 = vmatprep.subr.mxu1 %v1279_v16  ;;  %1357 = vmatprep.subr.mxu0 %v5626_v20  ;;  %v5678_v16 = vld [vmem:[%s9944_s9 + $0x228] sm:$0xff]  ;;  %v5655_v20 = vld [vmem:[%s9944_s9 + $0x190] sm:$0xff] }
 0x2eb   :  { %1449 = vmatpush1.msra.mxu1 %v1278_v19  ;;  %1358 = vmatpush1.msra.mxu0 %v5625_v22  ;;  %v5677_v19 = vld [vmem:[%s9944_s9 + $0x220] sm:$0xff]  ;;  %v5654_v22 = vld [vmem:[%s9944_s9 + $0x188] sm:$0xff] }
 0x2ec   :  { %1450 = vmatprep.subr.mxu1 %v1277_v21  ;;  %1359 = vmatprep.subr.mxu0 %v5624_v24  ;;  %v5676_v21 = vld [vmem:[%s9944_s9 + $0x218] sm:$0xff]  ;;  %v5653_v24 = vld [vmem:[%s9944_s9 + $0x180] sm:$0xff] }
 0x2ed   :  { %1451 = vmatpush1.msra.mxu1 %v1276_v23  ;;  %1360 = vmatpush1.msra.mxu0 %v5623_v26  ;;  %v5675_v23 = vld [vmem:[%s9944_s9 + $0x210] sm:$0xff] }
 0x2ee   :  { %1452 = vmatprep.subr.mxu1 %v1275_v25  ;;  %1361 = vmatprep.subr.mxu0 %v5622_v28  ;;  %v5652_v25 = vld [vmem:[%s9944_s9 + $0x178] sm:$0xff]  ;;  %v5651_v26 = vld [vmem:[%s9944_s9 + $0x170] sm:$0xff]  ;;  %v5650_v28 = vld [vmem:[%s9944_s9 + $0x168] sm:$0xff] }
 0x2ef   :  { %1453 = vmatpush1.msra.mxu1 %v1274_v27  ;;  %1362 = vmatpush1.msra.mxu0 %v5621_v30  ;;  %v5722_v30 = vld [vmem:[%s9944_s9 + $0x368] sm:$0xf] }
 0x2f0   :  { %5697 = vmatprep.subr.msk.mxu1 %vm894_vm3, %v5696_v29  ;;  %1363 = vmatprep.subr.mxu0 %v5620_v31  ;;  %v5649_v29 = vld [vmem:[%s9944_s9 + $0x160] sm:$0xff] }
 0x2f1   :  { %1364 = vmatpush1.msra.mxu0 %v5619_v32 }
 0x2f2   :  { %5671 = vmatprep.subr.msk.mxu0 %vm894_vm3, %v5670_v33  ;;  %v5721_v33 = vld [vmem:[%s9944_s9 + $0x360] sm:$0xf] }
 0x398   :  { %v1161_v34 = vpop.f32.mrf.mxu0  ;;  %v1257_v35 = vpop.f32.mrf.mxu1 }
 0x399   :  { %v1266_v36 = vmax.f32 %v1161_v34, %v1257_v35  ;;  %v5720_v34 = vld [vmem:[%s9944_s9 + $0x358] sm:$0xff]  ;;  %v5719_v35 = vld [vmem:[%s9944_s9 + $0x350] sm:$0xff] }
 0x39a   :  { %v1163_v37 = vpop.f32.mrf.mxu0  ;;  %v1259_v38 = vpop.f32.mrf.mxu1 }
 0x39b   :  { %1269 = vst.msk [vmem:[#allocation3] sm:$0xff] %vm1268_vm6, %v1266_v36  ;;  %v5718_v36 = vld [vmem:[%s9944_s9 + $0x348] sm:$0xff]  ;;  %v5717_v37 = vld [vmem:[%s9944_s9 + $0x340] sm:$0xff] }
 0x39c   :  { %v1166_v39 = vpop.f32.mrf.mxu0  ;;  %v1262_v40 = vpop.f32.mrf.mxu1 }
 0x39d   :  { %v1267_v41 = vmax.f32 %v1166_v39, %v1262_v40  ;;  %v5716_v39 = vld [vmem:[%s9944_s9 + $0x338] sm:$0xff]  ;;  %v5715_v40 = vld [vmem:[%s9944_s9 + $0x330] sm:$0xff] }
 0x39e   :  { %v1168_v42 = vpop.f32.mrf.mxu0  ;;  %v1264_v43 = vpop.f32.mrf.mxu1 }
 0x39f   :  { %1271 = vst.msk [vmem:[#allocation3 + $0x8] sm:$0x3f] %vm1270_vm7, %v1267_v41  ;;  %v5714_v41 = vld [vmem:[%s9944_s9 + $0x328] sm:$0xff]  ;;  %v5713_v42 = vld [vmem:[%s9944_s9 + $0x320] sm:$0xff]  ;;  %v5712_v43 = vld [vmem:[%s9944_s9 + $0x318] sm:$0xff] }
 0x3a2   :  { %v1272_v46 = vld [vmem:[#allocation3] sm:$0xff] }
 0x3a3   :  { %5647 = vmatmul.mubr.msk.f32.vlgmr.msra.gmra.mxu1 %vm1268_vm6, %v1272_v46  ;;  %v5710_v46 = vld [vmem:[%s9944_s9 + $0x308] sm:$0xff] }
 0x3a4   :  { %5698 = vmatpush1.msk.msra.mxu1 %vm894_vm3, %v5695_v44  ;;  %1492 = vmatprep.mubr.f32.mxu1 %v6824_v45  ;;  %v5711_v44 = vld [vmem:[%s9944_s9 + $0x310] sm:$0xff] }
 0x3a5   :  { %1666 = vmatprep.subr.mxu1 %v5694_v47  ;;  %v5709_v47 = vld [vmem:[%s9944_s9 + $0x300] sm:$0xff] }
 0x3a6   :  { %1667 = vmatpush1.msra.mxu1 %v5693_v48  ;;  %v1296_v52 = vld [vmem:[#allocation3 + $0x1] sm:$0xff]  ;;  %v1297_v63 = vld [vmem:[#allocation3 + $0x9] sm:$0x3]  ;;  %v1618_v32 = vld [vmem:[#allocation3 + $0xb] sm:$0x3] }
 0x3a7   :  { %v1273_v53 = vld [vmem:[#allocation3 + $0x8] sm:$0x3]  ;;  %1668 = vmatprep.subr.mxu1 %v5692_v49  ;;  %5643 = vmatmul.mubr.msk.f32.vlgmr.msra.gmra.mxu0 %vm1268_vm6, %v1296_v52  ;;  %v1500_v38 = vld [vmem:[#allocation3 + $0xa] sm:$0x3]  ;;  %v5708_v48 = vld [vmem:[%s9944_s9 + $0x2f8] sm:$0xff] }
 0x3a8   :  { %5648 = vmatmul.mubr.msk.f32.gmra.mxu1 %vm1268_vm6, %v1273_v53  ;;  %5672 = vmatpush1.msk.msra.mxu0 %vm894_vm3, %v5669_v50  ;;  %v1617_v27 = vld [vmem:[#allocation3 + $0x3] sm:$0xff]  ;;  %v5707_v49 = vld [vmem:[%s9944_s9 + $0x2f0] sm:$0xff]  ;;  %v5704_v52 = vld [vmem:[%s9944_s9 + $0x2d8] sm:$0xff] }
 0x3a9   :  { %1669 = vmatpush1.msra.mxu1 %v5691_v51  ;;  %1548 = vmatprep.subr.mxu0 %v5668_v54  ;;  %v1499_v31 = vld [vmem:[#allocation3 + $0x2] sm:$0xff]  ;;  %v5703_v53 = vld [vmem:[%s9944_s9 + $0x2d0] sm:$0xff] }
 0x3aa   :  { %1670 = vmatprep.subr.mxu1 %v5690_v55  ;;  %1549 = vmatpush1.msra.mxu0 %v5667_v56  ;;  %v5706_v50 = vld [vmem:[%s9944_s9 + $0x2e8] sm:$0xff]  ;;  %v5705_v51 = vld [vmem:[%s9944_s9 + $0x2e0] sm:$0xff] }
 0x3ab   :  { %1671 = vmatpush1.msra.mxu1 %v5689_v57  ;;  %1403 = vmatprep.mubr.f32.mxu0 %v6824_v45  ;;  %v5702_v54 = vld [vmem:[%s9944_s9 + $0x2c8] sm:$0xff]  ;;  %v5701_v55 = vld [vmem:[%s9944_s9 + $0x2c0] sm:$0xff] }
 0x3ac   :  { %1550 = vmatprep.subr.mxu0 %v5666_v58  ;;  %1672 = vmatprep.subr.mxu1 %v5688_v59  ;;  %v1735_v56 = vld [vmem:[#allocation3 + $0x4] sm:$0xff]  ;;  %v1736_v57 = vld [vmem:[#allocation3 + $0xc] sm:$0x3]  ;;  %v2142_v58 = vld [vmem:[%s9949_s14 + $0x78] sm:$0xff] }
 0x3ad   :  { %5644 = vmatmul.mubr.msk.f32.gmra.mxu0 %vm1268_vm6, %v1297_v63  ;;  %1673 = vmatpush1.msra.mxu1 %v5687_v60  ;;  %v2141_v59 = vld [vmem:[%s9949_s14 + $0x70] sm:$0xff]  ;;  %v2140_v60 = vld [vmem:[%s9949_s14 + $0x68] sm:$0xff] }
 0x3ae   :  { %1551 = vmatpush1.msra.mxu0 %v5665_v61  ;;  %1674 = vmatprep.subr.mxu1 %v5686_v62  ;;  %v2139_v61 = vld [vmem:[%s9949_s14 + $0x60] sm:$0xff]  ;;  %v2138_v62 = vld [vmem:[%s9949_s14 + $0x58] sm:$0xff]  ;;  %v2137_v63 = vld [vmem:[%s9949_s14 + $0x50] sm:$0xff] }
 0x3af   :  { %1552 = vmatprep.subr.mxu0 %v5664_v0  ;;  %1675 = vmatpush1.msra.mxu1 %v5685_v1  ;;  %v2136_v0 = vld [vmem:[%s9949_s14 + $0x48] sm:$0xff]  ;;  %v2135_v1 = vld [vmem:[%s9949_s14 + $0x40] sm:$0xff] }
 0x3b0   :  { %1553 = vmatpush1.msra.mxu0 %v5663_v2  ;;  %1676 = vmatprep.subr.mxu1 %v5684_v3  ;;  %v2134_v2 = vld [vmem:[%s9949_s14 + $0x38] sm:$0xff]  ;;  %v2133_v3 = vld [vmem:[%s9949_s14 + $0x30] sm:$0xff] }
 0x3b1   :  { %1554 = vmatprep.subr.mxu0 %v5662_v4  ;;  %1677 = vmatpush1.msra.mxu1 %v5683_v5  ;;  %v2132_v4 = vld [vmem:[%s9949_s14 + $0x28] sm:$0xff]  ;;  %v2131_v5 = vld [vmem:[%s9949_s14 + $0x20] sm:$0xff] }
 0x3b2   :  { %1555 = vmatpush1.msra.mxu0 %v5661_v6  ;;  %1678 = vmatprep.subr.mxu1 %v5682_v7  ;;  %v2130_v6 = vld [vmem:[%s9949_s14 + $0x18] sm:$0xff]  ;;  %v2129_v7 = vld [vmem:[%s9949_s14 + $0x10] sm:$0xff] }
 0x3b3   :  { %1556 = vmatprep.subr.mxu0 %v5660_v8  ;;  %1679 = vmatpush1.msra.mxu1 %v5681_v9  ;;  %v2128_v8 = vld [vmem:[%s9949_s14 + $0x8] sm:$0xff] }
 0x3b4   :  { %1557 = vmatpush1.msra.mxu0 %v5659_v10  ;;  %1680 = vmatprep.subr.mxu1 %v5680_v11 }
 0x3b5   :  { %1558 = vmatprep.subr.mxu0 %v5658_v13  ;;  %1681 = vmatpush1.msra.mxu1 %v5679_v14 }
 0x3b6   :  { %1559 = vmatpush1.msra.mxu0 %v5657_v15  ;;  %1682 = vmatprep.subr.mxu1 %v5678_v16 }
 0x3b7   :  { %1560 = vmatprep.subr.mxu0 %v5656_v18  ;;  %1683 = vmatpush1.msra.mxu1 %v5677_v19 }
 0x3b8   :  { %1561 = vmatpush1.msra.mxu0 %v5655_v20  ;;  %1684 = vmatprep.subr.mxu1 %v5676_v21 }
 0x3b9   :  { %1562 = vmatprep.subr.mxu0 %v5654_v22  ;;  %1685 = vmatpush1.msra.mxu1 %v5675_v23 }
 0x3ba   :  { %1563 = vmatpush1.msra.mxu0 %v5653_v24  ;;  %1718 = vmatprep.mubr.f32.mxu1 %v6824_v45 }
 0x3bb   :  { %1564 = vmatprep.subr.mxu0 %v5652_v25  ;;  %5699 = vmatmul.mubr.msk.f32.vlgmr.msra.gmra.mxu1 %vm1268_vm6, %v1617_v27 }
 0x3bc   :  { %1565 = vmatpush1.msra.mxu0 %v5651_v26  ;;  %1600 = vmatprep.mubr.f32.mxu0 %v6824_v45 }
 0x3bd   :  { %1566 = vmatprep.subr.mxu0 %v5650_v28  ;;  %1724 = vmatprep.mubr.f32.mxu1 %v6824_v45 }
 0x3be   :  { %1567 = vmatpush1.msra.mxu0 %v5649_v29 }
 0x3bf   :  { %5673 = vmatmul.mubr.msk.f32.vlgmr.msra.gmra.mxu0 %vm1268_vm6, %v1499_v31  ;;  %5700 = vmatmul.mubr.msk.f32.gmra.mxu1 %vm1268_vm6, %v1618_v32 }
 0x3c0   :  { %5723 = vmatprep.subr.msk.mxu0 %vm894_vm3, %v5722_v30  ;;  %1606 = vmatprep.mubr.f32.mxu0 %v6824_v45 }
 0x3c1   :  { %5724 = vmatpush1.msk.msra.mxu0 %vm894_vm3, %v5721_v33  ;;  %1949 = vmatprep.mubr.f32.mxu1 %v6824_v45 }
 0x3c2   :  { %1784 = vmatprep.subr.mxu0 %v5720_v34 }
 0x3c3   :  { %1785 = vmatpush1.msra.mxu0 %v5719_v35 }
 0x3c4   :  { %5674 = vmatmul.mubr.msk.f32.gmra.mxu0 %vm1268_vm6, %v1500_v38  ;;  %1786 = vmatprep.subr.mxu0 %v5718_v36  ;;  %v1853_v36 = vld [vmem:[%s9945_s10] sm:$0x3] }
 0x3c5   :  { %1787 = vmatpush1.msra.mxu0 %v5717_v37  ;;  %1836 = vmatprep.mubr.f32.mxu0 %v6824_v45 }
 0x3c6   :  { %1788 = vmatprep.subr.mxu0 %v5716_v39 }
 0x3c7   :  { %1789 = vmatpush1.msra.mxu0 %v5715_v40 }
 0x3c8   :  { %1790 = vmatprep.subr.mxu0 %v5714_v41 }
 0x3c9   :  { %1791 = vmatpush1.msra.mxu0 %v5713_v42 }
 0x3ca   :  { %1792 = vmatprep.subr.mxu0 %v5712_v43  ;;  %v1862_v43 = vrot.slane %v1853_v36, %v7411_v17 }
 0x3cb   :  { %1793 = vmatpush1.msra.mxu0 %v5711_v44 }
 0x3cc   :  { %1794 = vmatprep.subr.mxu0 %v5710_v46 }
 0x3cd   :  { %1795 = vmatpush1.msra.mxu0 %v5709_v47 }
 0x3ce   :  { %1796 = vmatprep.subr.mxu0 %v5708_v48  ;;  %v1858_v48 = vrot.slane %v1853_v36, %v7406_v12  ;;  %v5741_v36 = vld [vmem:[%s9950_s15 + $0x80] sm:$0xff] }
 0x3cf   :  { %1797 = vmatpush1.msra.mxu0 %v5707_v49 }
 0x3d0   :  { %1798 = vmatprep.subr.mxu0 %v5706_v50 }
 0x3d1   :  { %1799 = vmatpush1.msra.mxu0 %v5705_v51 }
 0x3d2   :  { %1800 = vmatprep.subr.mxu0 %v5704_v52 }
 0x3d3   :  { %1801 = vmatpush1.msra.mxu0 %v5703_v53 }
 0x3d4   :  { %1802 = vmatprep.subr.mxu0 %v5702_v54 }
 0x3d5   :  { %1803 = vmatpush1.msra.mxu0 %v5701_v55 }
 0x3d6   :  { %5725 = vmatmul.mubr.msk.f32.vlgmr.msra.gmra.mxu0 %vm1268_vm6, %v1735_v56  ;;  %2147 = vmatprep.subr.mxu0 %v6824_v45 }
 0x3d7   :  { %1842 = vmatprep.mubr.f32.mxu0 %v6824_v45  ;;  %2148 = vmatpush1.msra.mxu0 %v2142_v58 }
 0x3d8   :  { %2149 = vmatprep.subr.mxu0 %v6824_v45 }
 0x3d9   :  { %2150 = vmatpush1.msra.mxu0 %v2141_v59  ;;  %v1873_v59 = vld [vmem:[%s9946_s11] sm:$0x1f] }
 0x3da   :  { %5726 = vmatmul.mubr.msk.f32.gmra.mxu0 %vm1268_vm6, %v1736_v57  ;;  %2151 = vmatprep.subr.mxu0 %v6824_v45 }
 0x3db   :  { %2152 = vmatpush1.msra.mxu0 %v2140_v60  ;;  %v1956_v60 = vld [vmem:[%s9947_s12] sm:$0x1f] }
 0x3dc   :  { %2153 = vmatprep.subr.mxu0 %v6824_v45 }
 0x3dd   :  { %2154 = vmatpush1.msra.mxu0 %v2139_v61  ;;  %v2048_v61 = vld [vmem:[%s9948_s13 + $0x78] sm:$0xff] }
 0x3de   :  { %2155 = vmatprep.subr.mxu0 %v6824_v45 }
 0x3df   :  { %2156 = vmatpush1.msra.mxu0 %v2138_v62  ;;  %v2047_v62 = vld [vmem:[%s9948_s13 + $0x70] sm:$0xff] }
 0x3e0   :  { %2157 = vmatprep.subr.mxu0 %v6824_v45 }
 0x3e1   :  { %2158 = vmatpush1.msra.mxu0 %v2137_v63  ;;  %v2046_v63 = vld [vmem:[%s9948_s13 + $0x68] sm:$0xff] }
 0x3e2   :  { %2159 = vmatprep.subr.mxu0 %v6824_v45 }
 0x3e3   :  { %2160 = vmatpush1.msra.mxu0 %v2136_v0  ;;  %v2045_v0 = vld [vmem:[%s9948_s13 + $0x60] sm:$0xff] }
 0x3e4   :  { %2161 = vmatprep.subr.mxu0 %v6824_v45 }
 0x3e5   :  { %2162 = vmatpush1.msra.mxu0 %v2135_v1  ;;  %v2044_v1 = vld [vmem:[%s9948_s13 + $0x58] sm:$0xff] }
 0x3e6   :  { %2163 = vmatprep.subr.mxu0 %v6824_v45 }
 0x3e7   :  { %2164 = vmatpush1.msra.mxu0 %v2134_v2  ;;  %v2043_v2 = vld [vmem:[%s9948_s13 + $0x50] sm:$0xff] }
 0x3e8   :  { %2165 = vmatprep.subr.mxu0 %v6824_v45 }
 0x3e9   :  { %2166 = vmatpush1.msra.mxu0 %v2133_v3  ;;  %v2042_v3 = vld [vmem:[%s9948_s13 + $0x48] sm:$0xff] }
 0x3ea   :  { %2167 = vmatprep.subr.mxu0 %v6824_v45 }
 0x3eb   :  { %2168 = vmatpush1.msra.mxu0 %v2132_v4  ;;  %v2041_v4 = vld [vmem:[%s9948_s13 + $0x40] sm:$0xff] }
 0x3ec   :  { %2169 = vmatprep.subr.mxu0 %v6824_v45 }
 0x3ed   :  { %2170 = vmatpush1.msra.mxu0 %v2131_v5  ;;  %v2040_v5 = vld [vmem:[%s9948_s13 + $0x38] sm:$0xff] }
 0x3ee   :  { %2171 = vmatprep.subr.mxu0 %v6824_v45 }
 0x3ef   :  { %2172 = vmatpush1.msra.mxu0 %v2130_v6  ;;  %v2039_v6 = vld [vmem:[%s9948_s13 + $0x30] sm:$0xff] }
 0x3f0   :  { %2173 = vmatprep.subr.mxu0 %v6824_v45 }
 0x3f1   :  { %2174 = vmatpush1.msra.mxu0 %v2129_v7  ;;  %v2038_v7 = vld [vmem:[%s9948_s13 + $0x28] sm:$0xff] }
 0x3f2   :  { %2175 = vmatprep.subr.mxu0 %v6824_v45 }
 0x3f3   :  { %2176 = vmatpush1.msra.mxu0 %v2128_v8  ;;  %v2037_v8 = vld [vmem:[%s9948_s13 + $0x20] sm:$0xff] }
 0x3f4   :  { %2177 = vmatprep.subr.mxu0 %v6824_v45 }
 0x463   :  { %v1488_v11 = vpop.f32.mrf.mxu1 }
 0x465   :  { %v1490_v14 = vpop.f32.mrf.mxu1 }
 0x467   :  { %v1399_v9 = vpop.f32.mrf.mxu0 }
 0x468   :  { %v1494_v16 = vpop.f32.mrf.mxu1  ;;  %v1489_v26 = vadd.f32 %v1488_v11, %v1399_v9  ;;  %v2036_v9 = vld [vmem:[%s9948_s13 + $0x18] sm:$0xff]  ;;  %v2034_v11 = vld [vmem:[%s9948_s13 + $0x8] sm:$0xff] }
 0x469   :  { %v1401_v10 = vpop.f32.mrf.mxu0 }
 0x46a   :  { %v1496_v19 = vpop.f32.mrf.mxu1  ;;  %v1491_v24 = vadd.f32 %v1490_v14, %v1401_v10  ;;  %v2035_v10 = vld [vmem:[%s9948_s13 + $0x10] sm:$0xff]  ;;  %v2127_v14 = vld [vmem:[%s9949_s14] sm:$0xff] }
 0x46b   :  { %2178 = vmatpush1.msra.mxu0 %v2127_v14  ;;  %v5758_v14 = vld [vmem:[%s9950_s15 + $0xf0] sm:$0xff] }
 0x46c   :  { %2203 = vmatprep.subr.mxu0 %v6824_v45 }
 0x46d   :  { %v1405_v13 = vpop.f32.mrf.mxu0 }
 0x46e   :  { %v1495_v25 = vadd.f32 %v1494_v16, %v1405_v13  ;;  %v2033_v13 = vld [vmem:[%s9948_s13] sm:$0xff]  ;;  %v2146_v16 = vld [vmem:[%s9949_s14 + $0x98] sm:$0xff] }
 0x46f   :  { %v1407_v15 = vpop.f32.mrf.mxu0  ;;  %2204 = vmatpush2.msra.mxu0 %v2146_v16 }
 0x470   :  { %v1497_v28 = vadd.f32 %v1496_v19, %v1407_v15  ;;  %v2052_v15 = vld [vmem:[%s9948_s13 + $0x98] sm:$0xff]  ;;  %2205 = vmatprep.subr.mxu0 %v6824_v45  ;;  %v2145_v19 = vld [vmem:[%s9949_s14 + $0x90] sm:$0xff] }
 0x471   :  { %2206 = vmatpush2.msra.mxu0 %v2145_v19  ;;  %v5778_v19 = vld [vmem:[%s9950_s15 + $0x188] sm:$0xff] }
 0x472   :  { %2207 = vmatprep.subr.mxu0 %v6824_v45 }
 0x47b   :  { %v1720_v21 = vpop.f32.mrf.mxu1 }
 0x47d   :  { %v1722_v23 = vpop.f32.mrf.mxu1 }
 0x47f   :  { %v1602_v18 = vpop.f32.mrf.mxu0  ;;  %v1726_v32 = vpop.f32.mrf.mxu1 }
 0x480   :  { %v1613_v31 = vadd.f32 %v1602_v18, %v1489_v26  ;;  %v2051_v18 = vld [vmem:[%s9948_s13 + $0x90] sm:$0xff] }
 0x481   :  { %v1604_v20 = vpop.f32.mrf.mxu0  ;;  %v1728_v39 = vpop.f32.mrf.mxu1 }
 0x482   :  { %v1614_v29 = vadd.f32 %v1604_v20, %v1491_v24  ;;  %v1731_v40 = vadd.f32 %v1720_v21, %v1613_v31  ;;  %v2050_v20 = vld [vmem:[%s9948_s13 + $0x88] sm:$0xff] }
 0x483   :  { %v2144_v21 = vld [vmem:[%s9949_s14 + $0x88] sm:$0xff] }
 0x484   :  { %v1608_v22 = vpop.f32.mrf.mxu0  ;;  %v1732_v37 = vadd.f32 %v1722_v23, %v1614_v29  ;;  %2208 = vmatpush2.msra.mxu0 %v2144_v21  ;;  %v2143_v23 = vld [vmem:[%s9949_s14 + $0x80] sm:$0xff]  ;;  %v2230_v31 = vld [vmem:[%s9950_s15 + $0x48] sm:$0xff] }
 0x485   :  { %v1615_v30 = vadd.f32 %v1608_v22, %v1495_v25  ;;  %v2049_v22 = vld [vmem:[%s9948_s13 + $0x80] sm:$0xff]  ;;  %2209 = vmatprep.subr.mxu0 %v6824_v45 }
 0x486   :  { %v1610_v27 = vpop.f32.mrf.mxu0  ;;  %2210 = vmatpush2.msra.mxu0 %v2143_v23  ;;  %v5777_v21 = vld [vmem:[%s9950_s15 + $0x180] sm:$0xff]  ;;  %v5776_v23 = vld [vmem:[%s9950_s15 + $0x178] sm:$0xff] }
 0x487   :  { %v1616_v34 = vadd.f32 %v1610_v27, %v1497_v28  ;;  %v1733_v38 = vadd.f32 %v1726_v32, %v1615_v30  ;;  %6433 = vmatprep.subr.mxu0 %v6824_v45  ;;  %v5744_v30 = vld [vmem:[%s9950_s15 + $0x98] sm:$0xff]  ;;  %v5743_v32 = vld [vmem:[%s9950_s15 + $0x90] sm:$0xff] }
 0x489   :  { %v1734_v46 = vadd.f32 %v1728_v39, %v1616_v34  ;;  %v5742_v34 = vld [vmem:[%s9950_s15 + $0x88] sm:$0xff] }
 0x48a   :  { %v2226_v39 = vld [vmem:[%s9950_s15 + $0x28] sm:$0xff] }
 0x496   :  { %v1838_v33 = vpop.f32.mrf.mxu0 }
 0x497   :  { %v1849_v47 = vadd.f32 %v1838_v33, %v1731_v40  ;;  %v2229_v33 = vld [vmem:[%s9950_s15 + $0x40] sm:$0xff]  ;;  %v5739_v40 = vld [vmem:[%s9950_s15 + $0x70] sm:$0xff] }
 0x498   :  { %v1840_v35 = vpop.f32.mrf.mxu0 }
 0x499   :  { %v1850_v42 = vadd.f32 %v1840_v35, %v1732_v37  ;;  %v1865_v54 = vadd.f32 %v1858_v48, %v1849_v47  ;;  %v2228_v35 = vld [vmem:[%s9950_s15 + $0x38] sm:$0xff]  ;;  %v2227_v37 = vld [vmem:[%s9950_s15 + $0x30] sm:$0xff] }
 0x49a   :  { %v1844_v41 = vpop.f32.mrf.mxu0  ;;  %v5736_v47 = vld [vmem:[%s9950_s15 + $0x58] sm:$0xff] }
 0x49b   :  { %v1851_v44 = vadd.f32 %v1844_v41, %v1733_v38  ;;  %v1866_v52 = vadd.f32 %v1862_v43, %v1850_v42  ;;  %v1869_v58 = vmax.f32 %v1865_v54, 0.0  ;;  %v5740_v38 = vld [vmem:[%s9950_s15 + $0x78] sm:$0xff]  ;;  %v2225_v41 = vld [vmem:[%s9950_s15 + $0x20] sm:$0xff]  ;;  %v5738_v42 = vld [vmem:[%s9950_s15 + $0x68] sm:$0xff] }
 0x49c   :  { %v1846_v49 = vpop.f32.mrf.mxu0 }
 0x49d   :  { %v1852_v50 = vadd.f32 %v1846_v49, %v1734_v46  ;;  %v1867_v51 = vadd.f32 %v1858_v48, %v1851_v44  ;;  %v1870_v57 = vmax.f32 %v1866_v52, 0.0  ;;  %v5737_v44 = vld [vmem:[%s9950_s15 + $0x60] sm:$0xff]  ;;  %v2223_v46 = vld [vmem:[%s9950_s15 + $0x10] sm:$0xff]  ;;  %v2222_v48 = vld [vmem:[%s9950_s15 + $0x8] sm:$0xff] }
 0x49e   :  { %v5735_v49 = vld [vmem:[%s9950_s15 + $0x50] sm:$0xff] }
 0x49f   :  { %v1868_v53 = vadd.f32 %v1862_v43, %v1852_v50  ;;  %v1871_v56 = vmax.f32 %v1867_v51, 0.0  ;;  %v2224_v43 = vld [vmem:[%s9950_s15 + $0x18] sm:$0xff]  ;;  %v2221_v50 = vld [vmem:[%s9950_s15] sm:$0xff] }
 0x4a1   :  { %v1872_v55 = vmax.f32 %v1868_v53, 0.0 }
 0x4a3   :  { %5727 = vmatprep.subr.msk.mxu1 %vm1878_vm8, %v1872_v55 }
 0x4a4   :  { %5728 = vmatpush1.msk.msra.mxu1 %vm1878_vm8, %v1871_v56 }
 0x4a5   :  { %1915 = vmatprep.subr.mxu1 %v1870_v57 }
 0x4a6   :  { %1916 = vmatpush1.msra.mxu1 %v1869_v58 }
 0x4a7   :  { %5729 = vmatmul.mubr.msk.f32.vlgmr.msra.gmra.mxu1 %vm1874_vm9, %v1873_v59  ;;  %5730 = vmatprep.subr.msk.mxu1 %vm1878_vm8, %v1872_v55 }
 0x4a8   :  { %5731 = vmatpush1.msk.msra.mxu1 %vm1878_vm8, %v1871_v56  ;;  %2024 = vmatprep.mubr.f32.mxu1 %v6824_v45  ;;  %v5756_v56 = vld [vmem:[%s9950_s15 + $0xe8] sm:$0xff] }
 0x4a9   :  { %1990 = vmatprep.subr.mxu1 %v1870_v57  ;;  %v5767_v57 = vld [vmem:[%s9950_s15 + $0x138] sm:$0xff] }
 0x4aa   :  { %1991 = vmatpush1.msra.mxu1 %v1869_v58 }
 0x4ab   :  { %5732 = vmatmul.mubr.msk.f32.vlgmr.msra.gmra.mxu1 %vm1874_vm9, %v1956_v60  ;;  %2057 = vmatprep.subr.mxu1 %v6824_v45  ;;  %v5755_v60 = vld [vmem:[%s9950_s15 + $0xe0] sm:$0xff] }
 0x4ac   :  { %2058 = vmatpush1.msra.mxu1 %v2048_v61  ;;  %v5766_v61 = vld [vmem:[%s9950_s15 + $0x130] sm:$0xff] }
 0x4ad   :  { %2059 = vmatprep.subr.mxu1 %v6824_v45 }
 0x4ae   :  { %2060 = vmatpush1.msra.mxu1 %v2047_v62  ;;  %v5754_v62 = vld [vmem:[%s9950_s15 + $0xd8] sm:$0xff] }
 0x4af   :  { %2061 = vmatprep.subr.mxu1 %v6824_v45 }
 0x4b0   :  { %2062 = vmatpush1.msra.mxu1 %v2046_v63  ;;  %v5765_v63 = vld [vmem:[%s9950_s15 + $0x128] sm:$0xff] }
 0x4b1   :  { %2063 = vmatprep.subr.mxu1 %v6824_v45 }
 0x4b2   :  { %2064 = vmatpush1.msra.mxu1 %v2045_v0  ;;  %v5753_v0 = vld [vmem:[%s9950_s15 + $0xd0] sm:$0xff] }
 0x4b3   :  { %2065 = vmatprep.subr.mxu1 %v6824_v45 }
 0x4b4   :  { %2066 = vmatpush1.msra.mxu1 %v2044_v1  ;;  %v5764_v1 = vld [vmem:[%s9950_s15 + $0x120] sm:$0xff] }
 0x4b5   :  { %2067 = vmatprep.subr.mxu1 %v6824_v45 }
 0x4b6   :  { %2068 = vmatpush1.msra.mxu1 %v2043_v2  ;;  %v5752_v2 = vld [vmem:[%s9950_s15 + $0xc8] sm:$0xff] }
 0x4b7   :  { %2069 = vmatprep.subr.mxu1 %v6824_v45 }
 0x4b8   :  { %2070 = vmatpush1.msra.mxu1 %v2042_v3  ;;  %v5763_v3 = vld [vmem:[%s9950_s15 + $0x118] sm:$0xff] }
 0x4b9   :  { %2071 = vmatprep.subr.mxu1 %v6824_v45 }
 0x4ba   :  { %2072 = vmatpush1.msra.mxu1 %v2041_v4  ;;  %v5751_v4 = vld [vmem:[%s9950_s15 + $0xc0] sm:$0xff] }
 0x4bb   :  { %2073 = vmatprep.subr.mxu1 %v6824_v45 }
 0x4bc   :  { %2074 = vmatpush1.msra.mxu1 %v2040_v5  ;;  %v5762_v5 = vld [vmem:[%s9950_s15 + $0x110] sm:$0xff] }
 0x4bd   :  { %2075 = vmatprep.subr.mxu1 %v6824_v45 }
 0x4be   :  { %2076 = vmatpush1.msra.mxu1 %v2039_v6  ;;  %v5750_v6 = vld [vmem:[%s9950_s15 + $0xb8] sm:$0xff] }
 0x4bf   :  { %2077 = vmatprep.subr.mxu1 %v6824_v45 }
 0x4c0   :  { %2078 = vmatpush1.msra.mxu1 %v2038_v7  ;;  %v5761_v7 = vld [vmem:[%s9950_s15 + $0x108] sm:$0xff] }
 0x4c1   :  { %2079 = vmatprep.subr.mxu1 %v6824_v45 }
 0x4c2   :  { %2080 = vmatpush1.msra.mxu1 %v2037_v8  ;;  %v5749_v8 = vld [vmem:[%s9950_s15 + $0xb0] sm:$0xff] }
 0x4c3   :  { %2081 = vmatprep.subr.mxu1 %v6824_v45 }
 0x4c4   :  { %2082 = vmatpush1.msra.mxu1 %v2036_v9  ;;  %v5760_v9 = vld [vmem:[%s9950_s15 + $0x100] sm:$0xff] }
 0x4c5   :  { %2083 = vmatprep.subr.mxu1 %v6824_v45 }
 0x4c6   :  { %2084 = vmatpush1.msra.mxu1 %v2035_v10  ;;  %v5748_v10 = vld [vmem:[%s9950_s15 + $0xa8] sm:$0xff] }
 0x4c7   :  { %2085 = vmatprep.subr.mxu1 %v6824_v45 }
 0x4c8   :  { %2086 = vmatpush1.msra.mxu1 %v2034_v11  ;;  %v5759_v11 = vld [vmem:[%s9950_s15 + $0xf8] sm:$0xff] }
 0x4c9   :  { %2087 = vmatprep.subr.mxu1 %v6824_v45 }
 0x4ca   :  { %2088 = vmatpush1.msra.mxu1 %v2033_v13  ;;  %v5747_v13 = vld [vmem:[%s9950_s15 + $0xa0] sm:$0xff] }
 0x4cb   :  { %2113 = vmatprep.subr.mxu1 %v6824_v45 }
 0x4cc   :  { %2114 = vmatpush2.msra.mxu1 %v2052_v15  ;;  %v5799_v15 = vld [vmem:[%s9978_s24 + $0xb8] sm:$0xff] }
 0x4cd   :  { %2115 = vmatprep.subr.mxu1 %v6824_v45 }
 0x4ce   :  { %2116 = vmatpush2.msra.mxu1 %v2051_v18 }
 0x4cf   :  { %2117 = vmatprep.subr.mxu1 %v6824_v45 }
 0x4d0   :  { %2118 = vmatpush2.msra.mxu1 %v2050_v20  ;;  %v5798_v20 = vld [vmem:[%s9978_s24 + $0xb0] sm:$0xff] }
 0x4d1   :  { %2119 = vmatprep.subr.mxu1 %v6824_v45 }
 0x4d2   :  { %2120 = vmatpush2.msra.mxu1 %v2049_v22  ;;  %v5797_v22 = vld [vmem:[%s9978_s24 + $0xa8] sm:$0xff] }
 0x4d3   :  { %6410 = vmatprep.subr.mxu1 %v6824_v45 }
 0x567   :  { %v1951_v24 = vpop.f32.mrf.mxu1 }
 0x569   :  { %v1953_v25 = vpop.f32.mrf.mxu1 }
 0x56b   :  { %v2026_v26 = vpop.f32.mrf.mxu1 }
 0x56c   :  { %v2031_v29 = vmax.f32 %v1951_v24, %v2026_v26  ;;  %v5796_v24 = vld [vmem:[%s9978_s24 + $0xa0] sm:$0xff]  ;;  %v5795_v26 = vld [vmem:[%s9978_s24 + $0x98] sm:$0xff] }
 0x56d   :  { %v2028_v27 = vpop.f32.mrf.mxu1 }
 0x56e   :  { %v2032_v28 = vmax.f32 %v1953_v25, %v2028_v27  ;;  %v5775_v25 = vld [vmem:[%s9950_s15 + $0x170] sm:$0xff]  ;;  %v5774_v27 = vld [vmem:[%s9950_s15 + $0x168] sm:$0xff] }
 0x570   :  { %5733 = vmatprep.mubr.msk.f32.mxu1 %vm2053_vm10, %v2032_v28  ;;  %5734 = vmatprep.mubr.msk.f32.mxu0 %vm2053_vm10, %v2032_v28  ;;  %v5794_v28 = vld [vmem:[%s9978_s24 + $0x90] sm:$0xff] }
 0x571   :  { %2122 = vmatmul.mubr.f32.vlgmr.msra.gmra.mxu1 %v2031_v29  ;;  %2212 = vmatmul.mubr.f32.vlgmr.msra.gmra.mxu0 %v2031_v29  ;;  %v5773_v29 = vld [vmem:[%s9950_s15 + $0x160] sm:$0xff] }
 0x572   :  { %6411 = vmatpush3.msra.mxu1 %v5744_v30  ;;  %6434 = vmatpush3.msra.mxu0 %v2230_v31  ;;  %v5793_v30 = vld [vmem:[%s9978_s24 + $0x88] sm:$0xff]  ;;  %v5772_v31 = vld [vmem:[%s9950_s15 + $0x158] sm:$0xff] }
 0x573   :  { %6412 = vmatprep.subr.mxu1 %v6824_v45  ;;  %6435 = vmatprep.subr.mxu0 %v6824_v45 }
 0x574   :  { %6413 = vmatpush3.msra.mxu1 %v5743_v32  ;;  %6436 = vmatpush3.msra.mxu0 %v2229_v33  ;;  %v5792_v32 = vld [vmem:[%s9978_s24 + $0x80] sm:$0xff]  ;;  %v5771_v33 = vld [vmem:[%s9950_s15 + $0x150] sm:$0xff] }
 0x575   :  { %6414 = vmatprep.subr.mxu1 %v6824_v45  ;;  %6437 = vmatprep.subr.mxu0 %v6824_v45 }
 0x576   :  { %6415 = vmatpush3.msra.mxu1 %v5742_v34  ;;  %6438 = vmatpush3.msra.mxu0 %v2228_v35  ;;  %v5791_v34 = vld [vmem:[%s9978_s24 + $0x78] sm:$0xff]  ;;  %v5770_v35 = vld [vmem:[%s9950_s15 + $0x148] sm:$0xff] }
 0x577   :  { %6416 = vmatprep.subr.mxu1 %v6824_v45  ;;  %6439 = vmatprep.subr.mxu0 %v6824_v45 }
 0x578   :  { %6417 = vmatpush3.msra.mxu1 %v5741_v36  ;;  %6440 = vmatpush3.msra.mxu0 %v2227_v37  ;;  %v5790_v36 = vld [vmem:[%s9978_s24 + $0x70] sm:$0xff]  ;;  %v5769_v37 = vld [vmem:[%s9950_s15 + $0x140] sm:$0xff] }
 0x579   :  { %6418 = vmatprep.subr.mxu1 %v6824_v45  ;;  %6441 = vmatprep.subr.mxu0 %v6824_v45 }
 0x57a   :  { %6419 = vmatpush3.msra.mxu1 %v5740_v38  ;;  %6442 = vmatpush3.msra.mxu0 %v2226_v39  ;;  %v5789_v38 = vld [vmem:[%s9978_s24 + $0x68] sm:$0xff]  ;;  %v2669_v39 = vld [vmem:[%s9978_s24 + $0x58] sm:$0xff] }
 0x57b   :  { %6420 = vmatprep.subr.mxu1 %v6824_v45  ;;  %6443 = vmatprep.subr.mxu0 %v6824_v45 }
 0x57c   :  { %6421 = vmatpush3.msra.mxu1 %v5739_v40  ;;  %6444 = vmatpush3.msra.mxu0 %v2225_v41  ;;  %v5788_v41 = vld [vmem:[%s9978_s24 + $0x60] sm:$0xff] }
 0x57d   :  { %6422 = vmatprep.subr.mxu1 %v6824_v45  ;;  %6445 = vmatprep.subr.mxu0 %v6824_v45 }
 0x57e   :  { %6423 = vmatpush3.msra.mxu1 %v5738_v42  ;;  %6446 = vmatpush3.msra.mxu0 %v2224_v43  ;;  %v2668_v42 = vld [vmem:[%s9978_s24 + $0x50] sm:$0xff]  ;;  %v5784_v43 = vld [vmem:[%s9979_s27 + $0x21] sm:$0xff] }
 0x57f   :  { %6424 = vmatprep.subr.mxu1 %v6824_v45  ;;  %6447 = vmatprep.subr.mxu0 %v6824_v45 }
 0x580   :  { %6425 = vmatpush3.msra.mxu1 %v5737_v44  ;;  %6448 = vmatpush3.msra.mxu0 %v2223_v46  ;;  %v5785_v44 = vld [vmem:[%s9979_s27 + $0x29] sm:$0xff] }
 0x581   :  { %6426 = vmatprep.subr.mxu1 %v6824_v45  ;;  %6449 = vmatprep.subr.mxu0 %v6824_v45  ;;  %v2667_v46 = vld [vmem:[%s9978_s24 + $0x48] sm:$0xff] }
 0x582   :  { %6427 = vmatpush3.msra.mxu1 %v5736_v47  ;;  %6450 = vmatpush3.msra.mxu0 %v2222_v48  ;;  %v5823_v47 = vld [vmem:[%s9978_s24 + $0x118] sm:$0xff]  ;;  %v2666_v48 = vld [vmem:[%s9978_s24 + $0x40] sm:$0xff] }
 0x583   :  { %6428 = vmatprep.subr.mxu1 %v6824_v45  ;;  %6451 = vmatprep.subr.mxu0 %v6824_v45 }
 0x584   :  { %6429 = vmatpush3.msra.mxu1 %v5735_v49  ;;  %6452 = vmatpush3.msra.mxu0 %v2221_v50  ;;  %v5822_v49 = vld [vmem:[%s9978_s24 + $0x110] sm:$0xff]  ;;  %v2665_v50 = vld [vmem:[%s9978_s24 + $0x38] sm:$0xff] }
 0x585   :  { %6430 = vmatprep.mubr.msk.f32.mxu1 %vm6825_vm11, %v6824_v45  ;;  %6453 = vmatprep.mubr.msk.f32.mxu0 %vm6825_vm11, %v6824_v45 }
 0x586   :  { %6456 = vmatprep.subr.mxu1 %v6824_v45  ;;  %6479 = vmatprep.subr.mxu0 %v6824_v45 }
 0x631   :  { %v2123_v51 = vpop.f32.mrf.mxu1  ;;  %v2213_v52 = vpop.f32.mrf.mxu0 }
 0x632   :  { %v2217_v53 = vmax.f32 %v2123_v51, %v2213_v52  ;;  %v5821_v51 = vld [vmem:[%s9978_s24 + $0x108] sm:$0xff]  ;;  %v2664_v52 = vld [vmem:[%s9978_s24 + $0x30] sm:$0xff] }
 0x633   :  { %v2125_v54 = vpop.f32.mrf.mxu1  ;;  %v2215_v55 = vpop.f32.mrf.mxu0 }
 0x634   :  { %2219 = vst.msk [vmem:[#allocation4] sm:$0x1f] %vm2218_vm12, %v2217_v53  ;;  %v5820_v53 = vld [vmem:[%s9978_s24 + $0x100] sm:$0xff]  ;;  %v2663_v54 = vld [vmem:[%s9978_s24 + $0x28] sm:$0xff]  ;;  %v5819_v55 = vld [vmem:[%s9978_s24 + $0xf8] sm:$0xff] }
 0x63b   :  { %v2231_v58 = vld [vmem:[#allocation4 + $0x1] sm:$0x1]  ;;  %v2220_v59 = vld [vmem:[#allocation4] sm:$0x1]  ;;  %v2390_v16 = vld [vmem:[#allocation4 + $0x2] sm:$0x1] }
 0x63c   :  { %6431 = vmatmul.mubr.msk.f32.vlgmr.msra.gmra.mxu1 %vm2243_vm13, %v2231_v58  ;;  %6454 = vmatmul.mubr.msk.f32.vlgmr.msra.gmra.mxu0 %vm2243_vm13, %v2220_v59  ;;  %v2476_v18 = vld [vmem:[#allocation4 + $0x3] sm:$0x1]  ;;  %v2562_v40 = vld [vmem:[#allocation4 + $0x4] sm:$0x1]  ;;  %v2661_v58 = vld [vmem:[%s9978_s24 + $0x18] sm:$0xff] }
 0x63d   :  { %6457 = vmatpush3.msra.mxu1 %v5756_v56  ;;  %6480 = vmatpush3.msra.mxu0 %v5767_v57  ;;  %v2662_v56 = vld [vmem:[%s9978_s24 + $0x20] sm:$0xff]  ;;  %v5818_v57 = vld [vmem:[%s9978_s24 + $0xf0] sm:$0xff]  ;;  %v5817_v59 = vld [vmem:[%s9978_s24 + $0xe8] sm:$0xff] }
 0x63e   :  { %6458 = vmatprep.subr.mxu1 %v6824_v45  ;;  %6481 = vmatprep.subr.mxu0 %v6824_v45 }
 0x63f   :  { %6459 = vmatpush3.msra.mxu1 %v5755_v60  ;;  %6482 = vmatpush3.msra.mxu0 %v5766_v61  ;;  %v2660_v60 = vld [vmem:[%s9978_s24 + $0x10] sm:$0xff]  ;;  %v5816_v61 = vld [vmem:[%s9978_s24 + $0xe0] sm:$0xff] }
 0x640   :  { %6460 = vmatprep.subr.mxu1 %v6824_v45  ;;  %6483 = vmatprep.subr.mxu0 %v6824_v45 }
 0x641   :  { %6461 = vmatpush3.msra.mxu1 %v5754_v62  ;;  %6484 = vmatpush3.msra.mxu0 %v5765_v63  ;;  %v2659_v62 = vld [vmem:[%s9978_s24 + $0x8] sm:$0xff]  ;;  %v5815_v63 = vld [vmem:[%s9978_s24 + $0xd8] sm:$0xff] }
 0x642   :  { %6462 = vmatprep.subr.mxu1 %v6824_v45  ;;  %6485 = vmatprep.subr.mxu0 %v6824_v45 }
 0x643   :  { %6463 = vmatpush3.msra.mxu1 %v5753_v0  ;;  %6486 = vmatpush3.msra.mxu0 %v5764_v1  ;;  %v5786_v0 = vld [vmem:[%s9979_s27 + $0x31] sm:$0xff]  ;;  %v2658_v1 = vld [vmem:[%s9978_s24] sm:$0xff] }
 0x644   :  { %6464 = vmatprep.subr.mxu1 %v6824_v45  ;;  %6487 = vmatprep.subr.mxu0 %v6824_v45 }
 0x645   :  { %6465 = vmatpush3.msra.mxu1 %v5752_v2  ;;  %6488 = vmatpush3.msra.mxu0 %v5763_v3  ;;  %v5787_v2 = vld [vmem:[%s9979_s27 + $0x39] sm:$0x3f]  ;;  %v5814_v3 = vld [vmem:[%s9978_s24 + $0xd0] sm:$0xff] }
 0x646   :  { %6466 = vmatprep.subr.mxu1 %v6824_v45  ;;  %6489 = vmatprep.subr.mxu0 %v6824_v45 }
 0x647   :  { %6467 = vmatpush3.msra.mxu1 %v5751_v4  ;;  %6490 = vmatpush3.msra.mxu0 %v5762_v5  ;;  %v5780_v4 = vld [vmem:[%s9979_s27 + $0x20] sm:$0xff]  ;;  %v5781_v5 = vld [vmem:[%s9979_s27 + $0x28] sm:$0xff] }
 0x648   :  { %6468 = vmatprep.subr.mxu1 %v6824_v45  ;;  %6491 = vmatprep.subr.mxu0 %v6824_v45 }
 0x649   :  { %6469 = vmatpush3.msra.mxu1 %v5750_v6  ;;  %6492 = vmatpush3.msra.mxu0 %v5761_v7  ;;  %v5813_v6 = vld [vmem:[%s9978_s24 + $0xc8] sm:$0xff]  ;;  %v5782_v7 = vld [vmem:[%s9979_s27 + $0x30] sm:$0xff] }
 0x64a   :  { %6470 = vmatprep.subr.mxu1 %v6824_v45  ;;  %6493 = vmatprep.subr.mxu0 %v6824_v45 }
 0x64b   :  { %6471 = vmatpush3.msra.mxu1 %v5749_v8  ;;  %6494 = vmatpush3.msra.mxu0 %v5760_v9  ;;  %v5808_v8 = vld [vmem:[%s9979_s27 + $0x22] sm:$0xff] }
 0x64c   :  { %6472 = vmatprep.subr.mxu1 %v6824_v45  ;;  %6495 = vmatprep.subr.mxu0 %v6824_v45  ;;  %v5812_v9 = vld [vmem:[%s9978_s24 + $0xc0] sm:$0xff] }
 0x64d   :  { %6473 = vmatpush3.msra.mxu1 %v5748_v10  ;;  %6496 = vmatpush3.msra.mxu0 %v5759_v11  ;;  %v5783_v10 = vld [vmem:[%s9979_s27 + $0x38] sm:$0x3f]  ;;  %v5809_v11 = vld [vmem:[%s9979_s27 + $0x2a] sm:$0xff] }
 0x64e   :  { %6474 = vmatprep.subr.mxu1 %v6824_v45  ;;  %6497 = vmatprep.subr.mxu0 %v6824_v45 }
 0x64f   :  { %6475 = vmatpush3.msra.mxu1 %v5747_v13  ;;  %6476 = vmatprep.mubr.msk.f32.mxu1 %vm6825_vm11, %v6824_v45  ;;  %v5810_v13 = vld [vmem:[%s9979_s27 + $0x32] sm:$0xff] }
 0x650   :  { %6498 = vmatpush3.msra.mxu0 %v5758_v14  ;;  %6499 = vmatprep.mubr.msk.f32.mxu0 %vm6825_vm11, %v6824_v45  ;;  %v5811_v14 = vld [vmem:[%s9979_s27 + $0x3a] sm:$0x3f]  ;;  %s5490_s27 = sshll.u32 %s6826_s29, 4  ;;  %s5491_s27 = int_to_ptr.vmem [resolvable:$true] %s5490_s27 }
 0x651   :  { %6477 = vmatmul.mubr.msk.f32.vlgmr.msra.gmra.mxu1 %vm2243_vm13, %v2390_v16  ;;  %6500 = vmatmul.mubr.msk.f32.vlgmr.msra.gmra.mxu0 %vm2243_vm13, %v2476_v18  ;;  %v5857_v16 = vld [vmem:[%s9980_s1 + $0x1d0] sm:$0xff]  ;;  %v3049_v18 = vld [vmem:[%s9980_s1 + $0xe8] sm:$0xff]  ;;  %p6807_p1 = scmp.lt.s32.totalorder %s5491_s27, %s5491_s27 }
 0x652   :  { %6502 = vmatprep.subr.mxu1 %v6824_v45  ;;  %6525 = vmatprep.subr.mxu0 %v5799_v15 }
 0x653   :  { %6503 = vmatpush3.msra.mxu1 %v5778_v19  ;;  %6526 = vmatpush3.msra.mxu0 %v5799_v15  ;;  %v5858_v15 = vld [vmem:[%s9980_s1 + $0x1d8] sm:$0xff]  ;;  %v5856_v19 = vld [vmem:[%s9980_s1 + $0x1c8] sm:$0xff] }
 0x654   :  { %6504 = vmatprep.subr.mxu1 %v6824_v45  ;;  %6527 = vmatprep.subr.mxu0 %v5798_v20 }
 0x655   :  { %6505 = vmatpush3.msra.mxu1 %v5777_v21  ;;  %6528 = vmatpush3.msra.mxu0 %v5798_v20  ;;  %v3048_v20 = vld [vmem:[%s9980_s1 + $0xe0] sm:$0xff] }
 0x656   :  { %6506 = vmatprep.subr.mxu1 %v6824_v45  ;;  %6529 = vmatprep.subr.mxu0 %v5797_v22  ;;  %v5855_v21 = vld [vmem:[%s9980_s1 + $0x1c0] sm:$0xff] }
 0x657   :  { %6507 = vmatpush3.msra.mxu1 %v5776_v23  ;;  %6530 = vmatpush3.msra.mxu0 %v5797_v22  ;;  %v3047_v22 = vld [vmem:[%s9980_s1 + $0xd8] sm:$0xff] }
 0x658   :  { %6508 = vmatprep.subr.mxu1 %v6824_v45  ;;  %6531 = vmatprep.subr.mxu0 %v5796_v24  ;;  %v5854_v23 = vld [vmem:[%s9980_s1 + $0x1b8] sm:$0xff] }
 0x659   :  { %6509 = vmatpush3.msra.mxu1 %v5775_v25  ;;  %6532 = vmatpush3.msra.mxu0 %v5796_v24  ;;  %v3046_v24 = vld [vmem:[%s9980_s1 + $0xd0] sm:$0xff] }
 0x65a   :  { %6510 = vmatprep.subr.mxu1 %v6824_v45  ;;  %6533 = vmatprep.subr.mxu0 %v5795_v26  ;;  %v5853_v25 = vld [vmem:[%s9980_s1 + $0x1b0] sm:$0xff] }
 0x65b   :  { %6511 = vmatpush3.msra.mxu1 %v5774_v27  ;;  %6534 = vmatpush3.msra.mxu0 %v5795_v26  ;;  %v3045_v26 = vld [vmem:[%s9980_s1 + $0xc8] sm:$0xff] }
 0x65c   :  { %6512 = vmatprep.subr.mxu1 %v6824_v45  ;;  %6535 = vmatprep.subr.mxu0 %v5794_v28  ;;  %v5852_v27 = vld [vmem:[%s9980_s1 + $0x1a8] sm:$0xff] }
 0x65d   :  { %6513 = vmatpush3.msra.mxu1 %v5773_v29  ;;  %6536 = vmatpush3.msra.mxu0 %v5794_v28  ;;  %v3044_v28 = vld [vmem:[%s9980_s1 + $0xc0] sm:$0xff]  ;;  %v3043_v29 = vld [vmem:[%s9980_s1 + $0xb8] sm:$0xff] }
 0x65e   :  { %6514 = vmatprep.subr.mxu1 %v6824_v45  ;;  %6537 = vmatprep.subr.mxu0 %v5793_v30 }
 0x65f   :  { %6515 = vmatpush3.msra.mxu1 %v5772_v31  ;;  %6538 = vmatpush3.msra.mxu0 %v5793_v30  ;;  %v5851_v30 = vld [vmem:[%s9980_s1 + $0x1a0] sm:$0xff]  ;;  %v5850_v31 = vld [vmem:[%s9980_s1 + $0x198] sm:$0xff] }
 0x660   :  { %6516 = vmatprep.subr.mxu1 %v6824_v45  ;;  %6539 = vmatprep.subr.mxu0 %v5792_v32 }
 0x661   :  { %6517 = vmatpush3.msra.mxu1 %v5771_v33  ;;  %6540 = vmatpush3.msra.mxu0 %v5792_v32  ;;  %v3042_v32 = vld [vmem:[%s9980_s1 + $0xb0] sm:$0xff] }
 0x662   :  { %6518 = vmatprep.subr.mxu1 %v6824_v45  ;;  %6541 = vmatprep.subr.mxu0 %v5791_v34  ;;  %v5849_v33 = vld [vmem:[%s9980_s1 + $0x190] sm:$0xff] }
 0x663   :  { %6519 = vmatpush3.msra.mxu1 %v5770_v35  ;;  %6542 = vmatpush3.msra.mxu0 %v5791_v34  ;;  %v3041_v34 = vld [vmem:[%s9980_s1 + $0xa8] sm:$0xff] }
 0x664   :  { %6520 = vmatprep.subr.mxu1 %v6824_v45  ;;  %6543 = vmatprep.subr.mxu0 %v5790_v36  ;;  %v5848_v35 = vld [vmem:[%s9980_s1 + $0x188] sm:$0xff] }
 0x665   :  { %6521 = vmatpush3.msra.mxu1 %v5769_v37  ;;  %6522 = vmatprep.mubr.msk.f32.mxu1 %vm6825_vm11, %v6824_v45  ;;  %v5847_v37 = vld [vmem:[%s9980_s1 + $0x180] sm:$0xff] }
 0x666   :  { %6544 = vmatpush3.msra.mxu0 %v5790_v36  ;;  %6523 = vmatmul.mubr.msk.f32.vlgmr.msra.gmra.mxu1 %vm2243_vm13, %v2562_v40  ;;  %v3040_v36 = vld [vmem:[%s9980_s1 + $0xa0] sm:$0xff]  ;;  %v3038_v40 = vld [vmem:[%s9980_s1 + $0x90] sm:$0xff] }
 0x667   :  { %6545 = vmatprep.subr.mxu0 %v5789_v38  ;;  %6555 = vmatprep.subr.mxu1 %v2669_v39 }
 0x668   :  { %6546 = vmatpush3.msra.mxu0 %v5789_v38  ;;  %6556 = vmatpush3.msra.mxu1 %v2669_v39  ;;  %v3039_v38 = vld [vmem:[%s9980_s1 + $0x98] sm:$0xff] }
 0x669   :  { %6547 = vmatprep.subr.mxu0 %v5788_v41  ;;  %6557 = vmatprep.subr.mxu1 %v2668_v42  ;;  %v5846_v39 = vld [vmem:[%s9980_s1 + $0x178] sm:$0xff] }
 0x66a   :  { %6548 = vmatpush3.msra.mxu0 %v5788_v41  ;;  %6549 = vmatprep.mubr.msk.f32.mxu0 %vm108_vm0, %v5784_v43  ;;  %v5845_v41 = vld [vmem:[%s9980_s1 + $0x170] sm:$0xff]  ;;  %v5844_v43 = vld [vmem:[%s9980_s1 + $0x168] sm:$0xff] }
 0x66b   :  { %6558 = vmatpush3.msra.mxu1 %v2668_v42  ;;  %6550 = vmatmul.mubr.msk.f32.vlgmr.msra.gmra.mxu0 %vm108_vm0, %v5785_v44  ;;  %v3037_v42 = vld [vmem:[%s9980_s1 + $0x88] sm:$0xff]  ;;  %v3036_v44 = vld [vmem:[%s9980_s1 + $0x80] sm:$0xff] }
 0x66c   :  { %6559 = vmatprep.subr.mxu1 %v2667_v46  ;;  %6585 = vmatprep.subr.mxu0 %v5823_v47 }
 0x66d   :  { %6560 = vmatpush3.msra.mxu1 %v2667_v46  ;;  %6586 = vmatpush3.msra.mxu0 %v5823_v47  ;;  %v5843_v46 = vld [vmem:[%s9980_s1 + $0x160] sm:$0xff]  ;;  %v3035_v47 = vld [vmem:[%s9980_s1 + $0x78] sm:$0xff] }
 0x66e   :  { %6561 = vmatprep.subr.mxu1 %v2666_v48  ;;  %6587 = vmatprep.subr.mxu0 %v5822_v49 }
 0x66f   :  { %6562 = vmatpush3.msra.mxu1 %v2666_v48  ;;  %6588 = vmatpush3.msra.mxu0 %v5822_v49  ;;  %v5842_v48 = vld [vmem:[%s9980_s1 + $0x158] sm:$0xff]  ;;  %v3034_v49 = vld [vmem:[%s9980_s1 + $0x70] sm:$0xff] }
 0x670   :  { %6563 = vmatprep.subr.mxu1 %v2665_v50  ;;  %6589 = vmatprep.subr.mxu0 %v5821_v51 }
 0x671   :  { %6564 = vmatpush3.msra.mxu1 %v2665_v50  ;;  %6590 = vmatpush3.msra.mxu0 %v5821_v51  ;;  %v5841_v50 = vld [vmem:[%s9980_s1 + $0x150] sm:$0xff]  ;;  %v3033_v51 = vld [vmem:[%s9980_s1 + $0x68] sm:$0xff] }
 0x672   :  { %6565 = vmatprep.subr.mxu1 %v2664_v52  ;;  %6591 = vmatprep.subr.mxu0 %v5820_v53 }
 0x673   :  { %6566 = vmatpush3.msra.mxu1 %v2664_v52  ;;  %6592 = vmatpush3.msra.mxu0 %v5820_v53  ;;  %v5840_v52 = vld [vmem:[%s9980_s1 + $0x148] sm:$0xff]  ;;  %v3032_v53 = vld [vmem:[%s9980_s1 + $0x60] sm:$0xff] }
 0x674   :  { %6567 = vmatprep.subr.mxu1 %v2663_v54  ;;  %6593 = vmatprep.subr.mxu0 %v5819_v55 }
 0x675   :  { %6568 = vmatpush3.msra.mxu1 %v2663_v54  ;;  %6594 = vmatpush3.msra.mxu0 %v5819_v55  ;;  %v5839_v54 = vld [vmem:[%s9980_s1 + $0x140] sm:$0xff]  ;;  %v3031_v55 = vld [vmem:[%s9980_s1 + $0x58] sm:$0xff] }
 0x676   :  { %6569 = vmatprep.subr.mxu1 %v2662_v56  ;;  %6595 = vmatprep.subr.mxu0 %v5818_v57 }
 0x677   :  { %6570 = vmatpush3.msra.mxu1 %v2662_v56  ;;  %6596 = vmatpush3.msra.mxu0 %v5818_v57  ;;  %v5838_v56 = vld [vmem:[%s9980_s1 + $0x138] sm:$0xff]  ;;  %v3030_v57 = vld [vmem:[%s9980_s1 + $0x50] sm:$0xff] }
 0x678   :  { %6571 = vmatprep.subr.mxu1 %v2661_v58  ;;  %6597 = vmatprep.subr.mxu0 %v5817_v59 }
 0x679   :  { %6572 = vmatpush3.msra.mxu1 %v2661_v58  ;;  %6598 = vmatpush3.msra.mxu0 %v5817_v59  ;;  %v5837_v58 = vld [vmem:[%s9980_s1 + $0x130] sm:$0xff]  ;;  %v3029_v59 = vld [vmem:[%s9980_s1 + $0x48] sm:$0xff] }
 0x67a   :  { %6573 = vmatprep.subr.mxu1 %v2660_v60  ;;  %6599 = vmatprep.subr.mxu0 %v5816_v61 }
 0x67b   :  { %6574 = vmatpush3.msra.mxu1 %v2660_v60  ;;  %6600 = vmatpush3.msra.mxu0 %v5816_v61  ;;  %v5836_v60 = vld [vmem:[%s9980_s1 + $0x128] sm:$0xff]  ;;  %v3028_v61 = vld [vmem:[%s9980_s1 + $0x40] sm:$0xff] }
 0x67c   :  { %6575 = vmatprep.subr.mxu1 %v2659_v62  ;;  %6601 = vmatprep.subr.mxu0 %v5815_v63 }
 0x67d   :  { %6552 = vmatprep.mubr.msk.f32.mxu0 %vm108_vm0, %v5786_v0  ;;  %6576 = vmatpush3.msra.mxu1 %v2659_v62  ;;  %v5835_v62 = vld [vmem:[%s9980_s1 + $0x120] sm:$0xff]  ;;  %v5834_v0 = vld [vmem:[%s9980_s1 + $0x118] sm:$0xff] }
 0x67e   :  { %6602 = vmatpush3.msra.mxu0 %v5815_v63  ;;  %6577 = vmatprep.subr.mxu1 %v2658_v1  ;;  %v3027_v63 = vld [vmem:[%s9980_s1 + $0x38] sm:$0xff] }
 0x67f   :  { %6553 = vmatmul.mubr.msk.f32.gmra.mxu0 %vm108_vm0, %v5787_v2  ;;  %6603 = vmatprep.subr.mxu0 %v5814_v3  ;;  %v5833_v2 = vld [vmem:[%s9980_s1 + $0x110] sm:$0xff] }
 0x680   :  { %6578 = vmatpush3.msra.mxu1 %v2658_v1  ;;  %6579 = vmatprep.mubr.msk.f32.mxu1 %vm108_vm0, %v5780_v4  ;;  %v3026_v1 = vld [vmem:[%s9980_s1 + $0x30] sm:$0xff]  ;;  %v5832_v4 = vld [vmem:[%s9980_s1 + $0x108] sm:$0xff] }
 0x681   :  { %6604 = vmatpush3.msra.mxu0 %v5814_v3  ;;  %6580 = vmatmul.mubr.msk.f32.vlgmr.msra.gmra.mxu1 %vm108_vm0, %v5781_v5  ;;  %v3025_v3 = vld [vmem:[%s9980_s1 + $0x28] sm:$0xff]  ;;  %v3024_v5 = vld [vmem:[%s9980_s1 + $0x20] sm:$0xff] }
 0x682   :  { %6605 = vmatprep.subr.mxu0 %v5813_v6  ;;  %6582 = vmatprep.mubr.msk.f32.mxu1 %vm108_vm0, %v5782_v7  ;;  %v3023_v7 = vld [vmem:[%s9980_s1 + $0x18] sm:$0xff] }
 0x683   :  { %6606 = vmatpush3.msra.mxu0 %v5813_v6  ;;  %6609 = vmatprep.mubr.msk.f32.mxu0 %vm108_vm0, %v5808_v8  ;;  %v5831_v6 = vld [vmem:[%s9980_s1 + $0x100] sm:$0xff]  ;;  %v5830_v8 = vld [vmem:[%s9980_s1 + $0xf8] sm:$0xff] }
 0x684   :  { %6607 = vmatprep.subr.mxu0 %v5812_v9  ;;  %3098 = vmatprep.subr.mxu1 %v5858_v15 }
 0x685   :  { %6608 = vmatpush3.msra.mxu0 %v5812_v9  ;;  %6583 = vmatmul.mubr.msk.f32.gmra.mxu1 %vm108_vm0, %v5783_v10  ;;  %v3022_v9 = vld [vmem:[%s9980_s1 + $0x10] sm:$0xff] }
 0x686   :  { %6610 = vmatmul.mubr.msk.f32.vlgmr.msra.gmra.mxu0 %vm108_vm0, %v5809_v11  ;;  %3160 = vmatprep.mubr.f32.mxu1 %v6824_v45  ;;  %v5829_v10 = vld [vmem:[%s9980_s1 + $0xf0] sm:$0xff]  ;;  %v3021_v11 = vld [vmem:[%s9980_s1 + $0x8] sm:$0xff] }
 0x687   :  { %6612 = vmatprep.mubr.msk.f32.mxu0 %vm108_vm0, %v5810_v13  ;;  %3199 = vmatprep.subr.mxu0 %v3049_v18  ;;  %v3020_v13 = vld [vmem:[%s9980_s1] sm:$0xff] }
 0x688   :  { %3099 = vmatpush1.msra.mxu1 %v5857_v16  ;;  %3200 = vmatpush1.msra.mxu0 %v3048_v20 }
 0x689   :  { %3100 = vmatprep.subr.mxu1 %v5856_v19  ;;  %3201 = vmatprep.subr.mxu0 %v3047_v22 }
 0x68a   :  { %6613 = vmatmul.mubr.msk.f32.gmra.mxu0 %vm108_vm0, %v5811_v14  ;;  %3101 = vmatpush1.msra.mxu1 %v5855_v21  ;;  %v5896_v14 = vld [vmem:[%s9980_s1 + $0x2c8] sm:$0xff] }
 0x68b   :  { %3261 = vmatprep.mubr.f32.mxu0 %v6824_v45  ;;  %3202 = vmatpush1.msra.mxu0 %v3046_v24 }
 0x68c   :  { %3102 = vmatprep.subr.mxu1 %v5854_v23  ;;  %3203 = vmatprep.subr.mxu0 %v3045_v26 }
 0x68d   :  { %3103 = vmatpush1.msra.mxu1 %v5853_v25  ;;  %3204 = vmatpush1.msra.mxu0 %v3044_v28  ;;  %v2648_v28 = vld [vmem:[%s9951_s16] sm:$0x1] }
 0x68e   :  { %3104 = vmatprep.subr.mxu1 %v5852_v27  ;;  %3205 = vmatprep.subr.mxu0 %v3043_v29 }
 0x68f   :  { %3105 = vmatpush1.msra.mxu1 %v5851_v30  ;;  %3206 = vmatpush1.msra.mxu0 %v3042_v32 }
 0x690   :  { %3106 = vmatprep.subr.mxu1 %v5850_v31  ;;  %3207 = vmatprep.subr.mxu0 %v3041_v34 }
 0x691   :  { %3107 = vmatpush1.msra.mxu1 %v5849_v33  ;;  %3208 = vmatpush1.msra.mxu0 %v3040_v36 }
 0x692   :  { %3108 = vmatprep.subr.mxu1 %v5848_v35  ;;  %3209 = vmatprep.subr.mxu0 %v3039_v38 }
 0x693   :  { %3109 = vmatpush1.msra.mxu1 %v5847_v37  ;;  %3210 = vmatpush1.msra.mxu0 %v3038_v40 }
 0x694   :  { %3110 = vmatprep.subr.mxu1 %v5846_v39  ;;  %3211 = vmatprep.subr.mxu0 %v3037_v42  ;;  %v5828_v42 = vld [vmem:[%s9981_s6] ss:$0 sm:$0xff] }
 0x695   :  { %3111 = vmatpush1.msra.mxu1 %v5845_v41  ;;  %3212 = vmatpush1.msra.mxu0 %v3036_v44 }
 0x696   :  { %3112 = vmatprep.subr.mxu1 %v5844_v43  ;;  %3213 = vmatprep.subr.mxu0 %v3035_v47 }
 0x697   :  { %3113 = vmatpush1.msra.mxu1 %v5843_v46  ;;  %3214 = vmatpush1.msra.mxu0 %v3034_v49 }
 0x698   :  { %3114 = vmatprep.subr.mxu1 %v5842_v48  ;;  %3215 = vmatprep.subr.mxu0 %v3033_v51 }
 0x699   :  { %3115 = vmatpush1.msra.mxu1 %v5841_v50  ;;  %3216 = vmatpush1.msra.mxu0 %v3032_v53 }
 0x69a   :  { %3116 = vmatprep.subr.mxu1 %v5840_v52  ;;  %3217 = vmatprep.subr.mxu0 %v3031_v55 }
 0x69b   :  { %3117 = vmatpush1.msra.mxu1 %v5839_v54  ;;  %3218 = vmatpush1.msra.mxu0 %v3030_v57 }
 0x69c   :  { %3118 = vmatprep.subr.mxu1 %v5838_v56  ;;  %3219 = vmatprep.subr.mxu0 %v3029_v59 }
 0x69d   :  { %3119 = vmatpush1.msra.mxu1 %v5837_v58  ;;  %3220 = vmatpush1.msra.mxu0 %v3028_v61 }
 0x69e   :  { %3120 = vmatprep.subr.mxu1 %v5836_v60  ;;  %3221 = vmatprep.subr.mxu0 %v3027_v63  ;;  %v5895_v63 = vld [vmem:[%s9980_s1 + $0x2c0] sm:$0xff] }
 0x69f   :  { %3121 = vmatpush1.msra.mxu1 %v5835_v62  ;;  %3222 = vmatpush1.msra.mxu0 %v3026_v1 }
 0x6a0   :  { %3122 = vmatprep.subr.mxu1 %v5834_v0  ;;  %3223 = vmatprep.subr.mxu0 %v3025_v3  ;;  %v5893_v3 = vld [vmem:[%s9980_s1 + $0x2b0] sm:$0xff] }
 0x6a1   :  { %3123 = vmatpush1.msra.mxu1 %v5833_v2  ;;  %3224 = vmatpush1.msra.mxu0 %v3024_v5  ;;  %v5894_v2 = vld [vmem:[%s9980_s1 + $0x2b8] sm:$0xff]  ;;  %v5891_v5 = vld [vmem:[%s9980_s1 + $0x2a0] sm:$0xff] }
 0x6a2   :  { %3124 = vmatprep.subr.mxu1 %v5832_v4  ;;  %3225 = vmatprep.subr.mxu0 %v3023_v7  ;;  %v5892_v4 = vld [vmem:[%s9980_s1 + $0x2a8] sm:$0xff]  ;;  %v5890_v7 = vld [vmem:[%s9980_s1 + $0x298] sm:$0xff] }
 0x6a3   :  { %3125 = vmatpush1.msra.mxu1 %v5831_v6  ;;  %3226 = vmatpush1.msra.mxu0 %v3022_v9  ;;  %v5889_v9 = vld [vmem:[%s9980_s1 + $0x290] sm:$0xff] }
 0x6a4   :  { %3126 = vmatprep.subr.mxu1 %v5830_v8  ;;  %3227 = vmatprep.subr.mxu0 %v3021_v11  ;;  %v5887_v11 = vld [vmem:[%s9980_s1 + $0x280] sm:$0xff] }
 0x6a5   :  { %3127 = vmatpush1.msra.mxu1 %v5829_v10  ;;  %3228 = vmatpush1.msra.mxu0 %v3020_v13  ;;  %v5888_v10 = vld [vmem:[%s9980_s1 + $0x288] sm:$0xff] }
 0x6a6   :  { %3334 = vmatprep.subr.mxu1 %v5896_v14  ;;  %v5886_v14 = vld [vmem:[%s9980_s1 + $0x278] sm:$0xff] }
 0x6fc   :  { %v2313_v15 = vpop.f32.mrf.mxu1  ;;  %v2386_v16 = vpop.f32.mrf.mxu0 }
 0x6fd   :  { %v2387_v24 = vadd.f32 %v2386_v16, %v2313_v15  ;;  %v5885_v16 = vld [vmem:[%s9980_s1 + $0x270] sm:$0xff] }
 0x6fe   :  { %v6432_v18 = vpop.f32.mrf.mxu1  ;;  %v6455_v19 = vpop.f32.mrf.mxu0 }
 0x6ff   :  { %v5884_v18 = vld [vmem:[%s9980_s1 + $0x268] sm:$0xff]  ;;  %v5883_v19 = vld [vmem:[%s9980_s1 + $0x260] sm:$0xff] }
 0x711   :  { %v2471_v20 = vpop.f32.mrf.mxu1  ;;  %v2557_v21 = vpop.f32.mrf.mxu0 }
 0x712   :  { %v2475_v25 = vadd.f32 %v2471_v20, %v2387_v24  ;;  %v5880_v24 = vld [vmem:[%s9980_s1 + $0x248] sm:$0xff] }
 0x713   :  { %v6478_v22 = vpop.f32.mrf.mxu1  ;;  %v6501_v23 = vpop.f32.mrf.mxu0 }
 0x714   :  { %v2561_v26 = vadd.f32 %v2557_v21, %v2475_v25  ;;  %v5882_v21 = vld [vmem:[%s9980_s1 + $0x258] sm:$0xff]  ;;  %v5881_v23 = vld [vmem:[%s9980_s1 + $0x250] sm:$0xff]  ;;  %v5879_v25 = vld [vmem:[%s9980_s1 + $0x240] sm:$0xff] }
 0x726   :  { %v2643_v27 = vpop.f32.mrf.mxu1 }
 0x727   :  { %v2647_v29 = vadd.f32 %v2643_v27, %v2561_v26  ;;  %v5878_v26 = vld [vmem:[%s9980_s1 + $0x238] sm:$0xff]  ;;  %v5877_v27 = vld [vmem:[%s9980_s1 + $0x230] sm:$0xff] }
 0x728   :  { %v6524_v30 = vpop.f32.mrf.mxu1 }
 0x729   :  { %v2649_v31 = vadd.f32 %v2648_v28, %v2647_v29  ;;  %v5876_v28 = vld [vmem:[%s9980_s1 + $0x228] sm:$0xff]  ;;  %v5875_v29 = vld [vmem:[%s9980_s1 + $0x220] sm:$0xff]  ;;  %v5874_v30 = vld [vmem:[%s9980_s1 + $0x218] sm:$0xff] }
 0x72b   :  { %v2650_v32 = vmax.f32 %v2649_v31, 0.0  ;;  %v6551_v33 = vpop.f32.mrf.mxu0  ;;  %v5873_v31 = vld [vmem:[%s9980_s1 + $0x210] sm:$0xff] }
 0x72d   :  { %2652 = vst.msk [vmem:[#allocation5] sm:$0x1] %vm2651_vm14, %v2650_v32  ;;  %v2764_v34 = vpop.f32.mrf.mxu0  ;;  %v5872_v32 = vld [vmem:[%s9980_s1 + $0x208] sm:$0xff] }
 0x73f   :  { %v6554_v35 = vpop.f32.mrf.mxu0 }
 0x741   :  { %v6581_v36 = vpop.f32.mrf.mxu1  ;;  %v2774_v38 = vpop.f32.mrf.mxu0 }
 0x742   :  { %v2867_v39 = vadd.f32 %v6581_v36, %v6551_v33  ;;  %v5871_v33 = vld [vmem:[%s9980_s1 + $0x200] sm:$0xff]  ;;  %v5868_v36 = vld [vmem:[%s9980_s1 + $0x1e8] sm:$0xff] }
 0x743   :  { %v2861_v37 = vpop.f32.mrf.mxu1 }
 0x744   :  { %v2862_v43 = vadd.f32 %v2861_v37, %v2764_v34  ;;  %v5870_v34 = vld [vmem:[%s9980_s1 + $0x1f8] sm:$0xff]  ;;  %v5867_v37 = vld [vmem:[%s9980_s1 + $0x1e0] sm:$0xff] }
 0x745   :  { %v6584_v40 = vpop.f32.mrf.mxu1 }
 0x746   :  { %v6611_v41 = vpop.f32.mrf.mxu0  ;;  %v2877_v48 = vadd.f32 %v6584_v40, %v6554_v35  ;;  %v5869_v35 = vld [vmem:[%s9980_s1 + $0x1f0] sm:$0xff] }
 0x747   :  { %v2994_v44 = vadd.f32 %v6611_v41, %v2867_v39  ;;  %v2871_v46 = vpop.f32.mrf.mxu1 }
 0x748   :  { %v2974_v47 = vpop.f32.mrf.mxu0  ;;  %v2872_v53 = vadd.f32 %v2871_v46, %v2774_v38  ;;  %v3649_v46 = vld [vmem:[%s9985_s3 + $0x60] sm:$0xff] }
 0x749   :  { %v3005_v49 = vadd.f32 %v5828_v42, %v2994_v44  ;;  %v2993_v50 = vadd.f32 %v2974_v47, %v2862_v43  ;;  %v3651_v43 = vld [vmem:[%s9985_s3 + $0x70] sm:$0xff]  ;;  %v3650_v44 = vld [vmem:[%s9985_s3 + $0x68] sm:$0xff]  ;;  %v3648_v47 = vld [vmem:[%s9985_s3 + $0x58] sm:$0xff] }
 0x74a   :  { %v6614_v51 = vpop.f32.mrf.mxu0 }
 0x74b   :  { %v3009_v52 = vmax.f32 %v3005_v49, 0.0  ;;  %v3004_v54 = vadd.f32 %v5828_v42, %v2993_v50  ;;  %v2996_v55 = vadd.f32 %v6614_v51, %v2877_v48  ;;  %v3647_v48 = vld [vmem:[%s9985_s3 + $0x50] sm:$0xff]  ;;  %v3646_v49 = vld [vmem:[%s9985_s3 + $0x48] sm:$0xff]  ;;  %v3645_v50 = vld [vmem:[%s9985_s3 + $0x40] sm:$0xff] }
 0x74c   :  { %v2984_v56 = vpop.f32.mrf.mxu0  ;;  %v3644_v51 = vld [vmem:[%s9985_s3 + $0x38] sm:$0xff] }
 0x74d   :  { %3013 = vst.msk [vmem:[#allocation2 + $0x8] sm:$0xff] %vm436_vm1, %v3009_v52  ;;  %v3008_v57 = vmax.f32 %v3004_v54, 0.0  ;;  %v3007_v58 = vadd.f32 %v5828_v42, %v2996_v55  ;;  %v2995_v59 = vadd.f32 %v2984_v56, %v2872_v53  ;;  %v3643_v52 = vld [vmem:[%s9985_s3 + $0x30] sm:$0xff]  ;;  %v3642_v53 = vld [vmem:[%s9985_s3 + $0x28] sm:$0xff]  ;;  %v3641_v54 = vld [vmem:[%s9985_s3 + $0x20] sm:$0xff] }
 0x74e   :  { %v3640_v55 = vld [vmem:[%s9985_s3 + $0x18] sm:$0xff]  ;;  %v3639_v56 = vld [vmem:[%s9985_s3 + $0x10] sm:$0xff] }
 0x74f   :  { %3012 = vst.msk [vmem:[#allocation2] sm:$0xff] %vm436_vm1, %v3008_v57  ;;  %v3011_v60 = vmax.f32 %v3007_v58, 0.0  ;;  %v3006_v61 = vadd.f32 %v5828_v42, %v2995_v59  ;;  %v3652_v42 = vld [vmem:[%s9985_s3 + $0x78] sm:$0xff] }
 0x751   :  { %3015 = vst.msk [vmem:[#allocation2 + $0x18] sm:$0x3f] %vm440_vm2, %v3011_v60  ;;  %v3010_v62 = vmax.f32 %v3006_v61, 0.0 }
 0x753   :  { %3014 = vst.msk [vmem:[#allocation2 + $0x10] sm:$0xff] %vm436_vm1, %v3010_v62 }
 0x754   :  { %v3017_v8 = vld [vmem:[#allocation2 + $0x8] sm:$0xff] }
 0x756   :  { %v3050_v0 = vld [vmem:[#allocation2 + $0x1] sm:$0xff] }
 0x757   :  { %v3016_v1 = vld [vmem:[#allocation2] sm:$0xff]  ;;  %5859 = vmatmul.mubr.msk.f32.vlgmr.msra.gmra.mxu1 %vm436_vm1, %v3050_v0 }
 0x758   :  { %5863 = vmatmul.mubr.msk.f32.vlgmr.msra.gmra.mxu0 %vm436_vm1, %v3016_v1  ;;  %3335 = vmatpush1.msra.mxu1 %v5895_v63  ;;  %v3053_v20 = vld [vmem:[#allocation2 + $0x19] sm:$0xf]  ;;  %v3286_v38 = vld [vmem:[#allocation2 + $0x2] sm:$0xff] }
 0x759   :  { %3166 = vmatprep.mubr.f32.mxu1 %v6824_v45  ;;  %3336 = vmatprep.subr.mxu1 %v5894_v2  ;;  %v3019_v22 = vld [vmem:[#allocation2 + $0x18] sm:$0xf] }
 0x75a   :  { %3267 = vmatprep.mubr.f32.mxu0 %v6824_v45  ;;  %3337 = vmatpush1.msra.mxu1 %v5893_v3  ;;  %v3051_v6 = vld [vmem:[#allocation2 + $0x9] sm:$0xff]  ;;  %v3052_v13 = vld [vmem:[#allocation2 + $0x11] sm:$0xff]  ;;  %v3289_v41 = vld [vmem:[#allocation2 + $0x1a] sm:$0xf] }
 0x75b   :  { %3338 = vmatprep.subr.mxu1 %v5892_v4  ;;  %5860 = vmatmul.mubr.msk.f32.gmra.mxu1 %vm436_vm1, %v3051_v6  ;;  %v3018_v15 = vld [vmem:[#allocation2 + $0x10] sm:$0xff] }
 0x75c   :  { %5864 = vmatmul.mubr.msk.f32.gmra.mxu0 %vm436_vm1, %v3017_v8  ;;  %3339 = vmatpush1.msra.mxu1 %v5891_v5  ;;  %v3287_v39 = vld [vmem:[#allocation2 + $0xa] sm:$0xff]  ;;  %v3288_v40 = vld [vmem:[#allocation2 + $0x12] sm:$0xff] }
 0x75d   :  { %3340 = vmatprep.subr.mxu1 %v5890_v7  ;;  %3172 = vmatprep.mubr.f32.mxu1 %v6824_v45 }
 0x75e   :  { %3341 = vmatpush1.msra.mxu1 %v5889_v9  ;;  %3273 = vmatprep.mubr.f32.mxu0 %v6824_v45 }
 0x75f   :  { %3342 = vmatprep.subr.mxu1 %v5888_v10  ;;  %5861 = vmatmul.mubr.msk.f32.gmra.mxu1 %vm436_vm1, %v3052_v13 }
 0x760   :  { %5865 = vmatmul.mubr.msk.f32.gmra.mxu0 %vm436_vm1, %v3018_v15  ;;  %3343 = vmatpush1.msra.mxu1 %v5887_v11 }
 0x761   :  { %3344 = vmatprep.subr.mxu1 %v5886_v14  ;;  %3178 = vmatprep.mubr.f32.mxu1 %v6824_v45 }
 0x762   :  { %3345 = vmatpush1.msra.mxu1 %v5885_v16  ;;  %3279 = vmatprep.mubr.f32.mxu0 %v6824_v45 }
 0x763   :  { %3346 = vmatprep.subr.mxu1 %v5884_v18  ;;  %5862 = vmatmul.mubr.msk.f32.gmra.mxu1 %vm436_vm1, %v3053_v20 }
 0x764   :  { %5866 = vmatmul.mubr.msk.f32.gmra.mxu0 %vm436_vm1, %v3019_v22  ;;  %3347 = vmatpush1.msra.mxu1 %v5883_v19  ;;  %v3429_v19 = vld [vmem:[%s9982_s4] sm:$0x3] }
 0x765   :  { %3348 = vmatprep.subr.mxu1 %v5882_v21  ;;  %3396 = vmatprep.mubr.f32.mxu1 %v6824_v45 }
 0x766   :  { %3349 = vmatpush1.msra.mxu1 %v5881_v23  ;;  %3535 = vmatprep.mubr.f32.mxu0 %v6824_v45 }
 0x767   :  { %3350 = vmatprep.subr.mxu1 %v5880_v24 }
 0x768   :  { %3351 = vmatpush1.msra.mxu1 %v5879_v25 }
 0x769   :  { %3352 = vmatprep.subr.mxu1 %v5878_v26 }
 0x76a   :  { %3353 = vmatpush1.msra.mxu1 %v5877_v27  ;;  %v3434_v27 = vrot.slane %v3429_v19, %v7406_v12 }
 0x76b   :  { %3354 = vmatprep.subr.mxu1 %v5876_v28 }
 0x76c   :  { %3355 = vmatpush1.msra.mxu1 %v5875_v29 }
 0x76d   :  { %3356 = vmatprep.subr.mxu1 %v5874_v30 }
 0x76e   :  { %3357 = vmatpush1.msra.mxu1 %v5873_v31  ;;  %v3438_v31 = vrot.slane %v3429_v19, %v7411_v17  ;;  %v3655_v19 = vld [vmem:[%s9985_s3 + $0x90] sm:$0xff] }
 0x76f   :  { %3358 = vmatprep.subr.mxu1 %v5872_v32 }
 0x770   :  { %3359 = vmatpush1.msra.mxu1 %v5871_v33 }
 0x771   :  { %3360 = vmatprep.subr.mxu1 %v5870_v34 }
 0x772   :  { %3361 = vmatpush1.msra.mxu1 %v5869_v35 }
 0x773   :  { %3362 = vmatprep.subr.mxu1 %v5868_v36 }
 0x774   :  { %3363 = vmatpush1.msra.mxu1 %v5867_v37 }
 0x775   :  { %5897 = vmatmul.mubr.msk.f32.vlgmr.msra.gmra.mxu1 %vm436_vm1, %v3286_v38  ;;  %3664 = vmatprep.subr.mxu1 %v6824_v45 }
 0x776   :  { %3402 = vmatprep.mubr.f32.mxu1 %v6824_v45  ;;  %3665 = vmatpush1.msra.mxu1 %v3652_v42 }
 0x777   :  { %3666 = vmatprep.subr.mxu1 %v6824_v45 }
 0x778   :  { %3667 = vmatpush1.msra.mxu1 %v3651_v43 }
 0x779   :  { %5898 = vmatmul.mubr.msk.f32.gmra.mxu1 %vm436_vm1, %v3287_v39  ;;  %3668 = vmatprep.subr.mxu1 %v6824_v45 }
 0x77a   :  { %3408 = vmatprep.mubr.f32.mxu1 %v6824_v45  ;;  %3669 = vmatpush1.msra.mxu1 %v3650_v44 }
 0x77b   :  { %3670 = vmatprep.subr.mxu1 %v6824_v45 }
 0x77c   :  { %3671 = vmatpush1.msra.mxu1 %v3649_v46 }
 0x77d   :  { %5899 = vmatmul.mubr.msk.f32.gmra.mxu1 %vm436_vm1, %v3288_v40  ;;  %3672 = vmatprep.subr.mxu1 %v6824_v45 }
 0x77e   :  { %3414 = vmatprep.mubr.f32.mxu1 %v6824_v45  ;;  %3673 = vmatpush1.msra.mxu1 %v3648_v47 }
 0x77f   :  { %3674 = vmatprep.subr.mxu1 %v6824_v45 }
 0x780   :  { %3675 = vmatpush1.msra.mxu1 %v3647_v48 }
 0x781   :  { %5900 = vmatmul.mubr.msk.f32.gmra.mxu1 %vm436_vm1, %v3289_v41  ;;  %3676 = vmatprep.subr.mxu1 %v6824_v45 }
 0x782   :  { %3677 = vmatpush1.msra.mxu1 %v3646_v49 }
 0x783   :  { %3678 = vmatprep.subr.mxu1 %v6824_v45 }
 0x784   :  { %3679 = vmatpush1.msra.mxu1 %v3645_v50 }
 0x785   :  { %3680 = vmatprep.subr.mxu1 %v6824_v45 }
 0x786   :  { %3681 = vmatpush1.msra.mxu1 %v3644_v51 }
 0x787   :  { %3682 = vmatprep.subr.mxu1 %v6824_v45 }
 0x788   :  { %3683 = vmatpush1.msra.mxu1 %v3643_v52 }
 0x789   :  { %3684 = vmatprep.subr.mxu1 %v6824_v45 }
 0x78a   :  { %3685 = vmatpush1.msra.mxu1 %v3642_v53 }
 0x78b   :  { %3686 = vmatprep.subr.mxu1 %v6824_v45 }
 0x78c   :  { %3687 = vmatpush1.msra.mxu1 %v3641_v54 }
 0x78d   :  { %3688 = vmatprep.subr.mxu1 %v6824_v45 }
 0x78e   :  { %3689 = vmatpush1.msra.mxu1 %v3640_v55  ;;  %v3457_v55 = vld [vmem:[%s9983_s5] sm:$0xff] }
 0x78f   :  { %3690 = vmatprep.subr.mxu1 %v6824_v45 }
 0x790   :  { %3691 = vmatpush1.msra.mxu1 %v3639_v56  ;;  %v3458_v56 = vld [vmem:[%s9983_s5 + $0x8] sm:$0x3f]  ;;  %s9987_s5 = sld [smem:[#allocation18_spill]] }
 0x791   :  { %3692 = vmatprep.subr.mxu1 %v6824_v45 }
 0x817   :  { %v3162_v57 = vpop.f32.mrf.mxu1 }
 0x818   :  { %v3263_v60 = vpop.f32.mrf.mxu0 }
 0x819   :  { %v3164_v58 = vpop.f32.mrf.mxu1  ;;  %v3264_v34 = vadd.f32 %v3263_v60, %v3162_v57  ;;  %v3548_v57 = vld [vmem:[%s9984_s7] sm:$0xff]  ;;  %v3549_v60 = vld [vmem:[%s9984_s7 + $0x8] sm:$0x3f] }
 0x81a   :  { %v3265_v62 = vpop.f32.mrf.mxu0 }
 0x81b   :  { %v3168_v59 = vpop.f32.mrf.mxu1  ;;  %v3266_v30 = vadd.f32 %v3265_v62, %v3164_v58  ;;  %v3754_v58 = vld [vmem:[%s9943_s8 + $0x78] sm:$0xff]  ;;  %v3751_v62 = vld [vmem:[%s9943_s8 + $0x60] sm:$0xff] }
 0x81c   :  { %v3269_v0 = vpop.f32.mrf.mxu0 }
 0x81d   :  { %v3170_v61 = vpop.f32.mrf.mxu1  ;;  %v3270_v26 = vadd.f32 %v3269_v0, %v3168_v59  ;;  %v3753_v59 = vld [vmem:[%s9943_s8 + $0x70] sm:$0xff] }
 0x81e   :  { %v3271_v2 = vpop.f32.mrf.mxu0  ;;  %v3749_v0 = vld [vmem:[%s9943_s8 + $0x50] sm:$0xff] }
 0x81f   :  { %v3174_v63 = vpop.f32.mrf.mxu1  ;;  %v3272_v22 = vadd.f32 %v3271_v2, %v3170_v61  ;;  %v3752_v61 = vld [vmem:[%s9943_s8 + $0x68] sm:$0xff]  ;;  %v3747_v2 = vld [vmem:[%s9943_s8 + $0x40] sm:$0xff] }
 0x820   :  { %v3275_v4 = vpop.f32.mrf.mxu0 }
 0x821   :  { %v3176_v1 = vpop.f32.mrf.mxu1  ;;  %v3276_v20 = vadd.f32 %v3275_v4, %v3174_v63  ;;  %v3750_v63 = vld [vmem:[%s9943_s8 + $0x58] sm:$0xff]  ;;  %v3745_v4 = vld [vmem:[%s9943_s8 + $0x30] sm:$0xff] }
 0x822   :  { %v3277_v7 = vpop.f32.mrf.mxu0 }
 0x823   :  { %v3180_v3 = vpop.f32.mrf.mxu1  ;;  %v3278_v16 = vadd.f32 %v3277_v7, %v3176_v1  ;;  %v3748_v1 = vld [vmem:[%s9943_s8 + $0x48] sm:$0xff]  ;;  %v3742_v7 = vld [vmem:[%s9943_s8 + $0x18] sm:$0xff] }
 0x824   :  { %v3281_v10 = vpop.f32.mrf.mxu0 }
 0x825   :  { %v3182_v5 = vpop.f32.mrf.mxu1  ;;  %v3282_v18 = vadd.f32 %v3281_v10, %v3180_v3  ;;  %v3746_v3 = vld [vmem:[%s9943_s8 + $0x38] sm:$0xff]  ;;  %v3740_v10 = vld [vmem:[%s9943_s8 + $0x8] sm:$0xff] }
 0x826   :  { %v3283_v14 = vpop.f32.mrf.mxu0 }
 0x827   :  { %v3284_v23 = vadd.f32 %v3283_v14, %v3182_v5  ;;  %v3744_v5 = vld [vmem:[%s9943_s8 + $0x28] sm:$0xff]  ;;  %v3657_v14 = vld [vmem:[%s9985_s3 + $0xa0] sm:$0xff] }
 0x835   :  { %v3398_v6 = vpop.f32.mrf.mxu1 }
 0x836   :  { %v3421_v40 = vadd.f32 %v3398_v6, %v3264_v34  ;;  %v3743_v6 = vld [vmem:[%s9943_s8 + $0x20] sm:$0xff] }
 0x837   :  { %v3400_v8 = vpop.f32.mrf.mxu1 }
 0x838   :  { %v3422_v37 = vadd.f32 %v3400_v8, %v3266_v30  ;;  %v3441_v49 = vadd.f32 %v3434_v27, %v3421_v40  ;;  %v3741_v8 = vld [vmem:[%s9943_s8 + $0x10] sm:$0xff] }
 0x839   :  { %v3404_v9 = vpop.f32.mrf.mxu1 }
 0x83a   :  { %v3423_v35 = vadd.f32 %v3404_v9, %v3270_v26  ;;  %v3442_v47 = vadd.f32 %v3438_v31, %v3422_v37  ;;  %v3449_v54 = vmax.f32 %v3441_v49, 0.0  ;;  %v3638_v9 = vld [vmem:[%s9985_s3 + $0x8] sm:$0xff]  ;;  %v5934_v26 = vld [vmem:[%s9944_s9 + $0x158] sm:$0xf]  ;;  %v5933_v37 = vld [vmem:[%s9944_s9 + $0x150] sm:$0xf] }
 0x83b   :  { %v3406_v11 = vpop.f32.mrf.mxu1  ;;  %3693 = vmatpush1.msra.mxu1 %v3638_v9  ;;  %v5929_v49 = vld [vmem:[%s9944_s9 + $0x130] sm:$0xff] }
 0x83c   :  { %v3424_v32 = vadd.f32 %v3406_v11, %v3272_v22  ;;  %v3443_v44 = vadd.f32 %v3434_v27, %v3423_v35  ;;  %v3450_v53 = vmax.f32 %v3442_v47, 0.0  ;;  %3694 = vmatprep.subr.mxu1 %v6824_v45  ;;  %v3637_v11 = vld [vmem:[%s9985_s3] sm:$0xff]  ;;  %v3756_v22 = vld [vmem:[%s9943_s8 + $0x88] sm:$0xff]  ;;  %v5930_v47 = vld [vmem:[%s9944_s9 + $0x138] sm:$0xff] }
 0x83d   :  { %v3410_v13 = vpop.f32.mrf.mxu1  ;;  %3695 = vmatpush1.msra.mxu1 %v3637_v11  ;;  %v3843_v9 = vld [vmem:[%s9944_s9 + $0x10] sm:$0xff]  ;;  %v3842_v11 = vld [vmem:[%s9944_s9 + $0x8] sm:$0xff] }
 0x83e   :  { %v3425_v28 = vadd.f32 %v3410_v13, %v3276_v20  ;;  %v3444_v42 = vadd.f32 %v3438_v31, %v3424_v32  ;;  %v3451_v52 = vmax.f32 %v3443_v44, 0.0  ;;  %v3739_v13 = vld [vmem:[%s9943_s8] sm:$0xff]  ;;  %3718 = vmatprep.subr.mxu1 %v6824_v45  ;;  %v3757_v20 = vld [vmem:[%s9943_s8 + $0x90] sm:$0xff] }
 0x83f   :  { %v3412_v15 = vpop.f32.mrf.mxu1  ;;  %3719 = vmatpush2.msra.mxu1 %v3657_v14  ;;  %v5931_v44 = vld [vmem:[%s9944_s9 + $0x140] sm:$0xff] }
 0x840   :  { %v3426_v24 = vadd.f32 %v3412_v15, %v3278_v16  ;;  %v3445_v41 = vadd.f32 %v3434_v27, %v3425_v28  ;;  %v3452_v51 = vmax.f32 %v3444_v42, 0.0  ;;  %v3759_v15 = vld [vmem:[%s9943_s8 + $0xa0] sm:$0xff]  ;;  %3720 = vmatprep.subr.mxu1 %v6824_v45  ;;  %v3656_v16 = vld [vmem:[%s9985_s3 + $0x98] sm:$0xff] }
 0x841   :  { %v3416_v21 = vpop.f32.mrf.mxu1  ;;  %3721 = vmatpush2.msra.mxu1 %v3656_v16  ;;  %v3841_v14 = vld [vmem:[%s9944_s9] sm:$0xff]  ;;  %v5990_v16 = vld [vmem:[%s9944_s9 + $0x2b8] sm:$0xf] }
 0x842   :  { %v3427_v25 = vadd.f32 %v3416_v21, %v3282_v18  ;;  %v3446_v38 = vadd.f32 %v3438_v31, %v3426_v24  ;;  %v3453_v50 = vmax.f32 %v3445_v41, 0.0  ;;  %v3758_v18 = vld [vmem:[%s9943_s8 + $0x98] sm:$0xff]  ;;  %3722 = vmatprep.subr.mxu1 %v6824_v45  ;;  %v3654_v21 = vld [vmem:[%s9985_s3 + $0x88] sm:$0xff]  ;;  %v3755_v24 = vld [vmem:[%s9943_s8 + $0x80] sm:$0xff] }
 0x843   :  { %v3418_v29 = vpop.f32.mrf.mxu1  ;;  %3723 = vmatpush2.msra.mxu1 %v3655_v19  ;;  %v5914_v19 = vld [vmem:[%s9944_s9 + $0xb8] sm:$0xff] }
 0x844   :  { %v3428_v33 = vadd.f32 %v3418_v29, %v3284_v23  ;;  %v3447_v36 = vadd.f32 %v3434_v27, %v3427_v25  ;;  %v3454_v48 = vmax.f32 %v3446_v38, 0.0  ;;  %3724 = vmatprep.subr.mxu1 %v6824_v45  ;;  %v3653_v23 = vld [vmem:[%s9985_s3 + $0x80] sm:$0xff]  ;;  %v3862_v25 = vld [vmem:[%s9944_s9 + $0xa8] sm:$0xf]  ;;  %v3860_v38 = vld [vmem:[%s9944_s9 + $0x98] sm:$0xff] }
 0x845   :  { %3725 = vmatpush2.msra.mxu1 %v3654_v21  ;;  %v5964_v21 = vld [vmem:[%s9944_s9 + $0x208] sm:$0xf] }
 0x846   :  { %v3448_v39 = vadd.f32 %v3438_v31, %v3428_v33  ;;  %v3455_v46 = vmax.f32 %v3447_v36, 0.0  ;;  %3726 = vmatprep.subr.mxu1 %v6824_v45  ;;  %v3861_v36 = vld [vmem:[%s9944_s9 + $0xa0] sm:$0xf] }
 0x847   :  { %3727 = vmatpush2.msra.mxu1 %v3653_v23 }
 0x848   :  { %v3456_v43 = vmax.f32 %v3448_v39, 0.0  ;;  %5935 = vmatprep.subr.msk.mxu1 %vm894_vm3, %v5934_v26  ;;  %v5932_v39 = vld [vmem:[%s9944_s9 + $0x148] sm:$0xff] }
 0x84a   :  { %5901 = vmatprep.subr.msk.mxu0 %vm894_vm3, %v3456_v43 }
 0x84b   :  { %5902 = vmatpush1.msk.msra.mxu0 %vm894_vm3, %v3455_v46 }
 0x84c   :  { %3497 = vmatprep.subr.mxu0 %v3454_v48 }
 0x84d   :  { %3498 = vmatpush1.msra.mxu0 %v3453_v50 }
 0x84e   :  { %3499 = vmatprep.subr.mxu0 %v3452_v51 }
 0x84f   :  { %3500 = vmatpush1.msra.mxu0 %v3451_v52 }
 0x850   :  { %3501 = vmatprep.subr.mxu0 %v3450_v53 }
 0x851   :  { %3502 = vmatpush1.msra.mxu0 %v3449_v54 }
 0x852   :  { %5903 = vmatmul.mubr.msk.f32.vlgmr.msra.gmra.mxu0 %vm887_vm4, %v3457_v55  ;;  %5905 = vmatprep.subr.msk.mxu0 %vm894_vm3, %v3456_v43  ;;  %v3859_v43 = vld [vmem:[%s9944_s9 + $0x90] sm:$0xff]  ;;  %v3853_v55 = vld [vmem:[%s9944_s9 + $0x60] sm:$0xff] }
 0x853   :  { %5906 = vmatpush1.msk.msra.mxu0 %vm894_vm3, %v3455_v46  ;;  %3541 = vmatprep.mubr.f32.mxu0 %v6824_v45  ;;  %v3858_v46 = vld [vmem:[%s9944_s9 + $0x88] sm:$0xff] }
 0x854   :  { %3582 = vmatprep.subr.mxu0 %v3454_v48  ;;  %v3857_v48 = vld [vmem:[%s9944_s9 + $0x80] sm:$0xff] }
 0x855   :  { %3583 = vmatpush1.msra.mxu0 %v3453_v50  ;;  %v3856_v50 = vld [vmem:[%s9944_s9 + $0x78] sm:$0xff] }
 0x856   :  { %5904 = vmatmul.mubr.msk.f32.gmra.mxu0 %vm887_vm4, %v3458_v56  ;;  %3584 = vmatprep.subr.mxu0 %v3452_v51  ;;  %v5928_v51 = vld [vmem:[%s9944_s9 + $0x128] sm:$0xff]  ;;  %v3852_v56 = vld [vmem:[%s9944_s9 + $0x58] sm:$0xff] }
 0x857   :  { %3585 = vmatpush1.msra.mxu0 %v3451_v52  ;;  %3620 = vmatprep.mubr.f32.mxu0 %v6824_v45  ;;  %v3855_v52 = vld [vmem:[%s9944_s9 + $0x70] sm:$0xff] }
 0x858   :  { %3586 = vmatprep.subr.mxu0 %v3450_v53  ;;  %v5927_v53 = vld [vmem:[%s9944_s9 + $0x120] sm:$0xff] }
 0x859   :  { %3587 = vmatpush1.msra.mxu0 %v3449_v54  ;;  %v3854_v54 = vld [vmem:[%s9944_s9 + $0x68] sm:$0xff] }
 0x85a   :  { %5907 = vmatmul.mubr.msk.f32.vlgmr.msra.gmra.mxu0 %vm887_vm4, %v3548_v57  ;;  %3760 = vmatprep.subr.mxu0 %v6824_v45  ;;  %v3851_v57 = vld [vmem:[%s9944_s9 + $0x50] sm:$0xff] }
 0x85b   :  { %3626 = vmatprep.mubr.f32.mxu0 %v6824_v45  ;;  %3761 = vmatpush1.msra.mxu0 %v3754_v58  ;;  %v5926_v58 = vld [vmem:[%s9944_s9 + $0x118] sm:$0xff] }
 0x85c   :  { %3762 = vmatprep.subr.mxu0 %v6824_v45 }
 0x85d   :  { %3763 = vmatpush1.msra.mxu0 %v3753_v59  ;;  %v3850_v59 = vld [vmem:[%s9944_s9 + $0x48] sm:$0xff] }
 0x85e   :  { %5908 = vmatmul.mubr.msk.f32.gmra.mxu0 %vm887_vm4, %v3549_v60  ;;  %3764 = vmatprep.subr.mxu0 %v6824_v45  ;;  %v5925_v60 = vld [vmem:[%s9944_s9 + $0x110] sm:$0xff] }
 0x85f   :  { %3765 = vmatpush1.msra.mxu0 %v3752_v61  ;;  %v3849_v61 = vld [vmem:[%s9944_s9 + $0x40] sm:$0xff] }
 0x860   :  { %3766 = vmatprep.subr.mxu0 %v6824_v45 }
 0x861   :  { %3767 = vmatpush1.msra.mxu0 %v3751_v62  ;;  %v5924_v62 = vld [vmem:[%s9944_s9 + $0x108] sm:$0xff] }
 0x862   :  { %3768 = vmatprep.subr.mxu0 %v6824_v45 }
 0x863   :  { %3769 = vmatpush1.msra.mxu0 %v3750_v63  ;;  %v3848_v63 = vld [vmem:[%s9944_s9 + $0x38] sm:$0xff] }
 0x864   :  { %3770 = vmatprep.subr.mxu0 %v6824_v45 }
 0x865   :  { %3771 = vmatpush1.msra.mxu0 %v3749_v0  ;;  %v5923_v0 = vld [vmem:[%s9944_s9 + $0x100] sm:$0xff] }
 0x866   :  { %3772 = vmatprep.subr.mxu0 %v6824_v45 }
 0x867   :  { %3773 = vmatpush1.msra.mxu0 %v3748_v1  ;;  %v3847_v1 = vld [vmem:[%s9944_s9 + $0x30] sm:$0xff] }
 0x868   :  { %3774 = vmatprep.subr.mxu0 %v6824_v45 }
 0x869   :  { %3775 = vmatpush1.msra.mxu0 %v3747_v2  ;;  %v5922_v2 = vld [vmem:[%s9944_s9 + $0xf8] sm:$0xff] }
 0x86a   :  { %3776 = vmatprep.subr.mxu0 %v6824_v45 }
 0x86b   :  { %3777 = vmatpush1.msra.mxu0 %v3746_v3  ;;  %v3846_v3 = vld [vmem:[%s9944_s9 + $0x28] sm:$0xff] }
 0x86c   :  { %3778 = vmatprep.subr.mxu0 %v6824_v45 }
 0x86d   :  { %3779 = vmatpush1.msra.mxu0 %v3745_v4  ;;  %v5921_v4 = vld [vmem:[%s9944_s9 + $0xf0] sm:$0xff] }
 0x86e   :  { %3780 = vmatprep.subr.mxu0 %v6824_v45 }
 0x86f   :  { %3781 = vmatpush1.msra.mxu0 %v3744_v5  ;;  %v3845_v5 = vld [vmem:[%s9944_s9 + $0x20] sm:$0xff] }
 0x870   :  { %3782 = vmatprep.subr.mxu0 %v6824_v45 }
 0x871   :  { %3783 = vmatpush1.msra.mxu0 %v3743_v6  ;;  %v5920_v6 = vld [vmem:[%s9944_s9 + $0xe8] sm:$0xff] }
 0x872   :  { %3784 = vmatprep.subr.mxu0 %v6824_v45 }
 0x873   :  { %3785 = vmatpush1.msra.mxu0 %v3742_v7  ;;  %v3844_v7 = vld [vmem:[%s9944_s9 + $0x18] sm:$0xff] }
 0x874   :  { %3786 = vmatprep.subr.mxu0 %v6824_v45 }
 0x875   :  { %3787 = vmatpush1.msra.mxu0 %v3741_v8  ;;  %v5919_v8 = vld [vmem:[%s9944_s9 + $0xe0] sm:$0xff] }
 0x876   :  { %3788 = vmatprep.subr.mxu0 %v6824_v45 }
 0x877   :  { %3789 = vmatpush1.msra.mxu0 %v3740_v10  ;;  %v5918_v10 = vld [vmem:[%s9944_s9 + $0xd8] sm:$0xff] }
 0x878   :  { %3790 = vmatprep.subr.mxu0 %v6824_v45 }
 0x879   :  { %3791 = vmatpush1.msra.mxu0 %v3739_v13  ;;  %v5917_v13 = vld [vmem:[%s9944_s9 + $0xd0] sm:$0xff] }
 0x87a   :  { %3814 = vmatprep.subr.mxu0 %v6824_v45 }
 0x87b   :  { %3815 = vmatpush2.msra.mxu0 %v3759_v15  ;;  %v5916_v15 = vld [vmem:[%s9944_s9 + $0xc8] sm:$0xff] }
 0x87c   :  { %3816 = vmatprep.subr.mxu0 %v6824_v45 }
 0x87d   :  { %3817 = vmatpush2.msra.mxu0 %v3758_v18  ;;  %v5915_v18 = vld [vmem:[%s9944_s9 + $0xc0] sm:$0xff] }
 0x87e   :  { %3818 = vmatprep.subr.mxu0 %v6824_v45 }
 0x87f   :  { %3819 = vmatpush2.msra.mxu0 %v3757_v20  ;;  %v5913_v20 = vld [vmem:[%s9944_s9 + $0xb0] sm:$0xff] }
 0x880   :  { %3820 = vmatprep.subr.mxu0 %v6824_v45 }
 0x881   :  { %3821 = vmatpush2.msra.mxu0 %v3756_v22 }
 0x882   :  { %3822 = vmatprep.subr.mxu0 %v6824_v45 }
 0x883   :  { %3823 = vmatpush2.msra.mxu0 %v3755_v24 }
 0x884   :  { %5939 = vmatprep.subr.msk.mxu0 %vm894_vm3, %v3862_v25 }
 0x912   :  { %v3537_v27 = vpop.f32.mrf.mxu0 }
 0x914   :  { %v3539_v28 = vpop.f32.mrf.mxu0 }
 0x916   :  { %v3543_v29 = vpop.f32.mrf.mxu0 }
 0x918   :  { %v3545_v30 = vpop.f32.mrf.mxu0 }
 0x91a   :  { %v3622_v31 = vpop.f32.mrf.mxu0 }
 0x91b   :  { %v3633_v34 = vmax.f32 %v3537_v27, %v3622_v31 }
 0x91c   :  { %v3624_v32 = vpop.f32.mrf.mxu0 }
 0x91d   :  { %v3634_v33 = vmax.f32 %v3539_v28, %v3624_v32  ;;  %v5989_v32 = vld [vmem:[%s9944_s9 + $0x2b0] sm:$0xf] }
 0x91e   :  { %v3628_v35 = vpop.f32.mrf.mxu0 }
 0x91f   :  { %5909 = vmatprep.mubr.msk.f32.mxu1 %vm1088_vm5, %v3634_v33  ;;  %5911 = vmatprep.mubr.msk.f32.mxu0 %vm1088_vm5, %v3634_v33  ;;  %v3635_v42 = vmax.f32 %v3543_v29, %v3628_v35  ;;  %v5987_v35 = vld [vmem:[%s9944_s9 + $0x2a0] sm:$0xff] }
 0x920   :  { %v3630_v40 = vpop.f32.mrf.mxu0  ;;  %3729 = vmatmul.mubr.f32.vlgmr.msra.gmra.mxu1 %v3633_v34  ;;  %3825 = vmatmul.mubr.f32.vlgmr.msra.gmra.mxu0 %v3633_v34  ;;  %v5988_v34 = vld [vmem:[%s9944_s9 + $0x2a8] sm:$0xff] }
 0x921   :  { %v3636_v41 = vmax.f32 %v3545_v30, %v3630_v40  ;;  %5940 = vmatpush1.msk.msra.mxu0 %vm894_vm3, %v3861_v36  ;;  %5936 = vmatpush1.msk.msra.mxu1 %vm894_vm3, %v5933_v37  ;;  %v5986_v36 = vld [vmem:[%s9944_s9 + $0x298] sm:$0xff]  ;;  %v5963_v37 = vld [vmem:[%s9944_s9 + $0x200] sm:$0xf] }
 0x922   :  { %4000 = vmatprep.subr.mxu0 %v3860_v38  ;;  %3911 = vmatprep.subr.mxu1 %v5932_v39  ;;  %v5985_v38 = vld [vmem:[%s9944_s9 + $0x290] sm:$0xff] }
 0x923   :  { %5910 = vmatprep.mubr.msk.f32.mxu1 %vm1088_vm5, %v3636_v41  ;;  %5912 = vmatprep.mubr.msk.f32.mxu0 %vm1088_vm5, %v3636_v41  ;;  %v5962_v41 = vld [vmem:[%s9944_s9 + $0x1f8] sm:$0xff] }
 0x924   :  { %3734 = vmatmul.mubr.f32.gmra.mxu1 %v3635_v42  ;;  %3830 = vmatmul.mubr.f32.gmra.mxu0 %v3635_v42  ;;  %v5984_v42 = vld [vmem:[%s9944_s9 + $0x288] sm:$0xff] }
 0x925   :  { %4001 = vmatpush1.msra.mxu0 %v3859_v43  ;;  %3912 = vmatpush1.msra.mxu1 %v5931_v44  ;;  %v5961_v43 = vld [vmem:[%s9944_s9 + $0x1f0] sm:$0xff]  ;;  %v5983_v44 = vld [vmem:[%s9944_s9 + $0x280] sm:$0xff] }
 0x926   :  { %4002 = vmatprep.subr.mxu0 %v3858_v46  ;;  %3913 = vmatprep.subr.mxu1 %v5930_v47  ;;  %v5960_v46 = vld [vmem:[%s9944_s9 + $0x1e8] sm:$0xff]  ;;  %v5982_v47 = vld [vmem:[%s9944_s9 + $0x278] sm:$0xff] }
 0x927   :  { %4003 = vmatpush1.msra.mxu0 %v3857_v48  ;;  %3914 = vmatpush1.msra.mxu1 %v5929_v49  ;;  %v5981_v48 = vld [vmem:[%s9944_s9 + $0x270] sm:$0xff]  ;;  %v5959_v49 = vld [vmem:[%s9944_s9 + $0x1e0] sm:$0xff] }
 0x928   :  { %4004 = vmatprep.subr.mxu0 %v3856_v50  ;;  %3915 = vmatprep.subr.mxu1 %v5928_v51  ;;  %v5980_v50 = vld [vmem:[%s9944_s9 + $0x268] sm:$0xff] }
 0x929   :  { %4005 = vmatpush1.msra.mxu0 %v3855_v52  ;;  %3916 = vmatpush1.msra.mxu1 %v5927_v53  ;;  %v5958_v52 = vld [vmem:[%s9944_s9 + $0x1d8] sm:$0xff]  ;;  %v5979_v53 = vld [vmem:[%s9944_s9 + $0x260] sm:$0xff] }
 0x92a   :  { %4006 = vmatprep.subr.mxu0 %v3854_v54  ;;  %4052 = vmatprep.mubr.f32.mxu0 %v6824_v45  ;;  %v5957_v54 = vld [vmem:[%s9944_s9 + $0x1d0] sm:$0xff] }
 0x92b   :  { %4007 = vmatpush1.msra.mxu0 %v3853_v55  ;;  %3963 = vmatprep.mubr.f32.mxu1 %v6824_v45  ;;  %v5978_v55 = vld [vmem:[%s9944_s9 + $0x258] sm:$0xff] }
 0x92c   :  { %4008 = vmatprep.subr.mxu0 %v3852_v56  ;;  %3917 = vmatprep.subr.mxu1 %v5926_v58  ;;  %v5956_v56 = vld [vmem:[%s9944_s9 + $0x1c8] sm:$0xff]  ;;  %v5955_v58 = vld [vmem:[%s9944_s9 + $0x1c0] sm:$0xff] }
 0x92d   :  { %4009 = vmatpush1.msra.mxu0 %v3851_v57  ;;  %3918 = vmatpush1.msra.mxu1 %v5925_v60  ;;  %v5977_v57 = vld [vmem:[%s9944_s9 + $0x250] sm:$0xff]  ;;  %v5954_v60 = vld [vmem:[%s9944_s9 + $0x1b8] sm:$0xff] }
 0x92e   :  { %4010 = vmatprep.subr.mxu0 %v3850_v59  ;;  %3919 = vmatprep.subr.mxu1 %v5924_v62  ;;  %v5976_v59 = vld [vmem:[%s9944_s9 + $0x248] sm:$0xff]  ;;  %v5953_v62 = vld [vmem:[%s9944_s9 + $0x1b0] sm:$0xff] }
 0x92f   :  { %4011 = vmatpush1.msra.mxu0 %v3849_v61  ;;  %3920 = vmatpush1.msra.mxu1 %v5923_v0  ;;  %v5975_v61 = vld [vmem:[%s9944_s9 + $0x240] sm:$0xff]  ;;  %v5952_v0 = vld [vmem:[%s9944_s9 + $0x1a8] sm:$0xff] }
 0x930   :  { %4012 = vmatprep.subr.mxu0 %v3848_v63  ;;  %3921 = vmatprep.subr.mxu1 %v5922_v2  ;;  %v5974_v63 = vld [vmem:[%s9944_s9 + $0x238] sm:$0xff]  ;;  %v5951_v2 = vld [vmem:[%s9944_s9 + $0x1a0] sm:$0xff] }
 0x931   :  { %4013 = vmatpush1.msra.mxu0 %v3847_v1  ;;  %3922 = vmatpush1.msra.mxu1 %v5921_v4  ;;  %v5973_v1 = vld [vmem:[%s9944_s9 + $0x230] sm:$0xff]  ;;  %v5950_v4 = vld [vmem:[%s9944_s9 + $0x198] sm:$0xff] }
 0x932   :  { %4014 = vmatprep.subr.mxu0 %v3846_v3  ;;  %3923 = vmatprep.subr.mxu1 %v5920_v6  ;;  %v5972_v3 = vld [vmem:[%s9944_s9 + $0x228] sm:$0xff]  ;;  %v5949_v6 = vld [vmem:[%s9944_s9 + $0x190] sm:$0xff] }
 0x933   :  { %4015 = vmatpush1.msra.mxu0 %v3845_v5  ;;  %3924 = vmatpush1.msra.mxu1 %v5919_v8  ;;  %v5971_v5 = vld [vmem:[%s9944_s9 + $0x220] sm:$0xff]  ;;  %v5948_v8 = vld [vmem:[%s9944_s9 + $0x188] sm:$0xff] }
 0x934   :  { %4016 = vmatprep.subr.mxu0 %v3844_v7  ;;  %3925 = vmatprep.subr.mxu1 %v5918_v10  ;;  %v5970_v7 = vld [vmem:[%s9944_s9 + $0x218] sm:$0xff]  ;;  %v5947_v10 = vld [vmem:[%s9944_s9 + $0x180] sm:$0xff] }
 0x935   :  { %4017 = vmatpush1.msra.mxu0 %v3843_v9  ;;  %3926 = vmatpush1.msra.mxu1 %v5917_v13  ;;  %v5969_v9 = vld [vmem:[%s9944_s9 + $0x210] sm:$0xff] }
 0x936   :  { %4018 = vmatprep.subr.mxu0 %v3842_v11  ;;  %3927 = vmatprep.subr.mxu1 %v5916_v15  ;;  %v5946_v11 = vld [vmem:[%s9944_s9 + $0x178] sm:$0xff]  ;;  %v5945_v13 = vld [vmem:[%s9944_s9 + $0x170] sm:$0xff]  ;;  %v5944_v15 = vld [vmem:[%s9944_s9 + $0x168] sm:$0xff] }
 0x937   :  { %4019 = vmatpush1.msra.mxu0 %v3841_v14  ;;  %3928 = vmatpush1.msra.mxu1 %v5915_v18  ;;  %v6016_v18 = vld [vmem:[%s9944_s9 + $0x368] sm:$0xf] }
 0x938   :  { %5991 = vmatprep.subr.msk.mxu0 %vm894_vm3, %v5990_v16  ;;  %3929 = vmatprep.subr.mxu1 %v5914_v19  ;;  %v5943_v16 = vld [vmem:[%s9944_s9 + $0x160] sm:$0xff] }
 0x939   :  { %3930 = vmatpush1.msra.mxu1 %v5913_v20 }
 0x93a   :  { %5965 = vmatprep.subr.msk.mxu1 %vm894_vm3, %v5964_v21  ;;  %v6015_v21 = vld [vmem:[%s9944_s9 + $0x360] sm:$0xf] }
 0x9e0   :  { %v3730_v22 = vpop.f32.mrf.mxu1  ;;  %v3826_v23 = vpop.f32.mrf.mxu0 }
 0x9e1   :  { %v3835_v24 = vmax.f32 %v3730_v22, %v3826_v23  ;;  %v6014_v22 = vld [vmem:[%s9944_s9 + $0x358] sm:$0xff]  ;;  %v6013_v23 = vld [vmem:[%s9944_s9 + $0x350] sm:$0xff] }
 0x9e2   :  { %v3732_v25 = vpop.f32.mrf.mxu1  ;;  %v3828_v26 = vpop.f32.mrf.mxu0 }
 0x9e3   :  { %3837 = vst.msk [vmem:[#allocation3] sm:$0xff] %vm1268_vm6, %v3835_v24  ;;  %v6012_v24 = vld [vmem:[%s9944_s9 + $0x348] sm:$0xff]  ;;  %v6011_v25 = vld [vmem:[%s9944_s9 + $0x340] sm:$0xff] }
 0x9e4   :  { %v3735_v27 = vpop.f32.mrf.mxu1  ;;  %v3831_v28 = vpop.f32.mrf.mxu0 }
 0x9e5   :  { %v3836_v29 = vmax.f32 %v3735_v27, %v3831_v28  ;;  %v6010_v27 = vld [vmem:[%s9944_s9 + $0x338] sm:$0xff]  ;;  %v6009_v28 = vld [vmem:[%s9944_s9 + $0x330] sm:$0xff] }
 0x9e6   :  { %v3737_v30 = vpop.f32.mrf.mxu1  ;;  %v3833_v31 = vpop.f32.mrf.mxu0 }
 0x9e7   :  { %3838 = vst.msk [vmem:[#allocation3 + $0x8] sm:$0x3f] %vm1270_vm7, %v3836_v29  ;;  %v6008_v29 = vld [vmem:[%s9944_s9 + $0x328] sm:$0xff]  ;;  %v6007_v30 = vld [vmem:[%s9944_s9 + $0x320] sm:$0xff]  ;;  %v6006_v31 = vld [vmem:[%s9944_s9 + $0x318] sm:$0xff] }
 0x9ea   :  { %v3839_v33 = vld [vmem:[#allocation3] sm:$0xff] }
 0x9eb   :  { %5941 = vmatmul.mubr.msk.f32.vlgmr.msra.gmra.mxu0 %vm1268_vm6, %v3839_v33  ;;  %v6004_v33 = vld [vmem:[%s9944_s9 + $0x308] sm:$0xff] }
 0x9ec   :  { %5992 = vmatpush1.msk.msra.mxu0 %vm894_vm3, %v5989_v32  ;;  %4058 = vmatprep.mubr.f32.mxu0 %v6824_v45  ;;  %v6005_v32 = vld [vmem:[%s9944_s9 + $0x310] sm:$0xff] }
 0x9ed   :  { %4230 = vmatprep.subr.mxu0 %v5988_v34  ;;  %v6003_v34 = vld [vmem:[%s9944_s9 + $0x300] sm:$0xff] }
 0x9ee   :  { %4231 = vmatpush1.msra.mxu0 %v5987_v35  ;;  %v3863_v39 = vld [vmem:[#allocation3 + $0x1] sm:$0xff]  ;;  %v3864_v51 = vld [vmem:[#allocation3 + $0x9] sm:$0x3]  ;;  %v4183_v20 = vld [vmem:[#allocation3 + $0xb] sm:$0x3] }
 0x9ef   :  { %v3840_v40 = vld [vmem:[#allocation3 + $0x8] sm:$0x3]  ;;  %4232 = vmatprep.subr.mxu0 %v5986_v36  ;;  %5937 = vmatmul.mubr.msk.f32.vlgmr.msra.gmra.mxu1 %vm1268_vm6, %v3863_v39  ;;  %v4066_v26 = vld [vmem:[#allocation3 + $0xa] sm:$0x3]  ;;  %v6002_v35 = vld [vmem:[%s9944_s9 + $0x2f8] sm:$0xff] }
 0x9f0   :  { %5942 = vmatmul.mubr.msk.f32.gmra.mxu0 %vm1268_vm6, %v3840_v40  ;;  %5966 = vmatpush1.msk.msra.mxu1 %vm894_vm3, %v5963_v37  ;;  %v4182_v14 = vld [vmem:[#allocation3 + $0x3] sm:$0xff]  ;;  %v6001_v36 = vld [vmem:[%s9944_s9 + $0x2f0] sm:$0xff]  ;;  %v5998_v39 = vld [vmem:[%s9944_s9 + $0x2d8] sm:$0xff] }
 0x9f1   :  { %4233 = vmatpush1.msra.mxu0 %v5985_v38  ;;  %4113 = vmatprep.subr.mxu1 %v5962_v41  ;;  %v4065_v19 = vld [vmem:[#allocation3 + $0x2] sm:$0xff]  ;;  %v5997_v40 = vld [vmem:[%s9944_s9 + $0x2d0] sm:$0xff] }
 0x9f2   :  { %4234 = vmatprep.subr.mxu0 %v5984_v42  ;;  %4114 = vmatpush1.msra.mxu1 %v5961_v43  ;;  %v6000_v37 = vld [vmem:[%s9944_s9 + $0x2e8] sm:$0xff]  ;;  %v5999_v38 = vld [vmem:[%s9944_s9 + $0x2e0] sm:$0xff] }
 0x9f3   :  { %4235 = vmatpush1.msra.mxu0 %v5983_v44  ;;  %3969 = vmatprep.mubr.f32.mxu1 %v6824_v45  ;;  %v5996_v41 = vld [vmem:[%s9944_s9 + $0x2c8] sm:$0xff]  ;;  %v5995_v42 = vld [vmem:[%s9944_s9 + $0x2c0] sm:$0xff]  ;;  %s9986_s9 = sld [smem:[#allocation17_spill]] }
 0x9f4   :  { %4115 = vmatprep.subr.mxu1 %v5960_v46  ;;  %4236 = vmatprep.subr.mxu0 %v5982_v47  ;;  %v4299_v43 = vld [vmem:[#allocation3 + $0x4] sm:$0xff]  ;;  %v4300_v44 = vld [vmem:[#allocation3 + $0xc] sm:$0x3]  ;;  %v4702_v46 = vld [vmem:[%s9949_s14 + $0x78] sm:$0xff] }
 0x9f5   :  { %5938 = vmatmul.mubr.msk.f32.gmra.mxu1 %vm1268_vm6, %v3864_v51  ;;  %4237 = vmatpush1.msra.mxu0 %v5981_v48  ;;  %v4701_v47 = vld [vmem:[%s9949_s14 + $0x70] sm:$0xff]  ;;  %v4700_v48 = vld [vmem:[%s9949_s14 + $0x68] sm:$0xff] }
 0x9f6   :  { %4116 = vmatpush1.msra.mxu1 %v5959_v49  ;;  %4238 = vmatprep.subr.mxu0 %v5980_v50  ;;  %v4699_v49 = vld [vmem:[%s9949_s14 + $0x60] sm:$0xff]  ;;  %v4698_v50 = vld [vmem:[%s9949_s14 + $0x58] sm:$0xff]  ;;  %v4697_v51 = vld [vmem:[%s9949_s14 + $0x50] sm:$0xff] }
 0x9f7   :  { %4117 = vmatprep.subr.mxu1 %v5958_v52  ;;  %4239 = vmatpush1.msra.mxu0 %v5979_v53  ;;  %v4696_v52 = vld [vmem:[%s9949_s14 + $0x48] sm:$0xff]  ;;  %v4695_v53 = vld [vmem:[%s9949_s14 + $0x40] sm:$0xff] }
 0x9f8   :  { %4118 = vmatpush1.msra.mxu1 %v5957_v54  ;;  %4240 = vmatprep.subr.mxu0 %v5978_v55  ;;  %v4694_v54 = vld [vmem:[%s9949_s14 + $0x38] sm:$0xff]  ;;  %v4693_v55 = vld [vmem:[%s9949_s14 + $0x30] sm:$0xff] }
 0x9f9   :  { %4119 = vmatprep.subr.mxu1 %v5956_v56  ;;  %4241 = vmatpush1.msra.mxu0 %v5977_v57  ;;  %v4692_v56 = vld [vmem:[%s9949_s14 + $0x28] sm:$0xff]  ;;  %v4691_v57 = vld [vmem:[%s9949_s14 + $0x20] sm:$0xff] }
 0x9fa   :  { %4120 = vmatpush1.msra.mxu1 %v5955_v58  ;;  %4242 = vmatprep.subr.mxu0 %v5976_v59  ;;  %v4690_v58 = vld [vmem:[%s9949_s14 + $0x18] sm:$0xff]  ;;  %v4689_v59 = vld [vmem:[%s9949_s14 + $0x10] sm:$0xff] }
 0x9fb   :  { %4121 = vmatprep.subr.mxu1 %v5954_v60  ;;  %4243 = vmatpush1.msra.mxu0 %v5975_v61  ;;  %v4688_v60 = vld [vmem:[%s9949_s14 + $0x8] sm:$0xff] }
 0x9fc   :  { %4122 = vmatpush1.msra.mxu1 %v5953_v62  ;;  %4244 = vmatprep.subr.mxu0 %v5974_v63 }
 0x9fd   :  { %4123 = vmatprep.subr.mxu1 %v5952_v0  ;;  %4245 = vmatpush1.msra.mxu0 %v5973_v1 }
 0x9fe   :  { %4124 = vmatpush1.msra.mxu1 %v5951_v2  ;;  %4246 = vmatprep.subr.mxu0 %v5972_v3 }
 0x9ff   :  { %4125 = vmatprep.subr.mxu1 %v5950_v4  ;;  %4247 = vmatpush1.msra.mxu0 %v5971_v5 }
 0xa00   :  { %4126 = vmatpush1.msra.mxu1 %v5949_v6  ;;  %4248 = vmatprep.subr.mxu0 %v5970_v7 }
 0xa01   :  { %4127 = vmatprep.subr.mxu1 %v5948_v8  ;;  %4249 = vmatpush1.msra.mxu0 %v5969_v9 }
 0xa02   :  { %4128 = vmatpush1.msra.mxu1 %v5947_v10  ;;  %4282 = vmatprep.mubr.f32.mxu0 %v6824_v45 }
 0xa03   :  { %4129 = vmatprep.subr.mxu1 %v5946_v11  ;;  %5993 = vmatmul.mubr.msk.f32.vlgmr.msra.gmra.mxu0 %vm1268_vm6, %v4182_v14 }
 0xa04   :  { %4130 = vmatpush1.msra.mxu1 %v5945_v13  ;;  %4165 = vmatprep.mubr.f32.mxu1 %v6824_v45 }
 0xa05   :  { %4131 = vmatprep.subr.mxu1 %v5944_v15  ;;  %4288 = vmatprep.mubr.f32.mxu0 %v6824_v45 }
 0xa06   :  { %4132 = vmatpush1.msra.mxu1 %v5943_v16 }
 0xa07   :  { %5967 = vmatmul.mubr.msk.f32.vlgmr.msra.gmra.mxu1 %vm1268_vm6, %v4065_v19  ;;  %5994 = vmatmul.mubr.msk.f32.gmra.mxu0 %vm1268_vm6, %v4183_v20 }
 0xa08   :  { %6017 = vmatprep.subr.msk.mxu1 %vm894_vm3, %v6016_v18  ;;  %4171 = vmatprep.mubr.f32.mxu1 %v6824_v45 }
 0xa09   :  { %6018 = vmatpush1.msk.msra.mxu1 %vm894_vm3, %v6015_v21  ;;  %4510 = vmatprep.mubr.f32.mxu0 %v6824_v45 }
 0xa0a   :  { %4347 = vmatprep.subr.mxu1 %v6014_v22 }
 0xa0b   :  { %4348 = vmatpush1.msra.mxu1 %v6013_v23 }
 0xa0c   :  { %5968 = vmatmul.mubr.msk.f32.gmra.mxu1 %vm1268_vm6, %v4066_v26  ;;  %4349 = vmatprep.subr.mxu1 %v6012_v24  ;;  %v4416_v24 = vld [vmem:[%s9945_s10] sm:$0x3] }
 0xa0d   :  { %4350 = vmatpush1.msra.mxu1 %v6011_v25  ;;  %4399 = vmatprep.mubr.f32.mxu1 %v6824_v45 }
 0xa0e   :  { %4351 = vmatprep.subr.mxu1 %v6010_v27 }
 0xa0f   :  { %4352 = vmatpush1.msra.mxu1 %v6009_v28 }
 0xa10   :  { %4353 = vmatprep.subr.mxu1 %v6008_v29 }
 0xa11   :  { %4354 = vmatpush1.msra.mxu1 %v6007_v30 }
 0xa12   :  { %4355 = vmatprep.subr.mxu1 %v6006_v31  ;;  %v4425_v31 = vrot.slane %v4416_v24, %v7411_v17  ;;  %v4436_v17 = vld [vmem:[%s9946_s11] sm:$0x1f] }
 0xa13   :  { %4356 = vmatpush1.msra.mxu1 %v6005_v32 }
 0xa14   :  { %4357 = vmatprep.subr.mxu1 %v6004_v33 }
 0xa15   :  { %4358 = vmatpush1.msra.mxu1 %v6003_v34 }
 0xa16   :  { %4359 = vmatprep.subr.mxu1 %v6002_v35  ;;  %v4421_v35 = vrot.slane %v4416_v24, %v7406_v12  ;;  %v4517_v12 = vld [vmem:[%s9947_s12] sm:$0x1f]  ;;  %v6034_v24 = vld [vmem:[%s9950_s15 + $0x78] sm:$0xff] }
 0xa17   :  { %4360 = vmatpush1.msra.mxu1 %v6001_v36 }
 0xa18   :  { %4361 = vmatprep.subr.mxu1 %v6000_v37 }
 0xa19   :  { %4362 = vmatpush1.msra.mxu1 %v5999_v38 }
 0xa1a   :  { %4363 = vmatprep.subr.mxu1 %v5998_v39 }
 0xa1b   :  { %4364 = vmatpush1.msra.mxu1 %v5997_v40 }
 0xa1c   :  { %4365 = vmatprep.subr.mxu1 %v5996_v41 }
 0xa1d   :  { %4366 = vmatpush1.msra.mxu1 %v5995_v42 }
 0xa1e   :  { %6019 = vmatmul.mubr.msk.f32.vlgmr.msra.gmra.mxu1 %vm1268_vm6, %v4299_v43  ;;  %4707 = vmatprep.subr.mxu1 %v6824_v45 }
 0xa1f   :  { %4405 = vmatprep.mubr.f32.mxu1 %v6824_v45  ;;  %4708 = vmatpush1.msra.mxu1 %v4702_v46 }
 0xa20   :  { %4709 = vmatprep.subr.mxu1 %v6824_v45 }
 0xa21   :  { %4710 = vmatpush1.msra.mxu1 %v4701_v47  ;;  %v4609_v47 = vld [vmem:[%s9948_s13 + $0x78] sm:$0xff] }
 0xa22   :  { %6020 = vmatmul.mubr.msk.f32.gmra.mxu1 %vm1268_vm6, %v4300_v44  ;;  %4711 = vmatprep.subr.mxu1 %v6824_v45 }
 0xa23   :  { %4712 = vmatpush1.msra.mxu1 %v4700_v48  ;;  %v4608_v48 = vld [vmem:[%s9948_s13 + $0x70] sm:$0xff] }
 0xa24   :  { %4713 = vmatprep.subr.mxu1 %v6824_v45 }
 0xa25   :  { %4714 = vmatpush1.msra.mxu1 %v4699_v49  ;;  %v4607_v49 = vld [vmem:[%s9948_s13 + $0x68] sm:$0xff] }
 0xa26   :  { %4715 = vmatprep.subr.mxu1 %v6824_v45 }
 0xa27   :  { %4716 = vmatpush1.msra.mxu1 %v4698_v50  ;;  %v4606_v50 = vld [vmem:[%s9948_s13 + $0x60] sm:$0xff] }
 0xa28   :  { %4717 = vmatprep.subr.mxu1 %v6824_v45 }
 0xa29   :  { %4718 = vmatpush1.msra.mxu1 %v4697_v51  ;;  %v4605_v51 = vld [vmem:[%s9948_s13 + $0x58] sm:$0xff] }
 0xa2a   :  { %4719 = vmatprep.subr.mxu1 %v6824_v45 }
 0xa2b   :  { %4720 = vmatpush1.msra.mxu1 %v4696_v52  ;;  %v4604_v52 = vld [vmem:[%s9948_s13 + $0x50] sm:$0xff] }
 0xa2c   :  { %4721 = vmatprep.subr.mxu1 %v6824_v45 }
 0xa2d   :  { %4722 = vmatpush1.msra.mxu1 %v4695_v53  ;;  %v4603_v53 = vld [vmem:[%s9948_s13 + $0x48] sm:$0xff] }
 0xa2e   :  { %4723 = vmatprep.subr.mxu1 %v6824_v45 }
 0xa2f   :  { %4724 = vmatpush1.msra.mxu1 %v4694_v54  ;;  %v4602_v54 = vld [vmem:[%s9948_s13 + $0x40] sm:$0xff] }
 0xa30   :  { %4725 = vmatprep.subr.mxu1 %v6824_v45 }
 0xa31   :  { %4726 = vmatpush1.msra.mxu1 %v4693_v55  ;;  %v4601_v55 = vld [vmem:[%s9948_s13 + $0x38] sm:$0xff] }
 0xa32   :  { %4727 = vmatprep.subr.mxu1 %v6824_v45 }
 0xa33   :  { %4728 = vmatpush1.msra.mxu1 %v4692_v56  ;;  %v4600_v56 = vld [vmem:[%s9948_s13 + $0x30] sm:$0xff] }
 0xa34   :  { %4729 = vmatprep.subr.mxu1 %v6824_v45 }
 0xa35   :  { %4730 = vmatpush1.msra.mxu1 %v4691_v57  ;;  %v4599_v57 = vld [vmem:[%s9948_s13 + $0x28] sm:$0xff] }
 0xa36   :  { %4731 = vmatprep.subr.mxu1 %v6824_v45 }
 0xa37   :  { %4732 = vmatpush1.msra.mxu1 %v4690_v58  ;;  %v4598_v58 = vld [vmem:[%s9948_s13 + $0x20] sm:$0xff] }
 0xa38   :  { %4733 = vmatprep.subr.mxu1 %v6824_v45 }
 0xa39   :  { %4734 = vmatpush1.msra.mxu1 %v4689_v59  ;;  %v4597_v59 = vld [vmem:[%s9948_s13 + $0x18] sm:$0xff] }
 0xa3a   :  { %4735 = vmatprep.subr.mxu1 %v6824_v45 }
 0xa3b   :  { %4736 = vmatpush1.msra.mxu1 %v4688_v60  ;;  %v4596_v60 = vld [vmem:[%s9948_s13 + $0x10] sm:$0xff] }
 0xa3c   :  { %4737 = vmatprep.subr.mxu1 %v6824_v45 }
 0xaab   :  { %v4054_v63 = vpop.f32.mrf.mxu0 }
 0xaad   :  { %v4056_v1 = vpop.f32.mrf.mxu0 }
 0xaaf   :  { %v3965_v61 = vpop.f32.mrf.mxu1 }
 0xab0   :  { %v4060_v3 = vpop.f32.mrf.mxu0  ;;  %v4055_v13 = vadd.f32 %v4054_v63, %v3965_v61  ;;  %v4595_v61 = vld [vmem:[%s9948_s13 + $0x8] sm:$0xff]  ;;  %v4687_v63 = vld [vmem:[%s9949_s14] sm:$0xff] }
 0xab1   :  { %v3967_v62 = vpop.f32.mrf.mxu1  ;;  %4738 = vmatpush1.msra.mxu1 %v4687_v63 }
 0xab2   :  { %v4062_v5 = vpop.f32.mrf.mxu0  ;;  %v4057_v10 = vadd.f32 %v4056_v1, %v3967_v62  ;;  %v4594_v62 = vld [vmem:[%s9948_s13] sm:$0xff]  ;;  %4763 = vmatprep.subr.mxu1 %v6824_v45  ;;  %v4706_v1 = vld [vmem:[%s9949_s14 + $0x98] sm:$0xff] }
 0xab3   :  { %4764 = vmatpush2.msra.mxu1 %v4706_v1  ;;  %v6071_v1 = vld [vmem:[%s9950_s15 + $0x180] sm:$0xff] }
 0xab4   :  { %4765 = vmatprep.subr.mxu1 %v6824_v45 }
 0xab5   :  { %v3971_v0 = vpop.f32.mrf.mxu1 }
 0xab6   :  { %v4061_v11 = vadd.f32 %v4060_v3, %v3971_v0  ;;  %v4613_v0 = vld [vmem:[%s9948_s13 + $0x98] sm:$0xff]  ;;  %v4705_v3 = vld [vmem:[%s9949_s14 + $0x90] sm:$0xff] }
 0xab7   :  { %v3973_v2 = vpop.f32.mrf.mxu1  ;;  %4766 = vmatpush2.msra.mxu1 %v4705_v3  ;;  %v6069_v3 = vld [vmem:[%s9950_s15 + $0x170] sm:$0xff] }
 0xab8   :  { %v4063_v15 = vadd.f32 %v4062_v5, %v3973_v2  ;;  %v4612_v2 = vld [vmem:[%s9948_s13 + $0x90] sm:$0xff]  ;;  %4767 = vmatprep.subr.mxu1 %v6824_v45  ;;  %v4704_v5 = vld [vmem:[%s9949_s14 + $0x88] sm:$0xff] }
 0xab9   :  { %4768 = vmatpush2.msra.mxu1 %v4704_v5  ;;  %v6067_v5 = vld [vmem:[%s9950_s15 + $0x160] sm:$0xff] }
 0xaba   :  { %4769 = vmatprep.subr.mxu1 %v6824_v45 }
 0xac3   :  { %v4284_v7 = vpop.f32.mrf.mxu0 }
 0xac5   :  { %v4286_v9 = vpop.f32.mrf.mxu0 }
 0xac7   :  { %v4167_v4 = vpop.f32.mrf.mxu1  ;;  %v4290_v20 = vpop.f32.mrf.mxu0 }
 0xac8   :  { %v4178_v19 = vadd.f32 %v4167_v4, %v4055_v13  ;;  %v4611_v4 = vld [vmem:[%s9948_s13 + $0x88] sm:$0xff] }
 0xac9   :  { %v4169_v6 = vpop.f32.mrf.mxu1  ;;  %v4292_v27 = vpop.f32.mrf.mxu0 }
 0xaca   :  { %v4179_v16 = vadd.f32 %v4169_v6, %v4057_v10  ;;  %v4295_v28 = vadd.f32 %v4284_v7, %v4178_v19  ;;  %v4610_v6 = vld [vmem:[%s9948_s13 + $0x80] sm:$0xff] }
 0xacb   :  { %v4703_v7 = vld [vmem:[%s9949_s14 + $0x80] sm:$0xff] }
 0xacc   :  { %v4173_v8 = vpop.f32.mrf.mxu1  ;;  %v4296_v25 = vadd.f32 %v4286_v9, %v4179_v16  ;;  %4770 = vmatpush2.msra.mxu1 %v4703_v7  ;;  %v4789_v16 = vld [vmem:[%s9950_s15 + $0x48] sm:$0xff]  ;;  %v4788_v19 = vld [vmem:[%s9950_s15 + $0x40] sm:$0xff]  ;;  %v6065_v7 = vld [vmem:[%s9950_s15 + $0x150] sm:$0xff] }
 0xacd   :  { %v4180_v18 = vadd.f32 %v4173_v8, %v4061_v11  ;;  %6638 = vmatprep.subr.mxu1 %v6824_v45 }
 0xace   :  { %v4175_v14 = vpop.f32.mrf.mxu1 }
 0xacf   :  { %v4181_v22 = vadd.f32 %v4175_v14, %v4063_v15  ;;  %v4297_v26 = vadd.f32 %v4290_v20, %v4180_v18  ;;  %v6038_v15 = vld [vmem:[%s9950_s15 + $0x98] sm:$0xff]  ;;  %v6037_v18 = vld [vmem:[%s9950_s15 + $0x90] sm:$0xff]  ;;  %v6036_v20 = vld [vmem:[%s9950_s15 + $0x88] sm:$0xff] }
 0xad1   :  { %v4298_v33 = vadd.f32 %v4292_v27, %v4181_v22  ;;  %v6035_v22 = vld [vmem:[%s9950_s15 + $0x80] sm:$0xff] }
 0xad2   :  { %v4784_v27 = vld [vmem:[%s9950_s15 + $0x20] sm:$0xff] }
 0xade   :  { %v4401_v21 = vpop.f32.mrf.mxu1 }
 0xadf   :  { %v4412_v34 = vadd.f32 %v4401_v21, %v4295_v28  ;;  %v4787_v21 = vld [vmem:[%s9950_s15 + $0x38] sm:$0xff]  ;;  %v6032_v28 = vld [vmem:[%s9950_s15 + $0x68] sm:$0xff] }
 0xae0   :  { %v4403_v23 = vpop.f32.mrf.mxu1 }
 0xae1   :  { %v4413_v30 = vadd.f32 %v4403_v23, %v4296_v25  ;;  %v4428_v41 = vadd.f32 %v4421_v35, %v4412_v34  ;;  %v4786_v23 = vld [vmem:[%s9950_s15 + $0x30] sm:$0xff]  ;;  %v4785_v25 = vld [vmem:[%s9950_s15 + $0x28] sm:$0xff] }
 0xae2   :  { %v4407_v29 = vpop.f32.mrf.mxu1  ;;  %v6029_v34 = vld [vmem:[%s9950_s15 + $0x50] sm:$0xff] }
 0xae3   :  { %v4414_v32 = vadd.f32 %v4407_v29, %v4297_v26  ;;  %v4429_v39 = vadd.f32 %v4425_v31, %v4413_v30  ;;  %v4432_v46 = vmax.f32 %v4428_v41, 0.0  ;;  %v6033_v26 = vld [vmem:[%s9950_s15 + $0x70] sm:$0xff]  ;;  %v4783_v29 = vld [vmem:[%s9950_s15 + $0x18] sm:$0xff]  ;;  %v6031_v30 = vld [vmem:[%s9950_s15 + $0x60] sm:$0xff] }
 0xae4   :  { %v4409_v36 = vpop.f32.mrf.mxu1  ;;  %v6050_v41 = vld [vmem:[%s9950_s15 + $0xe8] sm:$0xff] }
 0xae5   :  { %v4415_v37 = vadd.f32 %v4409_v36, %v4298_v33  ;;  %v4430_v38 = vadd.f32 %v4421_v35, %v4414_v32  ;;  %v4433_v44 = vmax.f32 %v4429_v39, 0.0  ;;  %v6030_v32 = vld [vmem:[%s9950_s15 + $0x58] sm:$0xff]  ;;  %v4781_v33 = vld [vmem:[%s9950_s15 + $0x8] sm:$0xff]  ;;  %v4780_v35 = vld [vmem:[%s9950_s15] sm:$0xff] }
 0xae7   :  { %v4431_v40 = vadd.f32 %v4425_v31, %v4415_v37  ;;  %v4434_v43 = vmax.f32 %v4430_v38, 0.0  ;;  %v4782_v31 = vld [vmem:[%s9950_s15 + $0x10] sm:$0xff] }
 0xae9   :  { %v4435_v42 = vmax.f32 %v4431_v40, 0.0 }
 0xaeb   :  { %6021 = vmatprep.subr.msk.mxu0 %vm1878_vm8, %v4435_v42 }
 0xaec   :  { %6022 = vmatpush1.msk.msra.mxu0 %vm1878_vm8, %v4434_v43 }
 0xaed   :  { %4476 = vmatprep.subr.mxu0 %v4433_v44 }
 0xaee   :  { %4477 = vmatpush1.msra.mxu0 %v4432_v46 }
 0xaef   :  { %6023 = vmatmul.mubr.msk.f32.vlgmr.msra.gmra.mxu0 %vm1874_vm9, %v4436_v17  ;;  %6024 = vmatprep.subr.msk.mxu0 %vm1878_vm8, %v4435_v42  ;;  %v6061_v42 = vld [vmem:[%s9950_s15 + $0x138] sm:$0xff]  ;;  %v6060_v17 = vld [vmem:[%s9950_s15 + $0x130] sm:$0xff] }
 0xaf0   :  { %6025 = vmatpush1.msk.msra.mxu0 %vm1878_vm8, %v4434_v43  ;;  %4585 = vmatprep.mubr.f32.mxu0 %v6824_v45 }
 0xaf1   :  { %4551 = vmatprep.subr.mxu0 %v4433_v44 }
 0xaf2   :  { %4552 = vmatpush1.msra.mxu0 %v4432_v46  ;;  %v6049_v46 = vld [vmem:[%s9950_s15 + $0xe0] sm:$0xff] }
 0xaf3   :  { %6026 = vmatmul.mubr.msk.f32.vlgmr.msra.gmra.mxu0 %vm1874_vm9, %v4517_v12  ;;  %4617 = vmatprep.subr.mxu0 %v6824_v45  ;;  %v6048_v12 = vld [vmem:[%s9950_s15 + $0xd8] sm:$0xff] }
 0xaf4   :  { %4618 = vmatpush1.msra.mxu0 %v4609_v47  ;;  %v6059_v47 = vld [vmem:[%s9950_s15 + $0x128] sm:$0xff] }
 0xaf5   :  { %4619 = vmatprep.subr.mxu0 %v6824_v45 }
 0xaf6   :  { %4620 = vmatpush1.msra.mxu0 %v4608_v48  ;;  %v6047_v48 = vld [vmem:[%s9950_s15 + $0xd0] sm:$0xff] }
 0xaf7   :  { %4621 = vmatprep.subr.mxu0 %v6824_v45 }
 0xaf8   :  { %4622 = vmatpush1.msra.mxu0 %v4607_v49  ;;  %v6058_v49 = vld [vmem:[%s9950_s15 + $0x120] sm:$0xff] }
 0xaf9   :  { %4623 = vmatprep.subr.mxu0 %v6824_v45 }
 0xafa   :  { %4624 = vmatpush1.msra.mxu0 %v4606_v50  ;;  %v6046_v50 = vld [vmem:[%s9950_s15 + $0xc8] sm:$0xff] }
 0xafb   :  { %4625 = vmatprep.subr.mxu0 %v6824_v45 }
 0xafc   :  { %4626 = vmatpush1.msra.mxu0 %v4605_v51  ;;  %v6057_v51 = vld [vmem:[%s9950_s15 + $0x118] sm:$0xff] }
 0xafd   :  { %4627 = vmatprep.subr.mxu0 %v6824_v45 }
 0xafe   :  { %4628 = vmatpush1.msra.mxu0 %v4604_v52  ;;  %v6045_v52 = vld [vmem:[%s9950_s15 + $0xc0] sm:$0xff] }
 0xaff   :  { %4629 = vmatprep.subr.mxu0 %v6824_v45 }
 0xb00   :  { %4630 = vmatpush1.msra.mxu0 %v4603_v53  ;;  %v6056_v53 = vld [vmem:[%s9950_s15 + $0x110] sm:$0xff] }
 0xb01   :  { %4631 = vmatprep.subr.mxu0 %v6824_v45 }
 0xb02   :  { %4632 = vmatpush1.msra.mxu0 %v4602_v54  ;;  %v6044_v54 = vld [vmem:[%s9950_s15 + $0xb8] sm:$0xff] }
 0xb03   :  { %4633 = vmatprep.subr.mxu0 %v6824_v45 }
 0xb04   :  { %4634 = vmatpush1.msra.mxu0 %v4601_v55  ;;  %v6055_v55 = vld [vmem:[%s9950_s15 + $0x108] sm:$0xff] }
 0xb05   :  { %4635 = vmatprep.subr.mxu0 %v6824_v45 }
 0xb06   :  { %4636 = vmatpush1.msra.mxu0 %v4600_v56  ;;  %v6043_v56 = vld [vmem:[%s9950_s15 + $0xb0] sm:$0xff] }
 0xb07   :  { %4637 = vmatprep.subr.mxu0 %v6824_v45 }
 0xb08   :  { %4638 = vmatpush1.msra.mxu0 %v4599_v57  ;;  %v6054_v57 = vld [vmem:[%s9950_s15 + $0x100] sm:$0xff] }
 0xb09   :  { %4639 = vmatprep.subr.mxu0 %v6824_v45 }
 0xb0a   :  { %4640 = vmatpush1.msra.mxu0 %v4598_v58  ;;  %v6042_v58 = vld [vmem:[%s9950_s15 + $0xa8] sm:$0xff] }
 0xb0b   :  { %4641 = vmatprep.subr.mxu0 %v6824_v45 }
 0xb0c   :  { %4642 = vmatpush1.msra.mxu0 %v4597_v59  ;;  %v6053_v59 = vld [vmem:[%s9950_s15 + $0xf8] sm:$0xff] }
 0xb0d   :  { %4643 = vmatprep.subr.mxu0 %v6824_v45 }
 0xb0e   :  { %4644 = vmatpush1.msra.mxu0 %v4596_v60  ;;  %v6041_v60 = vld [vmem:[%s9950_s15 + $0xa0] sm:$0xff] }
 0xb0f   :  { %4645 = vmatprep.subr.mxu0 %v6824_v45 }
 0xb10   :  { %4646 = vmatpush1.msra.mxu0 %v4595_v61  ;;  %v6052_v61 = vld [vmem:[%s9950_s15 + $0xf0] sm:$0xff] }
 0xb11   :  { %4647 = vmatprep.subr.mxu0 %v6824_v45 }
 0xb12   :  { %4648 = vmatpush1.msra.mxu0 %v4594_v62 }
 0xb13   :  { %4673 = vmatprep.subr.mxu0 %v6824_v45 }
 0xb14   :  { %4674 = vmatpush2.msra.mxu0 %v4613_v0  ;;  %v6072_v0 = vld [vmem:[%s9950_s15 + $0x188] sm:$0xff] }
 0xb15   :  { %4675 = vmatprep.subr.mxu0 %v6824_v45 }
 0xb16   :  { %4676 = vmatpush2.msra.mxu0 %v4612_v2  ;;  %v6070_v2 = vld [vmem:[%s9950_s15 + $0x178] sm:$0xff] }
 0xb17   :  { %4677 = vmatprep.subr.mxu0 %v6824_v45 }
 0xb18   :  { %4678 = vmatpush2.msra.mxu0 %v4611_v4  ;;  %v6068_v4 = vld [vmem:[%s9950_s15 + $0x168] sm:$0xff] }
 0xb19   :  { %4679 = vmatprep.subr.mxu0 %v6824_v45 }
 0xb1a   :  { %4680 = vmatpush2.msra.mxu0 %v4610_v6  ;;  %v6066_v6 = vld [vmem:[%s9950_s15 + $0x158] sm:$0xff] }
 0xb1b   :  { %6615 = vmatprep.subr.mxu0 %v6824_v45 }
 0xbaf   :  { %v4512_v8 = vpop.f32.mrf.mxu0 }
 0xbb1   :  { %v4514_v9 = vpop.f32.mrf.mxu0 }
 0xbb3   :  { %v4587_v10 = vpop.f32.mrf.mxu0 }
 0xbb4   :  { %v4592_v14 = vmax.f32 %v4512_v8, %v4587_v10  ;;  %v6064_v8 = vld [vmem:[%s9950_s15 + $0x148] sm:$0xff] }
 0xbb5   :  { %v4589_v11 = vpop.f32.mrf.mxu0 }
 0xbb6   :  { %v4593_v13 = vmax.f32 %v4514_v9, %v4589_v11  ;;  %v6063_v9 = vld [vmem:[%s9950_s15 + $0x140] sm:$0xff]  ;;  %v5210_v11 = vld [vmem:[%s9952_s17 + $0x18] sm:$0xff] }
 0xbb8   :  { %6027 = vmatprep.mubr.msk.f32.mxu0 %vm2053_vm10, %v4593_v13  ;;  %6028 = vmatprep.mubr.msk.f32.mxu1 %vm2053_vm10, %v4593_v13  ;;  %v5209_v13 = vld [vmem:[%s9952_s17 + $0x10] sm:$0xff] }
 0xbb9   :  { %4682 = vmatmul.mubr.f32.vlgmr.msra.gmra.mxu0 %v4592_v14  ;;  %4772 = vmatmul.mubr.f32.vlgmr.msra.gmra.mxu1 %v4592_v14  ;;  %v5208_v14 = vld [vmem:[%s9952_s17 + $0x8] sm:$0xff] }
 0xbba   :  { %6616 = vmatpush3.msra.mxu0 %v6038_v15  ;;  %6639 = vmatpush3.msra.mxu1 %v4789_v16  ;;  %v5207_v15 = vld [vmem:[%s9952_s17] sm:$0xff] }
 0xbbb   :  { %6617 = vmatprep.subr.mxu0 %v6824_v45  ;;  %6640 = vmatprep.subr.mxu1 %v6824_v45 }
 0xbbc   :  { %6618 = vmatpush3.msra.mxu0 %v6037_v18  ;;  %6641 = vmatpush3.msra.mxu1 %v4788_v19 }
 0xbbd   :  { %6619 = vmatprep.subr.mxu0 %v6824_v45  ;;  %6642 = vmatprep.subr.mxu1 %v6824_v45 }
 0xbbe   :  { %6620 = vmatpush3.msra.mxu0 %v6036_v20  ;;  %6643 = vmatpush3.msra.mxu1 %v4787_v21 }
 0xbbf   :  { %6621 = vmatprep.subr.mxu0 %v6824_v45  ;;  %6644 = vmatprep.subr.mxu1 %v6824_v45 }
 0xbc0   :  { %6622 = vmatpush3.msra.mxu0 %v6035_v22  ;;  %6645 = vmatpush3.msra.mxu1 %v4786_v23 }
 0xbc1   :  { %6623 = vmatprep.subr.mxu0 %v6824_v45  ;;  %6646 = vmatprep.subr.mxu1 %v6824_v45 }
 0xbc2   :  { %6624 = vmatpush3.msra.mxu0 %v6034_v24  ;;  %6647 = vmatpush3.msra.mxu1 %v4785_v25 }
 0xbc3   :  { %6625 = vmatprep.subr.mxu0 %v6824_v45  ;;  %6648 = vmatprep.subr.mxu1 %v6824_v45 }
 0xbc4   :  { %6635 = vmatprep.mubr.msk.f32.mxu0 %vm6825_vm11, %v6824_v45  ;;  %6658 = vmatprep.mubr.msk.f32.mxu1 %vm6825_vm11, %v6824_v45 }
 0xbc5   :  { %6626 = vmatpush3.msra.mxu0 %v6033_v26  ;;  %6649 = vmatpush3.msra.mxu1 %v4784_v27 }
 0xbc6   :  { %6627 = vmatprep.subr.mxu0 %v6824_v45  ;;  %6650 = vmatprep.subr.mxu1 %v6824_v45 }
 0xbc7   :  { %6628 = vmatpush3.msra.mxu0 %v6032_v28  ;;  %6651 = vmatpush3.msra.mxu1 %v4783_v29  ;;  %v5202_v29 = vld [vmem:[%s9951_s16] sm:$0x1] }
 0xbc8   :  { %6629 = vmatprep.subr.mxu0 %v6824_v45  ;;  %6652 = vmatprep.subr.mxu1 %v6824_v45 }
 0xbc9   :  { %6630 = vmatpush3.msra.mxu0 %v6031_v30  ;;  %6653 = vmatpush3.msra.mxu1 %v4782_v31 }
 0xbca   :  { %6631 = vmatprep.subr.mxu0 %v6824_v45  ;;  %6654 = vmatprep.subr.mxu1 %v6824_v45 }
 0xbcb   :  { %6632 = vmatpush3.msra.mxu0 %v6030_v32  ;;  %6655 = vmatpush3.msra.mxu1 %v4781_v33 }
 0xbcc   :  { %6633 = vmatprep.subr.mxu0 %v6824_v45  ;;  %6656 = vmatprep.subr.mxu1 %v6824_v45 }
 0xbcd   :  { %6634 = vmatpush3.msra.mxu0 %v6029_v34  ;;  %6657 = vmatpush3.msra.mxu1 %v4780_v35  ;;  %v5306_v34 = vld [vmem:[%s9954_s19 + $0x70] sm:$0xff] }
 0xbce   :  { %6661 = vmatprep.subr.mxu0 %v6824_v45  ;;  %6684 = vmatprep.subr.mxu1 %v6824_v45 }
 0xc79   :  { %v4683_v36 = vpop.f32.mrf.mxu0  ;;  %v4773_v37 = vpop.f32.mrf.mxu1 }
 0xc7a   :  { %v4777_v38 = vmax.f32 %v4683_v36, %v4773_v37  ;;  %v5305_v36 = vld [vmem:[%s9954_s19 + $0x68] sm:$0xff]  ;;  %v5304_v37 = vld [vmem:[%s9954_s19 + $0x60] sm:$0xff] }
 0xc7b   :  { %v4685_v39 = vpop.f32.mrf.mxu0  ;;  %v4775_v40 = vpop.f32.mrf.mxu1 }
 0xc7c   :  { %4778 = vst.msk [vmem:[#allocation4] sm:$0x1f] %vm2218_vm12, %v4777_v38  ;;  %v5303_v38 = vld [vmem:[%s9954_s19 + $0x58] sm:$0xff]  ;;  %v5302_v39 = vld [vmem:[%s9954_s19 + $0x50] sm:$0xff]  ;;  %v5301_v40 = vld [vmem:[%s9954_s19 + $0x48] sm:$0xff] }
 0xc83   :  { %v4790_v43 = vld [vmem:[#allocation4 + $0x1] sm:$0x1]  ;;  %v4779_v44 = vld [vmem:[#allocation4] sm:$0x1]  ;;  %v4947_v62 = vld [vmem:[#allocation4 + $0x2] sm:$0x1] }
 0xc84   :  { %6636 = vmatmul.mubr.msk.f32.vlgmr.msra.gmra.mxu0 %vm2243_vm13, %v4790_v43  ;;  %6659 = vmatmul.mubr.msk.f32.vlgmr.msra.gmra.mxu1 %vm2243_vm13, %v4779_v44  ;;  %v5032_v63 = vld [vmem:[#allocation4 + $0x3] sm:$0x1]  ;;  %v5117_v10 = vld [vmem:[#allocation4 + $0x4] sm:$0x1]  ;;  %v5297_v44 = vld [vmem:[%s9954_s19 + $0x28] sm:$0xff] }
 0xc85   :  { %6662 = vmatpush3.msra.mxu0 %v6050_v41  ;;  %6685 = vmatpush3.msra.mxu1 %v6061_v42  ;;  %v5300_v41 = vld [vmem:[%s9954_s19 + $0x40] sm:$0xff]  ;;  %v5299_v42 = vld [vmem:[%s9954_s19 + $0x38] sm:$0xff]  ;;  %v5298_v43 = vld [vmem:[%s9954_s19 + $0x30] sm:$0xff] }
 0xc86   :  { %6663 = vmatprep.subr.mxu0 %v6824_v45  ;;  %6686 = vmatprep.subr.mxu1 %v6824_v45 }
 0xc87   :  { %6664 = vmatpush3.msra.mxu0 %v6049_v46  ;;  %6687 = vmatpush3.msra.mxu1 %v6060_v17  ;;  %v5296_v46 = vld [vmem:[%s9954_s19 + $0x20] sm:$0xff]  ;;  %v5295_v17 = vld [vmem:[%s9954_s19 + $0x18] sm:$0xff] }
 0xc88   :  { %6665 = vmatprep.subr.mxu0 %v6824_v45  ;;  %6688 = vmatprep.subr.mxu1 %v6824_v45 }
 0xc89   :  { %6666 = vmatpush3.msra.mxu0 %v6048_v12  ;;  %6689 = vmatpush3.msra.mxu1 %v6059_v47  ;;  %v5294_v12 = vld [vmem:[%s9954_s19 + $0x10] sm:$0xff]  ;;  %v5293_v47 = vld [vmem:[%s9954_s19 + $0x8] sm:$0xff] }
 0xc8a   :  { %6667 = vmatprep.subr.mxu0 %v6824_v45  ;;  %6690 = vmatprep.subr.mxu1 %v6824_v45 }
 0xc8b   :  { %6668 = vmatpush3.msra.mxu0 %v6047_v48  ;;  %6691 = vmatpush3.msra.mxu1 %v6058_v49  ;;  %v5292_v48 = vld [vmem:[%s9954_s19] sm:$0xff]  ;;  %v5398_v49 = vld [vmem:[%s9956_s21 + $0x50] sm:$0xf] }
 0xc8c   :  { %6669 = vmatprep.subr.mxu0 %v6824_v45  ;;  %6692 = vmatprep.subr.mxu1 %v6824_v45 }
 0xc8d   :  { %6670 = vmatpush3.msra.mxu0 %v6046_v50  ;;  %6693 = vmatpush3.msra.mxu1 %v6057_v51  ;;  %v5397_v50 = vld [vmem:[%s9956_s21 + $0x48] sm:$0xff]  ;;  %v5396_v51 = vld [vmem:[%s9956_s21 + $0x40] sm:$0xff] }
 0xc8e   :  { %6671 = vmatprep.subr.mxu0 %v6824_v45  ;;  %6694 = vmatprep.subr.mxu1 %v6824_v45 }
 0xc8f   :  { %6672 = vmatpush3.msra.mxu0 %v6045_v52  ;;  %6695 = vmatpush3.msra.mxu1 %v6056_v53  ;;  %v5395_v52 = vld [vmem:[%s9956_s21 + $0x38] sm:$0xff]  ;;  %v5394_v53 = vld [vmem:[%s9956_s21 + $0x30] sm:$0xff] }
 0xc90   :  { %6673 = vmatprep.subr.mxu0 %v6824_v45  ;;  %6696 = vmatprep.subr.mxu1 %v6824_v45 }
 0xc91   :  { %6674 = vmatpush3.msra.mxu0 %v6044_v54  ;;  %6697 = vmatpush3.msra.mxu1 %v6055_v55  ;;  %v5393_v54 = vld [vmem:[%s9956_s21 + $0x28] sm:$0xff]  ;;  %v5392_v55 = vld [vmem:[%s9956_s21 + $0x20] sm:$0xff] }
 0xc92   :  { %6675 = vmatprep.subr.mxu0 %v6824_v45  ;;  %6698 = vmatprep.subr.mxu1 %v6824_v45 }
 0xc93   :  { %6676 = vmatpush3.msra.mxu0 %v6043_v56  ;;  %6699 = vmatpush3.msra.mxu1 %v6054_v57  ;;  %v5391_v56 = vld [vmem:[%s9956_s21 + $0x18] sm:$0xff]  ;;  %v6074_v57 = vld [vmem:[%s9953_s18] ss:$0 sm:$0xff] }
 0xc94   :  { %6677 = vmatprep.subr.mxu0 %v6824_v45  ;;  %6700 = vmatprep.subr.mxu1 %v6824_v45 }
 0xc95   :  { %6678 = vmatpush3.msra.mxu0 %v6042_v58  ;;  %6701 = vmatpush3.msra.mxu1 %v6053_v59 }
 0xc96   :  { %6679 = vmatprep.subr.mxu0 %v6824_v45  ;;  %6702 = vmatprep.subr.mxu1 %v6824_v45 }
 0xc97   :  { %6680 = vmatpush3.msra.mxu0 %v6041_v60  ;;  %6681 = vmatprep.mubr.msk.f32.mxu0 %vm6825_vm11, %v6824_v45 }
 0xc98   :  { %6703 = vmatpush3.msra.mxu1 %v6052_v61  ;;  %6704 = vmatprep.mubr.msk.f32.mxu1 %vm6825_vm11, %v6824_v45 }
 0xc99   :  { %6682 = vmatmul.mubr.msk.f32.vlgmr.msra.gmra.mxu0 %vm2243_vm13, %v4947_v62  ;;  %6705 = vmatmul.mubr.msk.f32.vlgmr.msra.gmra.mxu1 %vm2243_vm13, %v5032_v63  ;;  %v5390_v62 = vld [vmem:[%s9956_s21 + $0x10] sm:$0xff]  ;;  %v5389_v63 = vld [vmem:[%s9956_s21 + $0x8] sm:$0xff] }
 0xc9a   :  { %6707 = vmatprep.subr.mxu0 %v6824_v45  ;;  %6727 = vmatprep.mubr.msk.f32.mxu0 %vm6825_vm11, %v6824_v45 }
 0xc9b   :  { %6708 = vmatpush3.msra.mxu0 %v6072_v0  ;;  %6730 = vmatprep.subr.mxu1 %v6824_v45  ;;  %v5388_v0 = vld [vmem:[%s9956_s21] sm:$0xff]  ;;  %s6802_s21 = scalar_lea.vmem %s5491_s27, 32 }
 0xc9c   :  { %6709 = vmatprep.subr.mxu0 %v6824_v45  ;;  %6738 = vmatprep.mubr.msk.f32.mxu1 %vm6825_vm11, %v6824_v45  ;;  %p6803_p0 = scmp.ne.s32.totalorder %s5491_s27, %s6802_s21  ;;  %p6808_p2 = scmp.lt.s32.totalorder %s6802_s21, %s6802_s21 }
 0xc9d   :  { %6710 = vmatpush3.msra.mxu0 %v6071_v1  ;;  %6731 = vmatpush3.msra.mxu1 %v5210_v11  ;;  %v6076_v1 = vld [vmem:[%s9986_s9] ss:$0 sm:$0xff] }
 0xc9e   :  { %6711 = vmatprep.subr.mxu0 %v6824_v45  ;;  %6732 = vmatprep.subr.mxu1 %v6824_v45  ;;  %p6809_p3 = por %p6808_p2, %p6807_p1 }
 0xc9f   :  { %6712 = vmatpush3.msra.mxu0 %v6070_v2  ;;  %6733 = vmatpush3.msra.mxu1 %v5209_v13 }
 0xca0   :  { %6713 = vmatprep.subr.mxu0 %v6824_v45  ;;  %6734 = vmatprep.subr.mxu1 %v6824_v45  ;;  %p6810_p4 = pnand %p6809_p3, %p6803_p0 }
 0xca1   :  { %6714 = vmatpush3.msra.mxu0 %v6069_v3  ;;  %6735 = vmatpush3.msra.mxu1 %v5208_v14 }
 0xca2   :  { %6715 = vmatprep.subr.mxu0 %v6824_v45  ;;  %6736 = vmatprep.subr.mxu1 %v6824_v45 }
 0xca3   :  { %6716 = vmatpush3.msra.mxu0 %v6068_v4  ;;  %6737 = vmatpush3.msra.mxu1 %v5207_v15 }
 0xca4   :  { %6717 = vmatprep.subr.mxu0 %v6824_v45  ;;  %6741 = vmatprep.subr.mxu1 %v6824_v45 }
 0xca5   :  { %6718 = vmatpush3.msra.mxu0 %v6067_v5 }
 0xca6   :  { %6719 = vmatprep.subr.mxu0 %v6824_v45 }
 0xca7   :  { %6720 = vmatpush3.msra.mxu0 %v6066_v6  ;;  %v6078_v6 = vld [vmem:[%s9987_s5] ss:$0 sm:$0xff] }
 0xca8   :  { %6721 = vmatprep.subr.mxu0 %v6824_v45 }
 0xca9   :  { %6722 = vmatpush3.msra.mxu0 %v6065_v7 }
 0xcaa   :  { %6723 = vmatprep.subr.mxu0 %v6824_v45 }
 0xcab   :  { %6724 = vmatpush3.msra.mxu0 %v6064_v8 }
 0xcac   :  { %6725 = vmatprep.subr.mxu0 %v6824_v45 }
 0xcad   :  { %6726 = vmatpush3.msra.mxu0 %v6063_v9 }
 0xcae   :  { %6728 = vmatmul.mubr.msk.f32.vlgmr.msra.gmra.mxu0 %vm2243_vm13, %v5117_v10  ;;  %6774 = vmatprep.subr.mxu0 %v6824_v45 }
 0xcaf   :  { %6796 = vmatprep.mubr.msk.f32.mxu0 %vm6825_vm11, %v6824_v45  ;;  %6775 = vmatpush3.msk.msra.mxu0 %vm894_vm3, %v5398_v49 }
 0xcb0   :  { %6776 = vmatprep.subr.mxu0 %v6824_v45 }
 0xcb1   :  { %6777 = vmatpush3.msra.mxu0 %v5397_v50 }
 0xcb2   :  { %6778 = vmatprep.subr.mxu0 %v6824_v45 }
 0xcb3   :  { %6779 = vmatpush3.msra.mxu0 %v5396_v51 }
 0xcb4   :  { %6780 = vmatprep.subr.mxu0 %v6824_v45 }
 0xcb5   :  { %6781 = vmatpush3.msra.mxu0 %v5395_v52 }
 0xcb6   :  { %6782 = vmatprep.subr.mxu0 %v6824_v45 }
 0xcb7   :  { %6783 = vmatpush3.msra.mxu0 %v5394_v53 }
 0xcb8   :  { %6784 = vmatprep.subr.mxu0 %v6824_v45 }
 0xcb9   :  { %6785 = vmatpush3.msra.mxu0 %v5393_v54 }
 0xcba   :  { %6786 = vmatprep.subr.mxu0 %v6824_v45 }
 0xcbb   :  { %6787 = vmatpush3.msra.mxu0 %v5392_v55 }
 0xcbc   :  { %6788 = vmatprep.subr.mxu0 %v6824_v45 }
 0xcbd   :  { %6789 = vmatpush3.msra.mxu0 %v5391_v56 }
 0xcbe   :  { %6790 = vmatprep.subr.mxu0 %v6824_v45 }
 0xcbf   :  { %6791 = vmatpush3.msra.mxu0 %v5390_v62 }
 0xcc0   :  { %6792 = vmatprep.subr.mxu0 %v6824_v45 }
 0xcc1   :  { %6793 = vmatpush3.msra.mxu0 %v5389_v63 }
 0xcc2   :  { %6794 = vmatprep.subr.mxu0 %v6824_v45 }
 0xcc3   :  { %6795 = vmatpush3.msra.mxu0 %v5388_v0 }
 0xd44   :  { %v4870_v16 = vpop.f32.mrf.mxu0  ;;  %v4943_v18 = vpop.f32.mrf.mxu1 }
 0xd45   :  { %v4944_v25 = vadd.f32 %v4943_v18, %v4870_v16 }
 0xd46   :  { %v6637_v19 = vpop.f32.mrf.mxu0  ;;  %v6660_v20 = vpop.f32.mrf.mxu1 }
 0xd59   :  { %v5027_v21 = vpop.f32.mrf.mxu0  ;;  %v5112_v22 = vpop.f32.mrf.mxu1 }
 0xd5a   :  { %v5031_v26 = vadd.f32 %v5027_v21, %v4944_v25 }
 0xd5b   :  { %v6683_v23 = vpop.f32.mrf.mxu0  ;;  %v6706_v24 = vpop.f32.mrf.mxu1 }
 0xd5c   :  { %v5116_v27 = vadd.f32 %v5112_v22, %v5031_v26 }
 0xd6e   :  { %v5197_v28 = vpop.f32.mrf.mxu0 }
 0xd6f   :  { %v5201_v30 = vadd.f32 %v5197_v28, %v5116_v27 }
 0xd70   :  { %v6729_v31 = vpop.f32.mrf.mxu0 }
 0xd71   :  { %v5203_v32 = vadd.f32 %v5202_v29, %v5201_v30 }
 0xd73   :  { %v5204_v33 = vmax.f32 %v5203_v32, 0.0 }
 0xd75   :  { %5205 = vst.msk [vmem:[#allocation5 + $0x1] sm:$0x1] %vm2651_vm14, %v5204_v33 }
 0xd7c   :  { %v5206_v35 = vld [vmem:[#allocation5] sm:$0x3] }
 0xd7d   :  { %6739 = vmatmul.mubr.msk.f32.vlgmr.msra.gmra.mxu1 %vm2053_vm10, %v5206_v35 }
 0xd7e   :  { %6742 = vmatpush3.msra.mxu1 %v5306_v34  ;;  %6771 = vmatprep.mubr.msk.f32.mxu1 %vm6825_vm11, %v6824_v45 }
 0xd7f   :  { %6743 = vmatprep.subr.mxu1 %v6824_v45 }
 0xd80   :  { %6744 = vmatpush3.msra.mxu1 %v5305_v36 }
 0xd81   :  { %6745 = vmatprep.subr.mxu1 %v6824_v45 }
 0xd82   :  { %6746 = vmatpush3.msra.mxu1 %v5304_v37 }
 0xd83   :  { %6747 = vmatprep.subr.mxu1 %v6824_v45 }
 0xd84   :  { %6748 = vmatpush3.msra.mxu1 %v5303_v38 }
 0xd85   :  { %6749 = vmatprep.subr.mxu1 %v6824_v45 }
 0xd86   :  { %6750 = vmatpush3.msra.mxu1 %v5302_v39 }
 0xd87   :  { %6751 = vmatprep.subr.mxu1 %v6824_v45 }
 0xd88   :  { %6752 = vmatpush3.msra.mxu1 %v5301_v40 }
 0xd89   :  { %6753 = vmatprep.subr.mxu1 %v6824_v45 }
 0xd8a   :  { %6754 = vmatpush3.msra.mxu1 %v5300_v41 }
 0xd8b   :  { %6755 = vmatprep.subr.mxu1 %v6824_v45 }
 0xd8c   :  { %6756 = vmatpush3.msra.mxu1 %v5299_v42 }
 0xd8d   :  { %6757 = vmatprep.subr.mxu1 %v6824_v45 }
 0xd8e   :  { %6758 = vmatpush3.msra.mxu1 %v5298_v43 }
 0xd8f   :  { %6759 = vmatprep.subr.mxu1 %v6824_v45 }
 0xd90   :  { %6760 = vmatpush3.msra.mxu1 %v5297_v44 }
 0xd91   :  { %6761 = vmatprep.subr.mxu1 %v6824_v45 }
 0xd92   :  { %6762 = vmatpush3.msra.mxu1 %v5296_v46 }
 0xd93   :  { %6763 = vmatprep.subr.mxu1 %v6824_v45 }
 0xd94   :  { %6764 = vmatpush3.msra.mxu1 %v5295_v17 }
 0xd95   :  { %6765 = vmatprep.subr.mxu1 %v6824_v45 }
 0xd96   :  { %6766 = vmatpush3.msra.mxu1 %v5294_v12 }
 0xd97   :  { %6767 = vmatprep.subr.mxu1 %v6824_v45 }
 0xd98   :  { %6768 = vmatpush3.msra.mxu1 %v5293_v47 }
 0xd99   :  { %6769 = vmatprep.subr.mxu1 %v6824_v45 }
 0xd9a   :  { %6770 = vmatpush3.msra.mxu1 %v5292_v48 }
 0xe3d   :  { %v5287_v58 = vpop.f32.mrf.mxu1 }
 0xe3e   :  { %v5288_v59 = vadd.f32 %v6074_v57, %v5287_v58 }
 0xe3f   :  { %v6740_v60 = vpop.f32.mrf.mxu1 }
 0xe40   :  { %v5291_v61 = vmax.f32 %v5288_v59, 0.0 }
 0xe42   :  { %6772 = vmatmul.mubr.msk.f32.vlgmr.msra.gmra.mxu1 %vm436_vm1, %v5291_v61 }
 0xf02   :  { %v5383_v2 = vpop.f32.mrf.mxu1 }
 0xf03   :  { %v5384_v3 = vadd.f32 %v6076_v1, %v5383_v2 }
 0xf04   :  { %v6773_v4 = vpop.f32.mrf.mxu1 }
 0xf05   :  { %v5387_v5 = vmax.f32 %v5384_v3, 0.0 }
 0xf07   :  { %6797 = vmatmul.mubr.msk.f32.vlgmr.msra.gmra.mxu0 %vm1268_vm6, %v5387_v5 }
 0xfc7   :  { %v5478_v45 = vpop.f32.mrf.mxu0 }
 0xfc8   :  { %v5479_v7 = vadd.f32 %v6078_v6, %v5478_v45 }
 0xfc9   :  { %v6798_v8 = vpop.f32.mrf.mxu0 }
 0xfca   :  { %5483 = vst.msk [vmem:[#allocation6] sm:$0x3] %vm5482_vm15, %v5479_v7 }
 0xfcb   :  { %6813 = shalt.err (!%p6810_p4)
}
 0xfcc   :  { %s9988_s30 = sld [smem:[#allocation19_spill]] }
 0xfd2   :  { %5493 = dma.vmem_to_hbm [thread:$0]  %s5491_s27, 32, %s9988_s30, [#allocation7]  }
 0xfd3   :  { %6822 = dma.done.wait [#allocation7], 32  }
 0xfd4   :  { %6823 = vsyncadd [#allocation7], 4294967264 }
 0xfd5   :  { %5497 = vsyncpa [#allocation7], 1 }

</bundles_post_ra>
